<compile_context>
chip_gen: v7x
topology: tpu7x:2x2x1
jax: 0.10.0
libtpu: 0.0.40
codegen_flags: <defaults>
</compile_context>

<pallas_src>
import functools

import jax
import jax.numpy as jnp
from jax import lax
from jax.experimental import pallas as pl
from jax.experimental.pallas import tpu as pltpu


K_CONV, S_CONV, P_CONV = 7, 2, 3   # conv1 hyper-params (fixed by the module)
K_POOL, S_POOL, P_POOL = 3, 2, 1   # maxpool hyper-params (fixed by the module)
BN_EPS = 1e-5
LANE = 128


def _head_kernel(x_ref, w_ref, shift_ref, o_ref, *, bb, oh, ow, poh, pow_, cin4, cpad):
    """Fused conv (16 accumulated GEMMs) + folded BN + ReLU + vectorized MaxPool.

    x_ref:     (bb, oh+3, ow+3, cin4)  bf16  stride-2 space-to-depth input slab
    w_ref:     (16, cin4, cpad)        f32   conv weight (BN scale folded in;
                                             invalid taps / channels >= Cout are 0)
    shift_ref: (1, cpad)               f32   folded BN shift
    o_ref:     (bb, poh, pow_*cpad)    f32   pooled output, lane-packed (pw, c)
    """
    # --- Conv2d(7x7, stride 2): 16 accumulated GEMMs over the phased slab. ---
    # bf16 is only the HBM/DMA storage dtype; compute is f32 (v5e-friendly).
    x = x_ref[...].astype(jnp.float32)
    w = w_ref[...]
    acc = jnp.zeros((bb * oh * ow, cpad), jnp.float32)
    for dh in range(4):
        for dw in range(4):
            xs = x[:, dh:dh + oh, dw:dw + ow, :].reshape(bb * oh * ow, cin4)
            acc += jnp.dot(xs, w[dh * 4 + dw], preferred_element_type=jnp.float32)

    # --- BatchNorm (eval; scale already folded into w) + ReLU, in f32. ---
    y = jnp.maximum(acc + shift_ref[...], 0.0).reshape(bb, oh, ow, cpad)

    # --- MaxPool2d(3, stride 2, pad 1), fully vectorized. ---
    # Post-ReLU values are >= 0 and every pool window contains a valid element,
    # so zero-padding the border is equivalent to PyTorch's implicit -inf pad.
    ohp, owp = 2 * poh + 1, 2 * pow_ + 1
    wpieces = [jnp.zeros((bb, oh, 1, cpad), jnp.float32), y]
    if owp - 1 - ow:
        wpieces.append(jnp.zeros((bb, oh, owp - 1 - ow, cpad), jnp.float32))
    y = jnp.concatenate(wpieces, axis=2)                       # (bb, oh, owp, cpad)
    hpieces = [jnp.zeros((bb, 1, owp, cpad), jnp.float32), y]
    if ohp - 1 - oh:
        hpieces.append(jnp.zeros((bb, ohp - 1 - oh, owp, cpad), jnp.float32))
    y = jnp.concatenate(hpieces, axis=1)                       # (bb, ohp, owp, cpad)

    # Row direction: even/odd regrouping of a MAJOR axis (layout-free reshape).
    a = y[:, 0:2 * poh].reshape(bb, poh, 2, owp, cpad)         # rows 2p, 2p+1
    b = y[:, 1:2 * poh + 1].reshape(bb, poh, 2, owp, cpad)     # rows 2p+1, 2p+2
    rmax = jnp.maximum(jnp.maximum(a[:, :, 0], a[:, :, 1]), b[:, :, 1])

    # Column direction: short unrolled loop over pooled columns, lane-aligned
    # concat, then ONE bulk lane-dense store of the whole pooled block.
    cols = [jnp.maximum(jnp.maximum(rmax[:, :, 2 * pw], rmax[:, :, 2 * pw + 1]),
                        rmax[:, :, 2 * pw + 2])
            for pw in range(pow_)]                              # each (bb, poh, cpad)
    o_ref[...] = jnp.concatenate(cols, axis=-1)                 # (bb, poh, pow_*cpad)


def eresnet_head_forward(x_nchw, w_oihw, gamma, beta, run_mean, run_var,
                         *, eps=BN_EPS, row_target=1024, vmem_budget_bytes=20 << 20):
    """x: (B, Cin, H, W) NCHW, w: (Cout, Cin, 7, 7).  Returns (B, Cout, PH, PW) NCHW."""
    B, Cin, H, W = x_nchw.shape
    Cout = w_oihw.shape[0]
    OH = (H + 2 * P_CONV - K_CONV) // S_CONV + 1
    OW = (W + 2 * P_CONV - K_CONV) // S_CONV + 1
    POH = (OH + 2 * P_POOL - K_POOL) // S_POOL + 1
    POW = (OW + 2 * P_POOL - K_POOL) // S_POOL + 1
    Cin4 = 4 * Cin
    Cpad = ((Cout + LANE - 1) // LANE) * LANE        # lane-dense GEMM-N / output
    HH, WW = OH + 3, OW + 3                          # phased (stride-2) spatial extents

    # ---- layout plumbing (plain JAX, ~1x input bytes; no HBM im2col) ----
    # NCHW -> NHWC, conv zero-pad by 3, then stride-2 space-to-depth so every
    # 7x7 tap is a contiguous unit-stride slice inside the kernel.
    xh = jnp.transpose(x_nchw, (0, 2, 3, 1))
    xh = jnp.pad(xh, ((0, 0), (P_CONV, P_CONV), (P_CONV, P_CONV), (0, 0)))
    xh = jnp.pad(xh, ((0, 0), (0, 2 * HH - (H + 2 * P_CONV)),
                      (0, 2 * WW - (W + 2 * P_CONV)), (0, 0)))
    xh = xh.reshape(B, HH, 2, WW, 2, Cin).transpose(0, 1, 3, 2, 4, 5)
    x_ph = xh.reshape(B, HH, WW, Cin4).astype(jnp.bfloat16)   # bf16 halves the HBM stream

    # ---- fold eval-mode BN into the conv weight (scale) and a per-channel shift ----
    inv_std = 1.0 / jnp.sqrt(run_var.astype(jnp.float32) + eps)
    scale = gamma.astype(jnp.float32) * inv_std
    shift = beta.astype(jnp.float32) - run_mean.astype(jnp.float32) * scale
    shift = jnp.pad(shift, (0, Cpad - Cout)).reshape(1, Cpad)

    # Conv weight (Cout, Cin, 7, 7) -> (16, 4*Cin, Cpad): tap (kh, kw) = (2dh+ph, 2dw+pw)
    # lives at [dh*4+dw, (ph*2+pw)*Cin + i, o]; kh==7 / kw==7 taps and o >= Cout are 0.
    wf = w_oihw.astype(jnp.float32) * scale[:, None, None, None]
    wf = jnp.pad(wf, ((0, 0), (0, 0), (0, 1), (0, 1)))          # (Cout, Cin, 8, 8)
    wf = wf.reshape(Cout, Cin, 4, 2, 4, 2).transpose(2, 4, 3, 5, 1, 0)
    w_k = jnp.pad(wf.reshape(16, Cin4, Cout), ((0, 0), (0, 0), (0, Cpad - Cout)))

    # ---- batch tiling: ~row_target GEMM rows per step, >=2 steps on the
    # "parallel" axis when B >= 2 (v7x megacore), per-step VMEM under budget ----
    def vmem_bytes(nb):
        slab = nb * HH * WW * Cin4 * 2                  # bf16 input block
        outb = nb * POH * POW * Cpad * 4
        accb = nb * OH * OW * Cpad * 4
        return 2 * (slab + outb) + 16 * Cin4 * Cpad * 4 + 4 * accb

    bb = 1
    for cand in range(1, B + 1):
        if B % cand:
            continue
        if cand > 1 and cand * OH * OW > row_target:
            continue
        if vmem_bytes(cand) > vmem_budget_bytes:
            continue
        if B >= 2 and B // cand < 2:
            continue
        bb = cand
    grid = (B // bb,)

    kern = functools.partial(_head_kernel, bb=bb, oh=OH, ow=OW, poh=POH,
                             pow_=POW, cin4=Cin4, cpad=Cpad)
    flops = 2 * B * OH * OW * K_CONV * K_CONV * Cin * Cout
    bytes_accessed = (x_ph.size * 2 + w_k.size * 4 + shift.size * 4
                      + B * POH * POW * Cpad * 4)

    out = pl.pallas_call(
        kern,
        out_shape=jax.ShapeDtypeStruct((B, POH, POW * Cpad), jnp.float32),
        grid=grid,
        in_specs=[
            pl.BlockSpec((bb, HH, WW, Cin4), lambda i: (i, 0, 0, 0)),  # per-batch-block slab
            pl.BlockSpec((16, Cin4, Cpad), lambda i: (0, 0, 0)),       # weights: grid-invariant
            pl.BlockSpec((1, Cpad), lambda i: (0, 0)),                 # BN shift: grid-invariant
        ],
        out_specs=pl.BlockSpec((bb, POH, POW * Cpad), lambda i: (i, 0, 0)),
        compiler_params=pltpu.CompilerParams(
            dimension_semantics=("parallel",),
            vmem_limit_bytes=32 * 1024 * 1024),
        cost_estimate=pl.CostEstimate(flops=flops, transcendentals=0,
                                      bytes_accessed=bytes_accessed),
    )(x_ph, w_k, shift)

    # Back to the module's NCHW output layout; drop the lane-padding channels.
    out = out.reshape(B, POH, POW, Cpad)[..., :Cout]
    return jnp.transpose(out, (0, 3, 1, 2))


def eresnet_head_reference(x, w, gamma, beta, run_mean, run_var, eps=BN_EPS):
    """Pure-JAX reference: conv -> BN(eval) -> ReLU -> maxpool, NCHW."""
    y = lax.conv_general_dilated(
        x, w, window_strides=(S_CONV, S_CONV),
        padding=((P_CONV, P_CONV), (P_CONV, P_CONV)),
        dimension_numbers=("NCHW", "OIHW", "NCHW"),
        precision=lax.Precision.HIGHEST)
    scale = gamma / jnp.sqrt(run_var + eps)
    shift = beta - run_mean * scale
    y = y * scale[None, :, None, None] + shift[None, :, None, None]
    y = jnp.maximum(y, 0.0)
    y = lax.reduce_window(
        y, -jnp.inf, lax.max,
        window_dimensions=(1, 1, K_POOL, K_POOL),
        window_strides=(1, 1, S_POOL, S_POOL),
        padding=((0, 0), (0, 0), (P_POOL, P_POOL), (P_POOL, P_POOL)))
    return y


if __name__ == "__main__":
    # Small shapes consistent with the module: 8 images, 3 input channels,
    # 16x16 spatial, inplanes=32.  (B=8 -> bb=4, a 2-step "parallel" grid.)
    B, Cin, H, W = 8, 3, 16, 16
    inplanes = 32

    key = jax.random.PRNGKey(0)
    kx, kw, kg, kb, km, kv = jax.random.split(key, 6)
    x = jax.random.normal(kx, (B, Cin, H, W), dtype=jnp.float32)
    fan_in = Cin * K_CONV * K_CONV
    w = jax.random.normal(kw, (inplanes, Cin, K_CONV, K_CONV), jnp.float32) * (2.0 / fan_in) ** 0.5
    gamma = jax.random.uniform(kg, (inplanes,), jnp.float32, 0.5, 1.5)
    beta = 0.1 * jax.random.normal(kb, (inplanes,), jnp.float32)
    run_mean = 0.1 * jax.random.normal(km, (inplanes,), jnp.float32)
    run_var = jax.random.uniform(kv, (inplanes,), jnp.float32, 0.5, 1.5)

    out = jax.jit(eresnet_head_forward)(x, w, gamma, beta, run_mean, run_var)
    out = jax.block_until_ready(out)

    ref = eresnet_head_reference(x, w, gamma, beta, run_mean, run_var)
    assert out.shape == (B, inplanes, 4, 4), out.shape
    # bf16 quantization of the kernel's input DMA stream -> slightly looser tol.
    assert jnp.allclose(out, ref, atol=5e-2, rtol=2e-2), float(jnp.max(jnp.abs(out - ref)))

    print("KERNEL_OK")
</pallas_src>

<mosaic_0001>
module attributes {stable_mosaic.version = 11 : i64} {
  func.func @_head_kernel(%arg0: i32, %arg1: memref<4x11x11x12xbf16, #tpu.memory_space<vmem>>, %arg2: memref<16x12x128xf32, #tpu.memory_space<vmem>>, %arg3: memref<1x128xf32, #tpu.memory_space<vmem>>, %arg4: memref<4x4x512xf32, #tpu.memory_space<vmem>>) attributes {dimension_semantics = [#tpu.dimension_semantics<parallel>], iteration_bounds = array<i64: 2>, scalar_prefetch = 0 : i64, scratch_operands = 0 : i64, tpu.core_type = #tpu.core_type<tc>, window_params = [{transform_indices = @transform_0, window_bounds = array<i64: 4, 11, 11, 12>}, {pipeline_mode = #tpu.pipeline_mode<synchronous>, transform_indices = @transform_1, window_bounds = array<i64: 16, 12, 128>}, {pipeline_mode = #tpu.pipeline_mode<synchronous>, transform_indices = @transform_2, window_bounds = array<i64: 1, 128>}, {transform_indices = @transform_3, window_bounds = array<i64: 4, 4, 512>}]} {
    %c0 = arith.constant 0 : index
    %c0_0 = arith.constant 0 : index
    %c0_1 = arith.constant 0 : index
    %c0_2 = arith.constant 0 : index
    %0 = vector.load %arg1[%c0, %c0_0, %c0_1, %c0_2] : memref<4x11x11x12xbf16, #tpu.memory_space<vmem>>, vector<4x11x11x12xbf16>
    %1 = arith.extf %0 : vector<4x11x11x12xbf16> to vector<4x11x11x12xf32>
    %c0_3 = arith.constant 0 : index
    %c0_4 = arith.constant 0 : index
    %c0_5 = arith.constant 0 : index
    %2 = vector.load %arg2[%c0_3, %c0_4, %c0_5] : memref<16x12x128xf32, #tpu.memory_space<vmem>>, vector<16x12x128xf32>
    %cst = arith.constant 0.000000e+00 : f32
    %3 = vector.broadcast %cst : f32 to vector<256x128xf32>
    %4 = vector.extract_strided_slice %1 {offsets = [0, 0, 0, 0], sizes = [4, 8, 8, 12], strides = [1, 1, 1, 1]} : vector<4x11x11x12xf32> to vector<4x8x8x12xf32>
    %5 = vector.shape_cast %4 : vector<4x8x8x12xf32> to vector<256x12xf32>
    %6 = vector.extract_strided_slice %2 {offsets = [0, 0, 0], sizes = [1, 12, 128], strides = [1, 1, 1]} : vector<16x12x128xf32> to vector<1x12x128xf32>
    %7 = vector.shape_cast %6 : vector<1x12x128xf32> to vector<12x128xf32>
    %cst_6 = arith.constant dense<0.000000e+00> : vector<256x128xf32>
    %8 = tpu.matmul %5, %7, %cst_6 {dimension_numbers = #tpu.dot_dimension_numbers<[1], [0], [0], [1], [0, 0, 1, 1], [], []>} : vector<256x12xf32>, vector<12x128xf32>, vector<256x128xf32> -> vector<256x128xf32>
    %9 = arith.addf %3, %8 : vector<256x128xf32>
    %10 = vector.extract_strided_slice %1 {offsets = [0, 0, 1, 0], sizes = [4, 8, 8, 12], strides = [1, 1, 1, 1]} : vector<4x11x11x12xf32> to vector<4x8x8x12xf32>
    %11 = vector.shape_cast %10 : vector<4x8x8x12xf32> to vector<256x12xf32>
    %12 = vector.extract_strided_slice %2 {offsets = [1, 0, 0], sizes = [1, 12, 128], strides = [1, 1, 1]} : vector<16x12x128xf32> to vector<1x12x128xf32>
    %13 = vector.shape_cast %12 : vector<1x12x128xf32> to vector<12x128xf32>
    %cst_7 = arith.constant dense<0.000000e+00> : vector<256x128xf32>
    %14 = tpu.matmul %11, %13, %cst_7 {dimension_numbers = #tpu.dot_dimension_numbers<[1], [0], [0], [1], [0, 0, 1, 1], [], []>} : vector<256x12xf32>, vector<12x128xf32>, vector<256x128xf32> -> vector<256x128xf32>
    %15 = arith.addf %9, %14 : vector<256x128xf32>
    %16 = vector.extract_strided_slice %1 {offsets = [0, 0, 2, 0], sizes = [4, 8, 8, 12], strides = [1, 1, 1, 1]} : vector<4x11x11x12xf32> to vector<4x8x8x12xf32>
    %17 = vector.shape_cast %16 : vector<4x8x8x12xf32> to vector<256x12xf32>
    %18 = vector.extract_strided_slice %2 {offsets = [2, 0, 0], sizes = [1, 12, 128], strides = [1, 1, 1]} : vector<16x12x128xf32> to vector<1x12x128xf32>
    %19 = vector.shape_cast %18 : vector<1x12x128xf32> to vector<12x128xf32>
    %cst_8 = arith.constant dense<0.000000e+00> : vector<256x128xf32>
    %20 = tpu.matmul %17, %19, %cst_8 {dimension_numbers = #tpu.dot_dimension_numbers<[1], [0], [0], [1], [0, 0, 1, 1], [], []>} : vector<256x12xf32>, vector<12x128xf32>, vector<256x128xf32> -> vector<256x128xf32>
    %21 = arith.addf %15, %20 : vector<256x128xf32>
    %22 = vector.extract_strided_slice %1 {offsets = [0, 0, 3, 0], sizes = [4, 8, 8, 12], strides = [1, 1, 1, 1]} : vector<4x11x11x12xf32> to vector<4x8x8x12xf32>
    %23 = vector.shape_cast %22 : vector<4x8x8x12xf32> to vector<256x12xf32>
    %24 = vector.extract_strided_slice %2 {offsets = [3, 0, 0], sizes = [1, 12, 128], strides = [1, 1, 1]} : vector<16x12x128xf32> to vector<1x12x128xf32>
    %25 = vector.shape_cast %24 : vector<1x12x128xf32> to vector<12x128xf32>
    %cst_9 = arith.constant dense<0.000000e+00> : vector<256x128xf32>
    %26 = tpu.matmul %23, %25, %cst_9 {dimension_numbers = #tpu.dot_dimension_numbers<[1], [0], [0], [1], [0, 0, 1, 1], [], []>} : vector<256x12xf32>, vector<12x128xf32>, vector<256x128xf32> -> vector<256x128xf32>
    %27 = arith.addf %21, %26 : vector<256x128xf32>
    %28 = vector.extract_strided_slice %1 {offsets = [0, 1, 0, 0], sizes = [4, 8, 8, 12], strides = [1, 1, 1, 1]} : vector<4x11x11x12xf32> to vector<4x8x8x12xf32>
    %29 = vector.shape_cast %28 : vector<4x8x8x12xf32> to vector<256x12xf32>
    %30 = vector.extract_strided_slice %2 {offsets = [4, 0, 0], sizes = [1, 12, 128], strides = [1, 1, 1]} : vector<16x12x128xf32> to vector<1x12x128xf32>
    %31 = vector.shape_cast %30 : vector<1x12x128xf32> to vector<12x128xf32>
    %cst_10 = arith.constant dense<0.000000e+00> : vector<256x128xf32>
    %32 = tpu.matmul %29, %31, %cst_10 {dimension_numbers = #tpu.dot_dimension_numbers<[1], [0], [0], [1], [0, 0, 1, 1], [], []>} : vector<256x12xf32>, vector<12x128xf32>, vector<256x128xf32> -> vector<256x128xf32>
    %33 = arith.addf %27, %32 : vector<256x128xf32>
    %34 = vector.extract_strided_slice %1 {offsets = [0, 1, 1, 0], sizes = [4, 8, 8, 12], strides = [1, 1, 1, 1]} : vector<4x11x11x12xf32> to vector<4x8x8x12xf32>
    %35 = vector.shape_cast %34 : vector<4x8x8x12xf32> to vector<256x12xf32>
    %36 = vector.extract_strided_slice %2 {offsets = [5, 0, 0], sizes = [1, 12, 128], strides = [1, 1, 1]} : vector<16x12x128xf32> to vector<1x12x128xf32>
    %37 = vector.shape_cast %36 : vector<1x12x128xf32> to vector<12x128xf32>
    %cst_11 = arith.constant dense<0.000000e+00> : vector<256x128xf32>
    %38 = tpu.matmul %35, %37, %cst_11 {dimension_numbers = #tpu.dot_dimension_numbers<[1], [0], [0], [1], [0, 0, 1, 1], [], []>} : vector<256x12xf32>, vector<12x128xf32>, vector<256x128xf32> -> vector<256x128xf32>
    %39 = arith.addf %33, %38 : vector<256x128xf32>
    %40 = vector.extract_strided_slice %1 {offsets = [0, 1, 2, 0], sizes = [4, 8, 8, 12], strides = [1, 1, 1, 1]} : vector<4x11x11x12xf32> to vector<4x8x8x12xf32>
    %41 = vector.shape_cast %40 : vector<4x8x8x12xf32> to vector<256x12xf32>
    %42 = vector.extract_strided_slice %2 {offsets = [6, 0, 0], sizes = [1, 12, 128], strides = [1, 1, 1]} : vector<16x12x128xf32> to vector<1x12x128xf32>
    %43 = vector.shape_cast %42 : vector<1x12x128xf32> to vector<12x128xf32>
    %cst_12 = arith.constant dense<0.000000e+00> : vector<256x128xf32>
    %44 = tpu.matmul %41, %43, %cst_12 {dimension_numbers = #tpu.dot_dimension_numbers<[1], [0], [0], [1], [0, 0, 1, 1], [], []>} : vector<256x12xf32>, vector<12x128xf32>, vector<256x128xf32> -> vector<256x128xf32>
    %45 = arith.addf %39, %44 : vector<256x128xf32>
    %46 = vector.extract_strided_slice %1 {offsets = [0, 1, 3, 0], sizes = [4, 8, 8, 12], strides = [1, 1, 1, 1]} : vector<4x11x11x12xf32> to vector<4x8x8x12xf32>
    %47 = vector.shape_cast %46 : vector<4x8x8x12xf32> to vector<256x12xf32>
    %48 = vector.extract_strided_slice %2 {offsets = [7, 0, 0], sizes = [1, 12, 128], strides = [1, 1, 1]} : vector<16x12x128xf32> to vector<1x12x128xf32>
    %49 = vector.shape_cast %48 : vector<1x12x128xf32> to vector<12x128xf32>
    %cst_13 = arith.constant dense<0.000000e+00> : vector<256x128xf32>
    %50 = tpu.matmul %47, %49, %cst_13 {dimension_numbers = #tpu.dot_dimension_numbers<[1], [0], [0], [1], [0, 0, 1, 1], [], []>} : vector<256x12xf32>, vector<12x128xf32>, vector<256x128xf32> -> vector<256x128xf32>
    %51 = arith.addf %45, %50 : vector<256x128xf32>
    %52 = vector.extract_strided_slice %1 {offsets = [0, 2, 0, 0], sizes = [4, 8, 8, 12], strides = [1, 1, 1, 1]} : vector<4x11x11x12xf32> to vector<4x8x8x12xf32>
    %53 = vector.shape_cast %52 : vector<4x8x8x12xf32> to vector<256x12xf32>
    %54 = vector.extract_strided_slice %2 {offsets = [8, 0, 0], sizes = [1, 12, 128], strides = [1, 1, 1]} : vector<16x12x128xf32> to vector<1x12x128xf32>
    %55 = vector.shape_cast %54 : vector<1x12x128xf32> to vector<12x128xf32>
    %cst_14 = arith.constant dense<0.000000e+00> : vector<256x128xf32>
    %56 = tpu.matmul %53, %55, %cst_14 {dimension_numbers = #tpu.dot_dimension_numbers<[1], [0], [0], [1], [0, 0, 1, 1], [], []>} : vector<256x12xf32>, vector<12x128xf32>, vector<256x128xf32> -> vector<256x128xf32>
    %57 = arith.addf %51, %56 : vector<256x128xf32>
    %58 = vector.extract_strided_slice %1 {offsets = [0, 2, 1, 0], sizes = [4, 8, 8, 12], strides = [1, 1, 1, 1]} : vector<4x11x11x12xf32> to vector<4x8x8x12xf32>
    %59 = vector.shape_cast %58 : vector<4x8x8x12xf32> to vector<256x12xf32>
    %60 = vector.extract_strided_slice %2 {offsets = [9, 0, 0], sizes = [1, 12, 128], strides = [1, 1, 1]} : vector<16x12x128xf32> to vector<1x12x128xf32>
    %61 = vector.shape_cast %60 : vector<1x12x128xf32> to vector<12x128xf32>
    %cst_15 = arith.constant dense<0.000000e+00> : vector<256x128xf32>
    %62 = tpu.matmul %59, %61, %cst_15 {dimension_numbers = #tpu.dot_dimension_numbers<[1], [0], [0], [1], [0, 0, 1, 1], [], []>} : vector<256x12xf32>, vector<12x128xf32>, vector<256x128xf32> -> vector<256x128xf32>
    %63 = arith.addf %57, %62 : vector<256x128xf32>
    %64 = vector.extract_strided_slice %1 {offsets = [0, 2, 2, 0], sizes = [4, 8, 8, 12], strides = [1, 1, 1, 1]} : vector<4x11x11x12xf32> to vector<4x8x8x12xf32>
    %65 = vector.shape_cast %64 : vector<4x8x8x12xf32> to vector<256x12xf32>
    %66 = vector.extract_strided_slice %2 {offsets = [10, 0, 0], sizes = [1, 12, 128], strides = [1, 1, 1]} : vector<16x12x128xf32> to vector<1x12x128xf32>
    %67 = vector.shape_cast %66 : vector<1x12x128xf32> to vector<12x128xf32>
    %cst_16 = arith.constant dense<0.000000e+00> : vector<256x128xf32>
    %68 = tpu.matmul %65, %67, %cst_16 {dimension_numbers = #tpu.dot_dimension_numbers<[1], [0], [0], [1], [0, 0, 1, 1], [], []>} : vector<256x12xf32>, vector<12x128xf32>, vector<256x128xf32> -> vector<256x128xf32>
    %69 = arith.addf %63, %68 : vector<256x128xf32>
    %70 = vector.extract_strided_slice %1 {offsets = [0, 2, 3, 0], sizes = [4, 8, 8, 12], strides = [1, 1, 1, 1]} : vector<4x11x11x12xf32> to vector<4x8x8x12xf32>
    %71 = vector.shape_cast %70 : vector<4x8x8x12xf32> to vector<256x12xf32>
    %72 = vector.extract_strided_slice %2 {offsets = [11, 0, 0], sizes = [1, 12, 128], strides = [1, 1, 1]} : vector<16x12x128xf32> to vector<1x12x128xf32>
    %73 = vector.shape_cast %72 : vector<1x12x128xf32> to vector<12x128xf32>
    %cst_17 = arith.constant dense<0.000000e+00> : vector<256x128xf32>
    %74 = tpu.matmul %71, %73, %cst_17 {dimension_numbers = #tpu.dot_dimension_numbers<[1], [0], [0], [1], [0, 0, 1, 1], [], []>} : vector<256x12xf32>, vector<12x128xf32>, vector<256x128xf32> -> vector<256x128xf32>
    %75 = arith.addf %69, %74 : vector<256x128xf32>
    %76 = vector.extract_strided_slice %1 {offsets = [0, 3, 0, 0], sizes = [4, 8, 8, 12], strides = [1, 1, 1, 1]} : vector<4x11x11x12xf32> to vector<4x8x8x12xf32>
    %77 = vector.shape_cast %76 : vector<4x8x8x12xf32> to vector<256x12xf32>
    %78 = vector.extract_strided_slice %2 {offsets = [12, 0, 0], sizes = [1, 12, 128], strides = [1, 1, 1]} : vector<16x12x128xf32> to vector<1x12x128xf32>
    %79 = vector.shape_cast %78 : vector<1x12x128xf32> to vector<12x128xf32>
    %cst_18 = arith.constant dense<0.000000e+00> : vector<256x128xf32>
    %80 = tpu.matmul %77, %79, %cst_18 {dimension_numbers = #tpu.dot_dimension_numbers<[1], [0], [0], [1], [0, 0, 1, 1], [], []>} : vector<256x12xf32>, vector<12x128xf32>, vector<256x128xf32> -> vector<256x128xf32>
    %81 = arith.addf %75, %80 : vector<256x128xf32>
    %82 = vector.extract_strided_slice %1 {offsets = [0, 3, 1, 0], sizes = [4, 8, 8, 12], strides = [1, 1, 1, 1]} : vector<4x11x11x12xf32> to vector<4x8x8x12xf32>
    %83 = vector.shape_cast %82 : vector<4x8x8x12xf32> to vector<256x12xf32>
    %84 = vector.extract_strided_slice %2 {offsets = [13, 0, 0], sizes = [1, 12, 128], strides = [1, 1, 1]} : vector<16x12x128xf32> to vector<1x12x128xf32>
    %85 = vector.shape_cast %84 : vector<1x12x128xf32> to vector<12x128xf32>
    %cst_19 = arith.constant dense<0.000000e+00> : vector<256x128xf32>
    %86 = tpu.matmul %83, %85, %cst_19 {dimension_numbers = #tpu.dot_dimension_numbers<[1], [0], [0], [1], [0, 0, 1, 1], [], []>} : vector<256x12xf32>, vector<12x128xf32>, vector<256x128xf32> -> vector<256x128xf32>
    %87 = arith.addf %81, %86 : vector<256x128xf32>
    %88 = vector.extract_strided_slice %1 {offsets = [0, 3, 2, 0], sizes = [4, 8, 8, 12], strides = [1, 1, 1, 1]} : vector<4x11x11x12xf32> to vector<4x8x8x12xf32>
    %89 = vector.shape_cast %88 : vector<4x8x8x12xf32> to vector<256x12xf32>
    %90 = vector.extract_strided_slice %2 {offsets = [14, 0, 0], sizes = [1, 12, 128], strides = [1, 1, 1]} : vector<16x12x128xf32> to vector<1x12x128xf32>
    %91 = vector.shape_cast %90 : vector<1x12x128xf32> to vector<12x128xf32>
    %cst_20 = arith.constant dense<0.000000e+00> : vector<256x128xf32>
    %92 = tpu.matmul %89, %91, %cst_20 {dimension_numbers = #tpu.dot_dimension_numbers<[1], [0], [0], [1], [0, 0, 1, 1], [], []>} : vector<256x12xf32>, vector<12x128xf32>, vector<256x128xf32> -> vector<256x128xf32>
    %93 = arith.addf %87, %92 : vector<256x128xf32>
    %94 = vector.extract_strided_slice %1 {offsets = [0, 3, 3, 0], sizes = [4, 8, 8, 12], strides = [1, 1, 1, 1]} : vector<4x11x11x12xf32> to vector<4x8x8x12xf32>
    %95 = vector.shape_cast %94 : vector<4x8x8x12xf32> to vector<256x12xf32>
    %96 = vector.extract_strided_slice %2 {offsets = [15, 0, 0], sizes = [1, 12, 128], strides = [1, 1, 1]} : vector<16x12x128xf32> to vector<1x12x128xf32>
    %97 = vector.shape_cast %96 : vector<1x12x128xf32> to vector<12x128xf32>
    %cst_21 = arith.constant dense<0.000000e+00> : vector<256x128xf32>
    %98 = tpu.matmul %95, %97, %cst_21 {dimension_numbers = #tpu.dot_dimension_numbers<[1], [0], [0], [1], [0, 0, 1, 1], [], []>} : vector<256x12xf32>, vector<12x128xf32>, vector<256x128xf32> -> vector<256x128xf32>
    %99 = arith.addf %93, %98 : vector<256x128xf32>
    %c0_22 = arith.constant 0 : index
    %c0_23 = arith.constant 0 : index
    %100 = vector.load %arg3[%c0_22, %c0_23] : memref<1x128xf32, #tpu.memory_space<vmem>>, vector<1x128xf32>
    %101 = vector.broadcast %100 : vector<1x128xf32> to vector<256x128xf32>
    %102 = arith.addf %99, %101 : vector<256x128xf32>
    %cst_24 = arith.constant 0.000000e+00 : f32
    %103 = vector.broadcast %cst_24 : f32 to vector<256x128xf32>
    %104 = arith.maximumf %102, %103 : vector<256x128xf32>
    %105 = vector.shape_cast %104 : vector<256x128xf32> to vector<4x8x8x128xf32>
    %cst_25 = arith.constant 0.000000e+00 : f32
    %106 = vector.broadcast %cst_25 : f32 to vector<4x8x1x128xf32>
    %107 = tpu.concatenate %106, %105 in 2 : vector<4x8x1x128xf32>, vector<4x8x8x128xf32> -> vector<4x8x9x128xf32>
    %cst_26 = arith.constant 0.000000e+00 : f32
    %108 = vector.broadcast %cst_26 : f32 to vector<4x1x9x128xf32>
    %109 = tpu.concatenate %108, %107 in 1 : vector<4x1x9x128xf32>, vector<4x8x9x128xf32> -> vector<4x9x9x128xf32>
    %110 = vector.extract_strided_slice %109 {offsets = [0, 0, 0, 0], sizes = [4, 8, 9, 128], strides = [1, 1, 1, 1]} : vector<4x9x9x128xf32> to vector<4x8x9x128xf32>
    %111 = vector.shape_cast %110 : vector<4x8x9x128xf32> to vector<4x4x2x9x128xf32>
    %112 = vector.extract_strided_slice %109 {offsets = [0, 1, 0, 0], sizes = [4, 8, 9, 128], strides = [1, 1, 1, 1]} : vector<4x9x9x128xf32> to vector<4x8x9x128xf32>
    %113 = vector.shape_cast %112 : vector<4x8x9x128xf32> to vector<4x4x2x9x128xf32>
    %114 = vector.extract_strided_slice %111 {offsets = [0, 0, 0, 0, 0], sizes = [4, 4, 1, 9, 128], strides = [1, 1, 1, 1, 1]} : vector<4x4x2x9x128xf32> to vector<4x4x1x9x128xf32>
    %115 = vector.shape_cast %114 : vector<4x4x1x9x128xf32> to vector<4x4x9x128xf32>
    %116 = vector.extract_strided_slice %111 {offsets = [0, 0, 1, 0, 0], sizes = [4, 4, 1, 9, 128], strides = [1, 1, 1, 1, 1]} : vector<4x4x2x9x128xf32> to vector<4x4x1x9x128xf32>
    %117 = vector.shape_cast %116 : vector<4x4x1x9x128xf32> to vector<4x4x9x128xf32>
    %118 = arith.maximumf %115, %117 : vector<4x4x9x128xf32>
    %119 = vector.extract_strided_slice %113 {offsets = [0, 0, 1, 0, 0], sizes = [4, 4, 1, 9, 128], strides = [1, 1, 1, 1, 1]} : vector<4x4x2x9x128xf32> to vector<4x4x1x9x128xf32>
    %120 = vector.shape_cast %119 : vector<4x4x1x9x128xf32> to vector<4x4x9x128xf32>
    %121 = arith.maximumf %118, %120 : vector<4x4x9x128xf32>
    %122 = vector.extract_strided_slice %121 {offsets = [0, 0, 0, 0], sizes = [4, 4, 1, 128], strides = [1, 1, 1, 1]} : vector<4x4x9x128xf32> to vector<4x4x1x128xf32>
    %123 = vector.shape_cast %122 : vector<4x4x1x128xf32> to vector<4x4x128xf32>
    %124 = vector.extract_strided_slice %121 {offsets = [0, 0, 1, 0], sizes = [4, 4, 1, 128], strides = [1, 1, 1, 1]} : vector<4x4x9x128xf32> to vector<4x4x1x128xf32>
    %125 = vector.shape_cast %124 : vector<4x4x1x128xf32> to vector<4x4x128xf32>
    %126 = arith.maximumf %123, %125 : vector<4x4x128xf32>
    %127 = vector.extract_strided_slice %121 {offsets = [0, 0, 2, 0], sizes = [4, 4, 1, 128], strides = [1, 1, 1, 1]} : vector<4x4x9x128xf32> to vector<4x4x1x128xf32>
    %128 = vector.shape_cast %127 : vector<4x4x1x128xf32> to vector<4x4x128xf32>
    %129 = arith.maximumf %126, %128 : vector<4x4x128xf32>
    %130 = vector.extract_strided_slice %121 {offsets = [0, 0, 2, 0], sizes = [4, 4, 1, 128], strides = [1, 1, 1, 1]} : vector<4x4x9x128xf32> to vector<4x4x1x128xf32>
    %131 = vector.shape_cast %130 : vector<4x4x1x128xf32> to vector<4x4x128xf32>
    %132 = vector.extract_strided_slice %121 {offsets = [0, 0, 3, 0], sizes = [4, 4, 1, 128], strides = [1, 1, 1, 1]} : vector<4x4x9x128xf32> to vector<4x4x1x128xf32>
    %133 = vector.shape_cast %132 : vector<4x4x1x128xf32> to vector<4x4x128xf32>
    %134 = arith.maximumf %131, %133 : vector<4x4x128xf32>
    %135 = vector.extract_strided_slice %121 {offsets = [0, 0, 4, 0], sizes = [4, 4, 1, 128], strides = [1, 1, 1, 1]} : vector<4x4x9x128xf32> to vector<4x4x1x128xf32>
    %136 = vector.shape_cast %135 : vector<4x4x1x128xf32> to vector<4x4x128xf32>
    %137 = arith.maximumf %134, %136 : vector<4x4x128xf32>
    %138 = vector.extract_strided_slice %121 {offsets = [0, 0, 4, 0], sizes = [4, 4, 1, 128], strides = [1, 1, 1, 1]} : vector<4x4x9x128xf32> to vector<4x4x1x128xf32>
    %139 = vector.shape_cast %138 : vector<4x4x1x128xf32> to vector<4x4x128xf32>
    %140 = vector.extract_strided_slice %121 {offsets = [0, 0, 5, 0], sizes = [4, 4, 1, 128], strides = [1, 1, 1, 1]} : vector<4x4x9x128xf32> to vector<4x4x1x128xf32>
    %141 = vector.shape_cast %140 : vector<4x4x1x128xf32> to vector<4x4x128xf32>
    %142 = arith.maximumf %139, %141 : vector<4x4x128xf32>
    %143 = vector.extract_strided_slice %121 {offsets = [0, 0, 6, 0], sizes = [4, 4, 1, 128], strides = [1, 1, 1, 1]} : vector<4x4x9x128xf32> to vector<4x4x1x128xf32>
    %144 = vector.shape_cast %143 : vector<4x4x1x128xf32> to vector<4x4x128xf32>
    %145 = arith.maximumf %142, %144 : vector<4x4x128xf32>
    %146 = vector.extract_strided_slice %121 {offsets = [0, 0, 6, 0], sizes = [4, 4, 1, 128], strides = [1, 1, 1, 1]} : vector<4x4x9x128xf32> to vector<4x4x1x128xf32>
    %147 = vector.shape_cast %146 : vector<4x4x1x128xf32> to vector<4x4x128xf32>
    %148 = vector.extract_strided_slice %121 {offsets = [0, 0, 7, 0], sizes = [4, 4, 1, 128], strides = [1, 1, 1, 1]} : vector<4x4x9x128xf32> to vector<4x4x1x128xf32>
    %149 = vector.shape_cast %148 : vector<4x4x1x128xf32> to vector<4x4x128xf32>
    %150 = arith.maximumf %147, %149 : vector<4x4x128xf32>
    %151 = vector.extract_strided_slice %121 {offsets = [0, 0, 8, 0], sizes = [4, 4, 1, 128], strides = [1, 1, 1, 1]} : vector<4x4x9x128xf32> to vector<4x4x1x128xf32>
    %152 = vector.shape_cast %151 : vector<4x4x1x128xf32> to vector<4x4x128xf32>
    %153 = arith.maximumf %150, %152 : vector<4x4x128xf32>
    %154 = tpu.concatenate %129, %137, %145, %153 in 2 : vector<4x4x128xf32>, vector<4x4x128xf32>, vector<4x4x128xf32>, vector<4x4x128xf32> -> vector<4x4x512xf32>
    %c0_27 = arith.constant 0 : index
    %c0_28 = arith.constant 0 : index
    %c0_29 = arith.constant 0 : index
    %155 = vector.load %arg4[%c0_27, %c0_28, %c0_29] : memref<4x4x512xf32, #tpu.memory_space<vmem>>, vector<4x4x512xf32>
    tpu.vector_store %arg4[%c0_27, %c0_28, %c0_29], %154 {strides = array<i32>} : memref<4x4x512xf32, #tpu.memory_space<vmem>>, vector<4x4x512xf32>,
    return
  }
  func.func @transform_0(%arg0: i32) -> (i32, i32, i32, i32) {
    %c0_i32 = arith.constant 0 : i32
    %c0_i32_0 = arith.constant 0 : i32
    %c0_i32_1 = arith.constant 0 : i32
    %c0_i32_2 = arith.constant 0 : i32
    return %arg0, %c0_i32, %c0_i32_0, %c0_i32_1 : i32, i32, i32, i32
  }
  func.func @transform_1(%arg0: i32) -> (i32, i32, i32) {
    %c0_i32 = arith.constant 0 : i32
    %c0_i32_0 = arith.constant 0 : i32
    %c0_i32_1 = arith.constant 0 : i32
    %c0_i32_2 = arith.constant 0 : i32
    return %c0_i32, %c0_i32_0, %c0_i32_1 : i32, i32, i32
  }
  func.func @transform_2(%arg0: i32) -> (i32, i32) {
    %c0_i32 = arith.constant 0 : i32
    %c0_i32_0 = arith.constant 0 : i32
    %c0_i32_1 = arith.constant 0 : i32
    return %c0_i32, %c0_i32_0 : i32, i32
  }
  func.func @transform_3(%arg0: i32) -> (i32, i32, i32) {
    %c0_i32 = arith.constant 0 : i32
    %c0_i32_0 = arith.constant 0 : i32
    %c0_i32_1 = arith.constant 0 : i32
    return %arg0, %c0_i32, %c0_i32_0 : i32, i32, i32
  }
}

</mosaic_0001>

<bundles_post_ra>
// kernel: eresnet_head_forward.1
= control target key start
LH: loop header
LB: loop body
LE: loop exit
PB: predicated region body
PF: predicated region fallthrough
CT: control target
= control target key end

     0   :  { %s8518_s12 = smov 0   ;;  %s10873_s0 = inlined_call_operand.vmem [shape: bf16[8,11,11,12], index: 0, kind: input, shape index: {}]   ;;  %s10874_s1 = inlined_call_operand.vmem [shape: f32[16,12,128], index: 1, kind: input, shape index: {}]   ;;  %s10875_s2 = inlined_call_operand.vmem [shape: f32[1,128], index: 2, kind: input, shape index: {}]   ;;  %s10876_s3 = inlined_call_operand.vmem [shape: f32[8,4,512], index: 3, kind: output, shape index: {}]  }
   0x1 LB: > { %s5985_s13 = sadd.s32 4294967295, %s8495_s12   ;;  %p5989_p0 = scmp.ge.s32.totalorder %s8495_s12, 1  ;;  %s8495_s12 = sphi %s8518_s12, %s13_s12  }
   0x2   : > { %p139_p1 = scmp.lt.s32.totalorder %s8495_s12, 3 }
   0x4   : > { %p140_p2 = pnand %p5989_p0, %p139_p1 }
   0x6   : > { %143 = sbr.rel (%p140_p2) target bundleno = 808 (0x328), region = 32 }
   0xd   : > { %v371_v0 = vld [vmem:[%s10874_s1 + $0x80] sm:$0xff]  ;;  %v372_v1 = vld [vmem:[%s10874_s1 + $0x88] sm:$0xf]  ;;  %vm613_vm0 = vcmask 1043456   ;;  %v357_v2 = vld [vmem:[%s10874_s1 + $0x10] sm:$0xff]  ;;  %vm8497_vm1 = vmmov 1  }
   0xe   : > { %vm8535_vm2 = vmpackc.low %vm613_vm0, %vm8497_vm1  ;;  %v7951_v4 = vpack.c.bf16 %v372_v1, %v371_v0  ;;  %v358_v5 = vld [vmem:[%s10874_s1 + $0x18] sm:$0xf]  ;;  %s5990_s22 = sshll.u32 %s5985_s13, 2  ;;  %v355_v6 = vld [vmem:[%s10874_s1] sm:$0xff]  ;;  %vm548_vm3 = vcmask 97280   ;;  %vm451_vm4 = vcmask 1046528  }
   0xf   : > { %v7903_v7 = vpack.c.bf16 %v358_v5, %v357_v2  ;;  %p166_p3 = scmp.lt.s32.totalorder %s5990_s22, 7  ;;  %v356_v8 = vld [vmem:[%s10874_s1 + $0x8] sm:$0xf]  ;;  %v373_v9 = vld [vmem:[%s10874_s1 + $0x90] sm:$0xff]  ;;  %v374_v10 = vld [vmem:[%s10874_s1 + $0x98] sm:$0xf] }
  0x10   : > { %7953 = vmatprep.subr.msk.bf16.mxu0 %vm8535_vm2, %v7951_v4  ;;  %v8556_v11 = vpack.c.bf16 %v356_v8, %v355_v6  ;;  %v7957_v12 = vpack.c.bf16 %v374_v10, %v373_v9  ;;  %v375_v13 = vld [vmem:[%s10874_s1 + $0xa0] sm:$0xff]  ;;  %v376_v14 = vld [vmem:[%s10874_s1 + $0xa8] sm:$0xf]  ;;  %vm1134_vm5 = vcmask 1045504   ;;  %vm1555_vm6 = vcmask 1044480  }
  0x11   : > { %7956 = vmatpush3.bf16.msk.msra.mxu0 %vm8535_vm2, %v7951_v4  ;;  %7905 = vmatprep.subr.msk.bf16.mxu1 %vm8535_vm2, %v7903_v7  ;;  %s11483_s22 = smov (!%p166_p3, %s5990_s22), 7  ;;  %v359_v18 = vld [vmem:[%s10874_s1 + $0x20] sm:$0xff]  ;;  %v8589_v19 = vpack.c.bf16 %v376_v14, %v375_v13  ;;  %v360_v33 = vld [vmem:[%s10874_s1 + $0x28] sm:$0xf]  ;;  %vm5491_vm7 = vcmask 1040384   ;;  %vm5781_vm8 = vcmask 1041409  }
  0x12   : > { %7908 = vmatpush3.bf16.msk.msra.mxu1 %vm8535_vm2, %v7903_v7  ;;  %7959 = vmatprep.subr.msk.bf16.mxu0 %vm8535_vm2, %v7957_v12  ;;  %s8479_s4 = smul.u32 88, %s11483_s22  ;;  %v8640_v48 = vpack.c.bf16 %v360_v33, %v359_v18  ;;  %vm5784_vm9 = vcmask 1042434   ;;  %vm5787_vm10 = vcmask 1043459   ;;  %s6526_s8 = sshll.u32 %s11483_s22, 4 }
  0x13   : > { %7911 = vmatprep.subr.msk.bf16.mxu1 %vm8535_vm2, %v8556_v11  ;;  %s10688_s10 = scalar_lea.vmem %s10876_s3, %s6526_s8 }
  0x14   : > { %s8581_s11 = scalar_lea.vmem %s10873_s0, %s8479_s4 }
  0x15   : > { %v183_v15 = vld [vmem:[%s8581_s11 + $0x10] ss:$8 sps:$4 sm:$0xff]   ;;  %v179_v16 = vld [vmem:[%s8581_s11] ss:$8 sps:$4 sm:$0xff]   ;;  %v180_v17 = vld [vmem:[%s8581_s11 + $0x4] sm:$0x3] }
  0x16   : > { %v8591_v20 = vunpack.c.l.bf16 %v183_v15  ;;  %v8593_v21 = vunpack.c.h.bf16 %v183_v15  ;;  %v8595_v22 = vunpack.c.l.bf16 %v179_v16  ;;  %v8597_v23 = vunpack.c.l.bf16 %v180_v17  ;;  %v182_v24 = vld [vmem:[%s8581_s11 + $0xc] sm:$0x3]  ;;  %v187_v25 = vld [vmem:[%s8581_s11 + $0x20] ss:$8 sps:$4 sm:$0xff]   ;;  %v184_v26 = vld [vmem:[%s8581_s11 + $0x14] sm:$0x3] }
  0x17   : > { %v8602_v27 = vunpack.c.h.bf16 %v179_v16  ;;  %v8604_v28 = vunpack.c.l.bf16 %v182_v24  ;;  %v8606_v29 = vunpack.c.l.bf16 %v187_v25  ;;  %v8608_v30 = vunpack.c.h.bf16 %v187_v25  ;;  %v186_v31 = vld [vmem:[%s8581_s11 + $0x1c] sm:$0x3]  ;;  %v191_v32 = vld [vmem:[%s8581_s11 + $0x30] ss:$8 sps:$4 sm:$0xff]   ;;  %v188_v38 = vld [vmem:[%s8581_s11 + $0x24] sm:$0x3] }
  0x18   : > { %11152 = vst [vmem:[#allocation2_spill] sm:$0xff] %v8591_v20  ;;  %11153 = vst [vmem:[#allocation3_spill] sm:$0xff] %v8593_v21  ;;  %7491 = vmatprep.mubr.msk.f32.mxu0 %vm548_vm3, %v8591_v20  ;;  %v452_v34 = vrot.slane %v8595_v22, 1  ;;  %v453_v35 = vrot.slane %v8597_v23, 1  ;;  %v8619_v36 = vunpack.c.l.bf16 %v184_v26  ;;  %v458_v37 = vrot.slane %v8591_v20, 1 }
  0x19   : > { %11154 = vst [vmem:[#allocation4_spill] sm:$0xff] %v8595_v22  ;;  %11155 = vst [vmem:[#allocation5_spill] sm:$0xff] %v8597_v23  ;;  %7492 = vmatmul.mubr.msk.f32.vlgmr.msra.gmra.mrb[0].mxu0 %vm548_vm3, %v8593_v21  ;;  %v455_v39 = vrot.slane %v8602_v27, 1  ;;  %v456_v40 = vrot.slane %v8604_v28, 1  ;;  %v8627_v41 = vunpack.c.l.bf16 %v186_v31  ;;  %v461_v42 = vrot.slane %v8593_v21, 1 }
  0x1a   : > { %11156 = vst [vmem:[#allocation6_spill] sm:$0xff] %v8602_v27  ;;  %11157 = vst [vmem:[#allocation7_spill] sm:$0xff] %v8604_v28  ;;  %v190_v43 = vld [vmem:[%s8581_s11 + $0x2c] sm:$0x3]  ;;  %v454_v44 = vsel %vm451_vm4, %v452_v34, %v453_v35  ;;  %7494 = vmatprep.mubr.msk.f32.mxu0 %vm548_vm3, %v8606_v29  ;;  %7962 = vmatpush3.bf16.msk.msra.mxu0 %vm8535_vm2, %v7957_v12  ;;  %v459_v45 = vrot.slane %v8619_v36, 1  ;;  %v8637_v46 = vunpack.c.l.bf16 %v191_v32  ;;  %v8647_v51 = vunpack.c.l.bf16 %v188_v38 }
  0x1b   : > { %11158 = vst [vmem:[#allocation8_spill] sm:$0xff] %v8606_v29  ;;  %11159 = vst [vmem:[#allocation9_spill] sm:$0xff] %v8619_v36  ;;  %v192_v47 = vld [vmem:[%s8581_s11 + $0x34] sm:$0x3]  ;;  %7075 = vmatprep.mubr.msk.f32.mxu1 %vm548_vm3, %v454_v44  ;;  %v8644_v49 = vsel %vm451_vm4, %v455_v39, %v456_v40  ;;  %v462_v50 = vrot.slane %v8627_v41, 1  ;;  %v464_v52 = vrot.slane %v8606_v29, 1  ;;  %7965 = vmatprep.subr.msk.bf16.mxu0 %vm8535_vm2, %v8589_v19  ;;  %v8660_v56 = vunpack.c.h.bf16 %v191_v32 }
  0x1c   : > { %11160 = vst [vmem:[#allocation10_spill] sm:$0xff] %v8627_v41  ;;  %11161 = vst [vmem:[#allocation11_spill] sm:$0xff] %v8644_v49  ;;  %v195_v53 = vld [vmem:[%s8581_s11 + $0x40] ss:$8 sps:$4 sm:$0xff]   ;;  %v194_v54 = vld [vmem:[%s8581_s11 + $0x3c] sm:$0x3]  ;;  %7076 = vmatmul.mubr.msk.f32.vlgmr.msra.gmra.mrb[0].mxu1 %vm548_vm3, %v8644_v49  ;;  %v8658_v55 = vsel %vm451_vm4, %v458_v37, %v459_v45  ;;  %v8662_v57 = vunpack.c.l.bf16 %v190_v43  ;;  %v8674_v61 = vunpack.c.l.bf16 %v192_v47 }
  0x1d   : > { %11162 = vst [vmem:[#allocation12_spill] sm:$0xff] %v8647_v51  ;;  %11163 = vst [vmem:[#allocation13_spill] sm:$0xff] %v8658_v55  ;;  %7914 = vmatpush3.bf16.msk.msra.mxu1 %vm8535_vm2, %v8556_v11  ;;  %7495 = vmatmul.mubr.msk.f32.gmra.mrb[2].mxu0 %vm548_vm3, %v8608_v30  ;;  %v8670_v58 = vsel %vm451_vm4, %v461_v42, %v462_v50  ;;  %v465_v59 = vrot.slane %v8647_v51, 1  ;;  %v467_v60 = vrot.slane %v8608_v30, 1  ;;  %v201_v62 = vld [vmem:[%s8581_s11 + $0x58] ss:$8 sps:$4 sm:$0xff]   ;;  %v8683_v1 = vunpack.c.l.bf16 %v195_v53 }
  0x1e   : > { %11164 = vst [vmem:[#allocation14_spill] sm:$0xff] %v8662_v57  ;;  %11165 = vst [vmem:[#allocation15_spill] sm:$0xff] %v8670_v58  ;;  %v202_v63 = vld [vmem:[%s8581_s11 + $0x5c] sm:$0x3]  ;;  %7078 = vmatprep.mubr.msk.f32.mxu1 %vm548_vm3, %v8658_v55  ;;  %7497 = vmatprep.mubr.msk.f32.mxu0 %vm548_vm3, %v8637_v46  ;;  %v468_v0 = vrot.slane %v8662_v57, 1  ;;  %v470_v2 = vrot.slane %v8637_v46, 1  ;;  %v8686_v4 = vunpack.c.l.bf16 %v194_v54  ;;  %v8699_v9 = vunpack.c.h.bf16 %v195_v53 }
  0x1f   : > { %11166 = vst [vmem:[#allocation16_spill] sm:$0xff] %v8674_v61  ;;  %v204_v5 = vld [vmem:[%s8581_s11 + $0x64] sm:$0x3]  ;;  %v8690_v6 = vsel %vm451_vm4, %v464_v52, %v465_v59  ;;  %v471_v7 = vrot.slane %v8674_v61, 1  ;;  %v205_v8 = vld [vmem:[%s8581_s11 + $0x68] ss:$8 sps:$4 sm:$0xff]   ;;  %7917 = vmatprep.subr.msk.bf16.mxu1 %vm8535_vm2, %v8640_v48  ;;  %v8702_v11 = vunpack.c.l.bf16 %v201_v62  ;;  %v8704_v12 = vunpack.c.l.bf16 %v202_v63 }
  0x20   : > { %11167 = vst [vmem:[#allocation17_spill] sm:$0xff] %v8686_v4  ;;  %11168 = vst [vmem:[#allocation18_spill] sm:$0xff] %v8690_v6  ;;  %7079 = vmatmul.mubr.msk.f32.gmra.mrb[2].mxu1 %vm548_vm3, %v8670_v58  ;;  %v473_v10 = vrot.slane %v8660_v56, 1  ;;  %v206_v13 = vld [vmem:[%s8581_s11 + $0x6c] sm:$0x3]  ;;  %v8712_v14 = vsel %vm451_vm4, %v467_v60, %v468_v0  ;;  %v474_v15 = vrot.slane %v8686_v4, 1  ;;  %v8715_v16 = vunpack.c.h.bf16 %v201_v62 }
  0x21   : > { %11169 = vst [vmem:[#allocation19_spill] sm:$0xff] %v8704_v12  ;;  %7498 = vmatmul.mubr.msk.f32.gmra.mrb[4].mxu0 %vm548_vm3, %v8660_v56  ;;  %7081 = vmatprep.mubr.msk.f32.mxu1 %vm548_vm3, %v8690_v6  ;;  %11170 = vst [vmem:[#allocation20_spill] sm:$0xff] %v8712_v14  ;;  %v8717_v17 = vunpack.c.l.bf16 %v204_v5  ;;  %v209_v18 = vld [vmem:[%s8581_s11 + $0x78] ss:$8 sps:$4 sm:$0xff]   ;;  %v8723_v24 = vsel %vm451_vm4, %v470_v2, %v471_v7  ;;  %v8725_v25 = vunpack.c.l.bf16 %v205_v8  ;;  %v476_v26 = vrot.slane %v8702_v11, 1 }
  0x22   : > { %11171 = vst [vmem:[#allocation21_spill] sm:$0xff] %v8715_v16  ;;  %7500 = vmatprep.mubr.msk.f32.mxu0 %vm548_vm3, %v8683_v1  ;;  %11173 = vst [vmem:[#allocation23_spill] sm:$0xff] %v8723_v24  ;;  %v477_v31 = vrot.slane %v8704_v12, 1  ;;  %v208_v32 = vld [vmem:[%s8581_s11 + $0x74] sm:$0x3]  ;;  %v8730_v33 = vunpack.c.l.bf16 %v206_v13  ;;  %v8735_v35 = vunpack.c.h.bf16 %v205_v8  ;;  %v8737_v37 = vunpack.c.l.bf16 %v209_v18 }
  0x23   : > { %11172 = vst [vmem:[#allocation22_spill] sm:$0xff] %v8717_v17  ;;  %11174 = vst [vmem:[#allocation24_spill] sm:$0xff] %v8725_v25  ;;  %v210_v34 = vld [vmem:[%s8581_s11 + $0x7c] sm:$0x3]  ;;  %v8744_v38 = vsel %vm451_vm4, %v473_v10, %v474_v15  ;;  %v479_v39 = vrot.slane %v8715_v16, 1  ;;  %v480_v40 = vrot.slane %v8717_v17, 1  ;;  %v8748_v42 = vunpack.c.l.bf16 %v208_v32 }
  0x24   : > { %11175 = vst [vmem:[#allocation25_spill] sm:$0xff] %v8730_v33  ;;  %7082 = vmatmul.mubr.msk.f32.gmra.mrb[4].mxu1 %vm548_vm3, %v8712_v14  ;;  %11176 = vst [vmem:[#allocation26_spill] sm:$0xff] %v8737_v37  ;;  %v478_v43 = vsel %vm451_vm4, %v476_v26, %v477_v31  ;;  %v482_v44 = vrot.slane %v8725_v25, 1  ;;  %v483_v45 = vrot.slane %v8730_v33, 1  ;;  %v213_v47 = vld [vmem:[%s8581_s11 + $0x88] ss:$8 sps:$4 sm:$0xff]   ;;  %v8756_v50 = vunpack.c.l.bf16 %v210_v34 }
  0x25   : > { %7501 = vmatmul.mubr.msk.f32.gmra.mrb[6].mxu0 %vm548_vm3, %v8699_v9  ;;  %7084 = vmatprep.mubr.msk.f32.mxu1 %vm548_vm3, %v8723_v24  ;;  %11177 = vst [vmem:[#allocation27_spill] sm:$0xff] %v8744_v38  ;;  %11178 = vst [vmem:[#allocation28_spill] sm:$0xff] %v8748_v42  ;;  %v212_v52 = vld [vmem:[%s8581_s11 + $0x84] sm:$0x3]  ;;  %v214_v53 = vld [vmem:[%s8581_s11 + $0x8c] sm:$0x3]  ;;  %v8762_v54 = vunpack.c.h.bf16 %v209_v18  ;;  %v8769_v60 = vsel %vm451_vm4, %v479_v39, %v480_v40  ;;  %v8772_v63 = vunpack.c.l.bf16 %v213_v47  ;;  %v8791_v26 = vunpack.c.h.bf16 %v213_v47 }
  0x26   : > { %7503 = vmatprep.mubr.msk.f32.mxu0 %vm548_vm3, %v8725_v25  ;;  %11179 = vst [vmem:[#allocation29_spill] sm:$0xff] %v8756_v50  ;;  %v485_v59 = vrot.slane %v8735_v35, 1  ;;  %11180 = vst [vmem:[#allocation30_spill] sm:$0xff] %v8769_v60  ;;  %v486_v62 = vrot.slane %v8748_v42, 1  ;;  %v8774_v0 = vunpack.c.l.bf16 %v212_v52  ;;  %v217_v2 = vld [vmem:[%s8581_s11 + $0x98] ss:$8 sps:$4 sm:$0xff]   ;;  %v8780_v5 = vsel %vm451_vm4, %v482_v44, %v483_v45 }
  0x27   : > { %11182 = vst [vmem:[#allocation32_spill] sm:$0xff] %v8780_v5  ;;  %v488_v7 = vrot.slane %v8737_v37, 1  ;;  %v489_v8 = vrot.slane %v8756_v50, 1  ;;  %v8784_v10 = vunpack.c.l.bf16 %v214_v53  ;;  %v216_v13 = vld [vmem:[%s8581_s11 + $0x94] sm:$0x3]  ;;  %v491_v31 = vrot.slane %v8762_v54, 1 }
  0x28   : > { %7085 = vmatmul.mubr.msk.f32.gmra.mrb[6].mxu1 %vm548_vm3, %v8744_v38  ;;  %11181 = vst [vmem:[#allocation31_spill] sm:$0xff] %v8774_v0  ;;  %v223_v15 = vld [vmem:[%s8581_s11 + $0xb0] ss:$8 sps:$4 sm:$0xff]   ;;  %v224_v18 = vld [vmem:[%s8581_s11 + $0xb4] sm:$0x3]  ;;  %v8794_v32 = vunpack.c.l.bf16 %v217_v2  ;;  %v8801_v34 = vsel %vm451_vm4, %v485_v59, %v486_v62  ;;  %v492_v39 = vrot.slane %v8774_v0, 1 }
  0x29   : > { %7504 = vmatmul.mubr.msk.f32.gmra.mrb[8].mxu0 %vm548_vm3, %v8735_v35  ;;  %7087 = vmatprep.mubr.msk.f32.mxu1 %vm548_vm3, %v478_v43  ;;  %11183 = vst [vmem:[#allocation33_spill] sm:$0xff] %v8784_v10  ;;  %11184 = vst [vmem:[#allocation34_spill] sm:$0xff] %v8801_v34  ;;  %v494_v40 = vrot.slane %v8772_v63, 1  ;;  %v8805_v43 = vunpack.c.l.bf16 %v216_v13  ;;  %v227_v44 = vld [vmem:[%s8581_s11 + $0xc0] ss:$8 sps:$4 sm:$0xff]   ;;  %v8811_v45 = vsel %vm451_vm4, %v488_v7, %v489_v8  ;;  %v495_v47 = vrot.slane %v8784_v10, 1 }
  0x2a   : > { %7506 = vmatprep.mubr.msk.f32.mxu0 %vm548_vm3, %v8737_v37  ;;  %11186 = vst [vmem:[#allocation36_spill] sm:$0xff] %v8811_v45  ;;  %v8814_v52 = vunpack.c.l.bf16 %v223_v15  ;;  %v8816_v53 = vunpack.c.l.bf16 %v224_v18  ;;  %v226_v59 = vld [vmem:[%s8581_s11 + $0xbc] sm:$0x3]  ;;  %v228_v62 = vld [vmem:[%s8581_s11 + $0xc4] sm:$0x3]  ;;  %v8822_v13 = vunpack.c.h.bf16 %v217_v2  ;;  %v8825_v7 = vunpack.c.l.bf16 %v227_v44 }
  0x2b   : > { %11185 = vst [vmem:[#allocation35_spill] sm:$0xff] %v8805_v43  ;;  %v8832_v8 = vsel %vm451_vm4, %v491_v31, %v492_v39  ;;  %v498_v18 = vrot.slane %v8805_v43, 1  ;;  %v8835_v49 = vunpack.c.h.bf16 %v223_v15  ;;  %v8837_v2 = vunpack.c.l.bf16 %v226_v59  ;;  %v231_v10 = vld [vmem:[%s8581_s11 + $0xd0] ss:$8 sps:$4 sm:$0xff]   ;;  %v230_v31 = vld [vmem:[%s8581_s11 + $0xcc] sm:$0x3] }
  0x2c   : > { %7088 = vmatmul.mubr.msk.f32.gmra.mrb[8].mxu1 %vm548_vm3, %v8769_v60  ;;  %11187 = vst [vmem:[#allocation37_spill] sm:$0xff] %v8816_v53  ;;  %11188 = vst [vmem:[#allocation38_spill] sm:$0xff] %v8822_v13  ;;  %v497_v60 = vrot.slane %v8791_v26, 1  ;;  %v8843_v0 = vsel %vm451_vm4, %v494_v40, %v495_v47  ;;  %v500_v17 = vrot.slane %v8814_v52, 1  ;;  %v501_v50 = vrot.slane %v8816_v53, 1 }
  0x2d   : > { %7507 = vmatmul.mubr.msk.f32.gmra.mrb[10].mxu0 %vm548_vm3, %v8762_v54  ;;  %7090 = vmatprep.mubr.msk.f32.mxu1 %vm548_vm3, %v8780_v5  ;;  %11189 = vst [vmem:[#allocation39_spill] sm:$0xff] %v8825_v7  ;;  %11190 = vst [vmem:[#allocation40_spill] sm:$0xff] %v8832_v8  ;;  %v8847_v12 = vunpack.c.l.bf16 %v228_v62  ;;  %v232_v39 = vld [vmem:[%s8581_s11 + $0xd4] sm:$0x3]  ;;  %v8853_v15 = vunpack.c.h.bf16 %v227_v44  ;;  %v8855_v59 = vunpack.c.l.bf16 %v231_v10  ;;  %v503_v47 = vrot.slane %v8835_v49, 1 }
  0x2e   : > { %7509 = vmatprep.mubr.msk.f32.mxu0 %vm548_vm3, %v8772_v63  ;;  %11191 = vst [vmem:[#allocation41_spill] sm:$0xff] %v8835_v49  ;;  %11192 = vst [vmem:[#allocation42_spill] sm:$0xff] %v8837_v2  ;;  %v8862_v40 = vsel %vm451_vm4, %v497_v60, %v498_v18  ;;  %v504_v62 = vrot.slane %v8837_v2, 1  ;;  %v8866_v53 = vunpack.c.l.bf16 %v230_v31  ;;  %v502_v44 = vsel %vm451_vm4, %v500_v17, %v501_v50  ;;  %v235_v33 = vld [vmem:[%s8581_s11 + $0xe0] ss:$8 sps:$4 sm:$0xff]  }
  0x2f   : > { %11193 = vst [vmem:[#allocation43_spill] sm:$0xff] %v8843_v0  ;;  %11194 = vst [vmem:[#allocation44_spill] sm:$0xff] %v8847_v12  ;;  %v506_v43 = vrot.slane %v8825_v7, 1  ;;  %v507_v42 = vrot.slane %v8847_v12, 1  ;;  %v8874_v4 = vunpack.c.l.bf16 %v232_v39  ;;  %v234_v60 = vld [vmem:[%s8581_s11 + $0xdc] sm:$0x3]  ;;  %v8880_v31 = vunpack.c.h.bf16 %v231_v10 }
  0x30   : > { %7091 = vmatmul.mubr.msk.f32.gmra.mrb[10].mxu1 %vm548_vm3, %v8801_v34  ;;  %11195 = vst [vmem:[#allocation45_spill] sm:$0xff] %v8853_v15  ;;  %11196 = vst [vmem:[#allocation46_spill] sm:$0xff] %v8855_v59  ;;  %v236_v18 = vld [vmem:[%s8581_s11 + $0xe4] sm:$0x3]  ;;  %v509_v17 = vrot.slane %v8853_v15, 1  ;;  %v8887_v50 = vsel %vm451_vm4, %v503_v47, %v504_v62  ;;  %v510_v39 = vrot.slane %v8866_v53, 1  ;;  %v8890_v2 = vunpack.c.l.bf16 %v235_v33 }
  0x31   : > { %7510 = vmatmul.mubr.msk.f32.gmra.mrb[12].mxu0 %vm548_vm3, %v8791_v26  ;;  %7093 = vmatprep.mubr.msk.f32.mxu1 %vm548_vm3, %v8811_v45  ;;  %11197 = vst [vmem:[#allocation47_spill] sm:$0xff] %v8862_v40  ;;  %11198 = vst [vmem:[#allocation48_spill] sm:$0xff] %v8866_v53  ;;  %v8892_v12 = vunpack.c.l.bf16 %v234_v60  ;;  %v239_v61 = vld [vmem:[%s8581_s11 + $0xf0] ss:$8 sps:$4 sm:$0xff]   ;;  %v8898_v10 = vsel %vm451_vm4, %v506_v43, %v507_v42  ;;  %v512_v57 = vrot.slane %v8855_v59, 1  ;;  %v8902_v47 = vunpack.c.l.bf16 %v236_v18 }
  0x32   : > { %7512 = vmatprep.mubr.msk.f32.mxu0 %vm548_vm3, %v8794_v32  ;;  %11199 = vst [vmem:[#allocation49_spill] sm:$0xff] %v8874_v4  ;;  %11200 = vst [vmem:[#allocation50_spill] sm:$0xff] %v8880_v31  ;;  %v238_v62 = vld [vmem:[%s8581_s11 + $0xec] sm:$0x3]  ;;  %v245_v53 = vld [vmem:[%s8581_s11 + $0x108] ss:$8 sps:$4 sm:$0xff]   ;;  %v8909_v60 = vunpack.c.h.bf16 %v235_v33  ;;  %v8912_v43 = vunpack.c.l.bf16 %v239_v61  ;;  %v8919_v18 = vsel %vm451_vm4, %v509_v17, %v510_v39 }
  0x33   : > { %11201 = vst [vmem:[#allocation51_spill] sm:$0xff] %v8887_v50  ;;  %11202 = vst [vmem:[#allocation52_spill] sm:$0xff] %v8890_v2  ;;  %v246_v28 = vld [vmem:[%s8581_s11 + $0x10c] sm:$0x3]  ;;  %v515_v42 = vrot.slane %v8880_v31, 1  ;;  %v8923_v33 = vunpack.c.l.bf16 %v238_v62  ;;  %v519_v41 = vrot.slane %v8902_v47, 1  ;;  %v8932_v36 = vunpack.c.l.bf16 %v245_v53 }
  0x34   : > { %7094 = vmatmul.mubr.msk.f32.gmra.mrb[12].mxu1 %vm548_vm3, %v8832_v8  ;;  %11203 = vst [vmem:[#allocation53_spill] sm:$0xff] %v8892_v12  ;;  %11204 = vst [vmem:[#allocation54_spill] sm:$0xff] %v8898_v10  ;;  %v249_v51 = vld [vmem:[%s8581_s11 + $0x118] ss:$8 sps:$4 sm:$0xff]   ;;  %v8934_v17 = vunpack.c.l.bf16 %v246_v28  ;;  %v248_v39 = vld [vmem:[%s8581_s11 + $0x114] sm:$0x3]  ;;  %v8940_v62 = vunpack.c.h.bf16 %v239_v61 }
  0x35   : > { %7513 = vmatmul.mubr.msk.f32.gmra.mrb[14].mxu0 %vm548_vm3, %v8822_v13  ;;  %7096 = vmatprep.mubr.msk.f32.mxu1 %vm548_vm3, %v8843_v0  ;;  %11205 = vst [vmem:[#allocation55_spill] sm:$0xff] %v8902_v47  ;;  %11206 = vst [vmem:[#allocation56_spill] sm:$0xff] %v8909_v60  ;;  %v8953_v47 = vunpack.c.h.bf16 %v245_v53  ;;  %v8955_v61 = vunpack.c.l.bf16 %v248_v39  ;;  %v8971_v53 = vunpack.c.h.bf16 %v249_v51 }
  0x36   : > { %7515 = vmatprep.mubr.msk.f32.mxu0 %vm548_vm3, %v8825_v7  ;;  %11207 = vst [vmem:[#allocation57_spill] sm:$0xff] %v8919_v18  ;;  %11208 = vst [vmem:[#allocation58_spill] sm:$0xff] %v8923_v33 }
  0x37   : > { %11210 = vst [vmem:[#allocation60_spill] sm:$0xff] %v8932_v36  ;;  %11211 = vst [vmem:[#allocation61_spill] sm:$0xff] %v8934_v17 }
  0x38   : > { %7097 = vmatmul.mubr.msk.f32.gmra.mrb[14].mxu1 %vm548_vm3, %v8862_v40  ;;  %11212 = vst [vmem:[#allocation62_spill] sm:$0xff] %v8940_v62  ;;  %11215 = vst [vmem:[#allocation65_spill] sm:$0xff] %v8953_v47 }
  0x39   : > { %7516 = vmatmul.mubr.msk.f32.gmra.mrb[16].mxu0 %vm548_vm3, %v8853_v15  ;;  %7099 = vmatprep.mubr.msk.f32.mxu1 %vm548_vm3, %v502_v44  ;;  %v513_v44 = vrot.slane %v8874_v4, 1  ;;  %v516_v4 = vrot.slane %v8892_v12, 1  ;;  %v250_v12 = vld [vmem:[%s8581_s11 + $0x11c] sm:$0x3]  ;;  %11216 = vst [vmem:[#allocation66_spill] sm:$0xff] %v8955_v61  ;;  %v525_v15 = vrot.slane %v8934_v17, 1 }
  0x3a   : > { %7518 = vmatprep.mubr.msk.f32.mxu0 %vm548_vm3, %v8855_v59  ;;  %v8965_v7 = vunpack.c.l.bf16 %v250_v12  ;;  %11219 = vst [vmem:[#allocation69_spill] sm:$0xff] %v8971_v53  ;;  %v527_v12 = vrot.slane %v8953_v47, 1 }
  0x3b   : > { %v8929_v23 = vsel %vm451_vm4, %v512_v57, %v513_v44  ;;  %v8943_v57 = vunpack.c.l.bf16 %v249_v51  ;;  %v8950_v28 = vsel %vm451_vm4, %v515_v42, %v516_v4  ;;  %v522_v44 = vrot.slane %v8923_v33, 1  ;;  %v252_v4 = vld [vmem:[%s8581_s11 + $0x124] sm:$0x3]  ;;  %v254_v42 = vld [vmem:[%s8581_s11 + $0x12c] sm:$0x3] }
  0x3c   : > { %7100 = vmatmul.mubr.msk.f32.gmra.mrb[16].mxu1 %vm548_vm3, %v8887_v50  ;;  %v518_v50 = vrot.slane %v8890_v2, 1  ;;  %11209 = vst [vmem:[#allocation59_spill] sm:$0xff] %v8929_v23  ;;  %11214 = vst [vmem:[#allocation64_spill] sm:$0xff] %v8950_v28  ;;  %v8984_v17 = vunpack.c.l.bf16 %v252_v4 }
  0x3d   : > { %7519 = vmatmul.mubr.msk.f32.gmra.mrb[18].mxu0 %vm548_vm3, %v8880_v31  ;;  %7102 = vmatprep.mubr.msk.f32.mxu1 %vm548_vm3, %v8898_v10  ;;  %11213 = vst [vmem:[#allocation63_spill] sm:$0xff] %v8943_v57  ;;  %v253_v31 = vld [vmem:[%s8581_s11 + $0x128] ss:$8 sps:$4 sm:$0xff]   ;;  %11218 = vst [vmem:[#allocation68_spill] sm:$0xff] %v8965_v7  ;;  %v530_v33 = vrot.slane %v8943_v57, 1 }
  0x3e   : > { %7521 = vmatprep.mubr.msk.f32.mxu0 %vm548_vm3, %v8890_v2  ;;  %v521_v2 = vrot.slane %v8909_v60, 1  ;;  %v8961_v59 = vsel %vm451_vm4, %v518_v50, %v519_v41  ;;  %v8973_v39 = vunpack.c.l.bf16 %v253_v31  ;;  %v528_v50 = vrot.slane %v8955_v61, 1  ;;  %11222 = vst [vmem:[#allocation72_spill] sm:$0xff] %v8984_v17 }
  0x3f   : > { %11217 = vst [vmem:[#allocation67_spill] sm:$0xff] %v8961_v59  ;;  %v8998_v4 = vunpack.c.h.bf16 %v253_v31  ;;  %v533_v61 = vrot.slane %v8971_v53, 1 }
  0x40   : > { %7103 = vmatmul.mubr.msk.f32.gmra.mrb[18].mxu1 %vm548_vm3, %v8919_v18  ;;  %11220 = vst [vmem:[#allocation70_spill] sm:$0xff] %v8973_v39  ;;  %v8980_v41 = vsel %vm451_vm4, %v521_v2, %v522_v44  ;;  %v256_v2 = vld [vmem:[%s8581_s11 + $0x134] sm:$0x3]  ;;  %v258_v44 = vld [vmem:[%s8581_s11 + $0x13c] sm:$0x3] }
  0x41   : > { %7522 = vmatmul.mubr.msk.f32.gmra.mrb[20].mxu0 %vm548_vm3, %v8909_v60  ;;  %7105 = vmatprep.mubr.msk.f32.mxu1 %vm548_vm3, %v8929_v23  ;;  %v524_v60 = vrot.slane %v8932_v36, 1  ;;  %11221 = vst [vmem:[#allocation71_spill] sm:$0xff] %v8980_v41  ;;  %v531_v36 = vrot.slane %v8965_v7, 1  ;;  %v9010_v7 = vunpack.c.l.bf16 %v256_v2 }
  0x42   : > { %7524 = vmatprep.mubr.msk.f32.mxu0 %vm548_vm3, %v8912_v43 }
  0x43   : > { %v526_v51 = vsel %vm451_vm4, %v524_v60, %v525_v15  ;;  %v9005_v15 = vsel %vm451_vm4, %v527_v12, %v528_v50  ;;  %v534_v60 = vrot.slane %v8984_v17, 1  ;;  %11226 = vst [vmem:[#allocation76_spill] sm:$0xff] %v9010_v7  ;;  %v9015_v31 = vsel %vm451_vm4, %v530_v33, %v531_v36  ;;  %v260_v12 = vld [vmem:[%s8581_s11 + $0x144] sm:$0x3]  ;;  %v261_v50 = vld [vmem:[%s8581_s11 + $0x148] ss:$8 sps:$4 sm:$0xff]  }
  0x44   : > { %7106 = vmatmul.mubr.msk.f32.gmra.mrb[20].mxu1 %vm548_vm3, %v8950_v28  ;;  %11224 = vst [vmem:[#allocation74_spill] sm:$0xff] %v9005_v15  ;;  %11227 = vst [vmem:[#allocation77_spill] sm:$0xff] %v9015_v31  ;;  %v539_v33 = vrot.slane %v8998_v4, 1  ;;  %v540_v2 = vrot.slane %v9010_v7, 1  ;;  %v196_v7 = vld [vmem:[%s8581_s11 + $0x44] sm:$0x3] }
  0x45   : > { %7525 = vmatmul.mubr.msk.f32.gmra.mrb[22].mxu0 %vm548_vm3, %v8940_v62  ;;  %7108 = vmatprep.mubr.msk.f32.mxu1 %vm548_vm3, %v8961_v59  ;;  %v257_v62 = vld [vmem:[%s8581_s11 + $0x138] ss:$8 sps:$4 sm:$0xff]   ;;  %v8992_v59 = vunpack.c.l.bf16 %v254_v42  ;;  %v9032_v36 = vsel %vm451_vm4, %v533_v61, %v534_v60 }
  0x46   : > { %7527 = vmatprep.mubr.msk.f32.mxu0 %vm548_vm3, %v8943_v57  ;;  %v9008_v42 = vunpack.c.l.bf16 %v257_v62  ;;  %v536_v57 = vrot.slane %v8973_v39, 1  ;;  %v9025_v17 = vunpack.c.h.bf16 %v257_v62  ;;  %11230 = vst [vmem:[#allocation80_spill] sm:$0xff] %v9032_v36  ;;  %v9054_v60 = vsel %vm451_vm4, %v539_v33, %v540_v2  ;;  %v377_v33 = vld [vmem:[%s10874_s1 + $0xb0] sm:$0xff] }
  0x47   : > { %11223 = vst [vmem:[#allocation73_spill] sm:$0xff] %v8992_v59  ;;  %11234 = vst [vmem:[#allocation84_spill] sm:$0xff] %v9054_v60  ;;  %v9083_v2 = vunpack.c.l.bf16 %v196_v7 }
  0x48   : > { %7109 = vmatmul.mubr.msk.f32.gmra.mrb[22].mxu1 %vm548_vm3, %v8980_v41  ;;  %11225 = vst [vmem:[#allocation75_spill] sm:$0xff] %v9008_v42  ;;  %11229 = vst [vmem:[#allocation79_spill] sm:$0xff] %v9025_v17 }
  0x49   : > { %7528 = vmatmul.mubr.msk.f32.gmra.mrb[24].mxu0 %vm548_vm3, %v8971_v53  ;;  %7111 = vmatprep.mubr.msk.f32.mxu1 %vm548_vm3, %v526_v51  ;;  %v537_v53 = vrot.slane %v8992_v59, 1  ;;  %v9019_v51 = vunpack.c.l.bf16 %v258_v44  ;;  %v9036_v44 = vunpack.c.l.bf16 %v260_v12  ;;  %v542_v59 = vrot.slane %v9008_v42, 1 }
  0x4a   : > { %7530 = vmatprep.mubr.msk.f32.mxu0 %vm548_vm3, %v8973_v39 }
  0x4b   : > { %11228 = vst [vmem:[#allocation78_spill] sm:$0xff] %v9019_v51  ;;  %11231 = vst [vmem:[#allocation81_spill] sm:$0xff] %v9036_v44  ;;  %v9041_v62 = vsel %vm451_vm4, %v536_v57, %v537_v53  ;;  %v543_v61 = vrot.slane %v9019_v51, 1  ;;  %v9056_v57 = vunpack.c.h.bf16 %v261_v50  ;;  %v545_v53 = vrot.slane %v9025_v17, 1 }
  0x4c   : > { %7112 = vmatmul.mubr.msk.f32.gmra.mrb[24].mxu1 %vm548_vm3, %v9005_v15  ;;  %11232 = vst [vmem:[#allocation82_spill] sm:$0xff] %v9041_v62  ;;  %v9043_v15 = vunpack.c.l.bf16 %v261_v50  ;;  %v546_v12 = vrot.slane %v9036_v44, 1  ;;  %v378_v50 = vld [vmem:[%s10874_s1 + $0xb8] sm:$0xf] }
  0x4d   : > { %7531 = vmatmul.mubr.msk.f32.gmra.mrb[26].mxu0 %vm548_vm3, %v8998_v4  ;;  %7114 = vmatprep.mubr.msk.f32.mxu1 %vm548_vm3, %v9015_v31  ;;  %11235 = vst [vmem:[#allocation85_spill] sm:$0xff] %v9056_v57  ;;  %v9063_v51 = vsel %vm451_vm4, %v542_v59, %v543_v61  ;;  %v198_v61 = vld [vmem:[%s8581_s11 + $0x4c] sm:$0x3]  ;;  %v9086_v44 = vpack.c.bf16 %v378_v50, %v377_v33  ;;  %v2253_v33 = vrot.slane %v9083_v2, 1 }
  0x4e   : > { %7533 = vmatprep.mubr.msk.f32.mxu0 %vm548_vm3, %v9008_v42  ;;  %11233 = vst [vmem:[#allocation83_spill] sm:$0xff] %v9043_v15  ;;  %11236 = vst [vmem:[#allocation86_spill] sm:$0xff] %v9063_v51  ;;  %v9079_v59 = vsel %vm451_vm4, %v545_v53, %v546_v12  ;;  %v362_v53 = vld [vmem:[%s10874_s1 + $0x38] sm:$0xf]  ;;  %v9105_v7 = vunpack.c.l.bf16 %v198_v61  ;;  %v2252_v12 = vrot.slane %v8683_v1, 1 }
  0x4f   : > { %11237 = vst [vmem:[#allocation87_spill] sm:$0xff] %v9079_v59 }
  0x50   : > { %7115 = vmatmul.mubr.msk.f32.gmra.mrb[26].mxu1 %vm548_vm3, %v9032_v36  ;;  %v9128_v61 = vsel %vm451_vm4, %v2252_v12, %v2253_v33  ;;  %v220_v33 = vld [vmem:[%s8581_s11 + $0xa4] sm:$0x3] }
  0x51   : > { %7534 = vmatmul.mubr.msk.f32.gmra.mrb[28].mxu0 %vm548_vm3, %v9025_v17  ;;  %7117 = vmatprep.mubr.msk.f32.mxu1 %vm548_vm3, %v9041_v62  ;;  %v361_v17 = vld [vmem:[%s10874_s1 + $0x30] sm:$0xff]  ;;  %11238 = vst [vmem:[#allocation88_spill] sm:$0xff] %v9128_v61 }
  0x52   : > { %7536 = vmatprep.mubr.msk.f32.mxu0 %vm548_vm3, %v9043_v15  ;;  %v9109_v50 = vpack.c.bf16 %v362_v53, %v361_v17  ;;  %v3369_v17 = vrot.slane %v9105_v7, 1  ;;  %v218_v53 = vld [vmem:[%s8581_s11 + $0x9c] sm:$0x3] }
  0x53   : > { %v9153_v12 = vunpack.c.l.bf16 %v218_v53 }
  0x54   : > { %7118 = vmatmul.mubr.msk.f32.gmra.mrb[28].mxu1 %vm548_vm3, %v9054_v60 }
  0x55   : > { %7537 = vmatmul.mubr.msk.f32.gmra.mrb[30].mxu0 %vm548_vm3, %v9056_v57  ;;  %7120 = vmatprep.mubr.msk.f32.mxu1 %vm548_vm3, %v9063_v51  ;;  %v2256_v53 = vrot.slane %v9153_v12, 1 }
  0x56   : > { %7543 = vmatprep.mubr.msk.f32.mxu0 %vm548_vm3, %v8658_v55  ;;  %v11260_v55 = vld [vmem:[#allocation69_spill] sm:$0xff] }
  0x58   : > { %7121 = vmatmul.mubr.msk.f32.gmra.mrb[30].mxu1 %vm548_vm3, %v9079_v59 }
  0x59   : > { %7544 = vmatmul.mubr.msk.f32.vlgmr.msra.gmra.mrb[0].mxu0 %vm548_vm3, %v8670_v58  ;;  %7127 = vmatprep.mubr.msk.f32.mxu1 %vm548_vm3, %v8595_v22 }
  0x5a   : > { %7546 = vmatprep.mubr.msk.f32.mxu0 %vm548_vm3, %v8690_v6  ;;  %7968 = vmatpush3.bf16.msk.msra.mxu0 %vm8535_vm2, %v8589_v19  ;;  %v3368_v19 = vrot.slane %v8699_v9, 1  ;;  %v11263_v6 = vld [vmem:[#allocation5_spill] sm:$0xff] }
  0x5b   : > { %7971 = vmatprep.subr.msk.bf16.mxu0 %vm8535_vm2, %v9086_v44  ;;  %v1136_v58 = vrot.slane %v11263_v6, 2  ;;  %v1150_v6 = vrot.slane %v8608_v30, 2 }
  0x5c   : > { %7128 = vmatmul.mubr.msk.f32.vlgmr.msra.gmra.mrb[0].mxu1 %vm548_vm3, %v8602_v27 }
  0x5d   : > { %7920 = vmatpush3.bf16.msk.msra.mxu1 %vm8535_vm2, %v8640_v48  ;;  %7547 = vmatmul.mubr.msk.f32.gmra.mrb[2].mxu0 %vm548_vm3, %v8712_v14  ;;  %v9142_v48 = vsel %vm451_vm4, %v3368_v19, %v3369_v17  ;;  %v9164_v19 = vunpack.c.l.bf16 %v220_v33  ;;  %v2255_v17 = vrot.slane %v8794_v32, 1  ;;  %v3371_v33 = vrot.slane %v8822_v13, 1 }
  0x5e   : > { %7130 = vmatprep.mubr.msk.f32.mxu1 %vm548_vm3, %v8591_v20  ;;  %7549 = vmatprep.mubr.msk.f32.mxu0 %vm548_vm3, %v8723_v24  ;;  %11239 = vst [vmem:[#allocation89_spill] sm:$0xff] %v9142_v48  ;;  %v1135_v14 = vrot.slane %v8595_v22, 2  ;;  %v11268_v22 = vld [vmem:[#allocation14_spill] sm:$0xff] }
  0x5f   : > { %7923 = vmatprep.subr.msk.bf16.mxu1 %vm8535_vm2, %v9109_v50  ;;  %11240 = vst [vmem:[#allocation90_spill] sm:$0xff] %v9164_v19 }
  0x60   : > { %7131 = vmatmul.mubr.msk.f32.gmra.mrb[2].mxu1 %vm548_vm3, %v8593_v21 }
  0x61   : > { %7550 = vmatmul.mubr.msk.f32.gmra.mrb[4].mxu0 %vm548_vm3, %v8744_v38  ;;  %7133 = vmatprep.mubr.msk.f32.mxu1 %vm548_vm3, %v8606_v29  ;;  %v11259_v38 = vld [vmem:[#allocation9_spill] sm:$0xff] }
  0x62   : > { %7552 = vmatprep.mubr.msk.f32.mxu0 %vm548_vm3, %v9128_v61  ;;  %v1141_v61 = vrot.slane %v8591_v20, 2  ;;  %v1142_v24 = vrot.slane %v11259_v38, 2  ;;  %v11265_v20 = vld [vmem:[#allocation12_spill] sm:$0xff] }
  0x64   : > { %7134 = vmatmul.mubr.msk.f32.gmra.mrb[4].mxu1 %vm548_vm3, %v8608_v30  ;;  %v9295_v38 = vsel %vm1134_vm5, %v1141_v61, %v1142_v24  ;;  %v1138_v24 = vrot.slane %v8602_v27, 2  ;;  %v11266_v61 = vld [vmem:[#allocation7_spill] sm:$0xff]  ;;  %v11270_v27 = vld [vmem:[#allocation16_spill] sm:$0xff] }
  0x65   : > { %7553 = vmatmul.mubr.msk.f32.gmra.mrb[6].mxu0 %vm548_vm3, %v9142_v48  ;;  %7136 = vmatprep.mubr.msk.f32.mxu1 %vm548_vm3, %v8637_v46  ;;  %v264_v48 = vld [vmem:[%s8581_s11 + $0x154] sm:$0x3]  ;;  %11264 = vst [vmem:[#allocation69_spill] sm:$0xff] %v9295_v38 }
  0x66   : > { %7555 = vmatprep.mubr.msk.f32.mxu0 %vm548_vm3, %v8780_v5  ;;  %v3372_v5 = vrot.slane %v9164_v19, 1 }
  0x68   : > { %7137 = vmatmul.mubr.msk.f32.gmra.mrb[6].mxu1 %vm548_vm3, %v8660_v56 }
  0x69   : > { %7556 = vmatmul.mubr.msk.f32.gmra.mrb[8].mxu0 %vm548_vm3, %v8801_v34  ;;  %7139 = vmatprep.mubr.msk.f32.mxu1 %vm548_vm3, %v8702_v11  ;;  %v11251_v34 = vld [vmem:[#allocation50_spill] sm:$0xff] }
  0x6a   : > { %7558 = vmatprep.mubr.msk.f32.mxu0 %vm548_vm3, %v8811_v45  ;;  %v9179_v45 = vsel %vm451_vm4, %v2255_v17, %v2256_v53  ;;  %v240_v17 = vld [vmem:[%s8581_s11 + $0xf4] sm:$0x3] }
  0x6b   : > { %11241 = vst [vmem:[#allocation91_spill] sm:$0xff] %v9179_v45  ;;  %v9201_v53 = vunpack.c.l.bf16 %v240_v17 }
  0x6c   : > { %7140 = vmatmul.mubr.msk.f32.gmra.mrb[8].mxu1 %vm548_vm3, %v8715_v16 }
  0x6d   : > { %7559 = vmatmul.mubr.msk.f32.gmra.mrb[10].mxu0 %vm548_vm3, %v8832_v8  ;;  %7142 = vmatprep.mubr.msk.f32.mxu1 %vm548_vm3, %v8725_v25  ;;  %v2259_v17 = vrot.slane %v9201_v53, 1  ;;  %v11248_v8 = vld [vmem:[#allocation45_spill] sm:$0xff] }
  0x6e   : > { %7561 = vmatprep.mubr.msk.f32.mxu0 %vm548_vm3, %v8843_v0  ;;  %v9190_v0 = vsel %vm451_vm4, %v3371_v33, %v3372_v5  ;;  %v2258_v33 = vrot.slane %v8912_v43, 1 }
  0x6f   : > { %11242 = vst [vmem:[#allocation92_spill] sm:$0xff] %v9190_v0 }
  0x70   : > { %7143 = vmatmul.mubr.msk.f32.gmra.mrb[10].mxu1 %vm548_vm3, %v8735_v35 }
  0x71   : > { %7562 = vmatmul.mubr.msk.f32.gmra.mrb[12].mxu0 %vm548_vm3, %v8862_v40  ;;  %7145 = vmatprep.mubr.msk.f32.mxu1 %vm548_vm3, %v8737_v37  ;;  %v242_v40 = vld [vmem:[%s8581_s11 + $0xfc] sm:$0x3] }
  0x72   : > { %7564 = vmatprep.mubr.msk.f32.mxu0 %vm548_vm3, %v9179_v45  ;;  %v9212_v5 = vunpack.c.l.bf16 %v242_v40  ;;  %v11246_v40 = vld [vmem:[#allocation62_spill] sm:$0xff]  ;;  %v9227_v45 = vsel %vm451_vm4, %v2258_v33, %v2259_v17  ;;  %v262_v33 = vld [vmem:[%s8581_s11 + $0x14c] sm:$0x3]  ;;  %v11252_v17 = vld [vmem:[#allocation52_spill] sm:$0xff] }
  0x73   : > { %11247 = vst [vmem:[#allocation94_spill] sm:$0xff] %v9227_v45 }
  0x74   : > { %7146 = vmatmul.mubr.msk.f32.gmra.mrb[12].mxu1 %vm548_vm3, %v8762_v54  ;;  %11243 = vst [vmem:[#allocation93_spill] sm:$0xff] %v9212_v5 }
  0x75   : > { %7565 = vmatmul.mubr.msk.f32.gmra.mrb[14].mxu0 %vm548_vm3, %v9190_v0  ;;  %7148 = vmatprep.mubr.msk.f32.mxu1 %vm548_vm3, %v8772_v63  ;;  %v3375_v0 = vrot.slane %v9212_v5, 1 }
  0x76   : > { %7567 = vmatprep.mubr.msk.f32.mxu0 %vm548_vm3, %v8898_v10  ;;  %v11244_v10 = vld [vmem:[#allocation39_spill] sm:$0xff] }
  0x78   : > { %7149 = vmatmul.mubr.msk.f32.gmra.mrb[14].mxu1 %vm548_vm3, %v8791_v26 }
  0x79   : > { %7568 = vmatmul.mubr.msk.f32.gmra.mrb[16].mxu0 %vm548_vm3, %v8919_v18  ;;  %7151 = vmatprep.mubr.msk.f32.mxu1 %vm548_vm3, %v8814_v52  ;;  %v11245_v18 = vld [vmem:[#allocation67_spill] sm:$0xff] }
  0x7a   : > { %7570 = vmatprep.mubr.msk.f32.mxu0 %vm548_vm3, %v8929_v23  ;;  %v3374_v23 = vrot.slane %v11246_v40, 1 }
  0x7c   : > { %7152 = vmatmul.mubr.msk.f32.gmra.mrb[16].mxu1 %vm548_vm3, %v8835_v49 }
  0x7d   : > { %7571 = vmatmul.mubr.msk.f32.gmra.mrb[18].mxu0 %vm548_vm3, %v8950_v28  ;;  %7154 = vmatprep.mubr.msk.f32.mxu1 %vm548_vm3, %v11244_v10  ;;  %v11249_v28 = vld [vmem:[#allocation46_spill] sm:$0xff] }
  0x7e   : > { %7573 = vmatprep.mubr.msk.f32.mxu0 %vm548_vm3, %v11245_v18  ;;  %v9238_v18 = vsel %vm451_vm4, %v3374_v23, %v3375_v0  ;;  %v11255_v23 = vld [vmem:[#allocation60_spill] sm:$0xff]  ;;  %v9260_v0 = vunpack.c.l.bf16 %v264_v48 }
  0x7f   : > { %11250 = vst [vmem:[#allocation45_spill] sm:$0xff] %v9238_v18 }
  0x80   : > { %7155 = vmatmul.mubr.msk.f32.gmra.mrb[18].mxu1 %vm548_vm3, %v11248_v8  ;;  %11256 = vst [vmem:[#allocation52_spill] sm:$0xff] %v9260_v0  ;;  %v3378_v48 = vrot.slane %v9260_v0, 1  ;;  %v1148_v0 = vrot.slane %v11265_v20, 2 }
  0x81   : > { %7574 = vmatmul.mubr.msk.f32.gmra.mrb[20].mxu0 %vm548_vm3, %v8980_v41  ;;  %7157 = vmatprep.mubr.msk.f32.mxu1 %vm548_vm3, %v11249_v28  ;;  %v9249_v41 = vunpack.c.l.bf16 %v262_v33 }
  0x82   : > { %7576 = vmatprep.mubr.msk.f32.mxu0 %vm548_vm3, %v9227_v45  ;;  %v11254_v45 = vld [vmem:[#allocation56_spill] sm:$0xff] }
  0x83   : > { %11253 = vst [vmem:[#allocation50_spill] sm:$0xff] %v9249_v41  ;;  %v2262_v33 = vrot.slane %v9249_v41, 1  ;;  %v11271_v41 = vld [vmem:[#allocation79_spill] sm:$0xff] }
  0x84   : > { %7158 = vmatmul.mubr.msk.f32.gmra.mrb[20].mxu1 %vm548_vm3, %v11251_v34 }
  0x85   : > { %7577 = vmatmul.mubr.msk.f32.gmra.mrb[22].mxu0 %vm548_vm3, %v9238_v18  ;;  %7160 = vmatprep.mubr.msk.f32.mxu1 %vm548_vm3, %v11252_v17  ;;  %v2261_v18 = vrot.slane %v9043_v15, 1 }
  0x86   : > { %7579 = vmatprep.mubr.msk.f32.mxu0 %vm548_vm3, %v9015_v31  ;;  %v11257_v31 = vld [vmem:[#allocation63_spill] sm:$0xff] }
  0x88   : > { %7161 = vmatmul.mubr.msk.f32.gmra.mrb[22].mxu1 %vm548_vm3, %v11254_v45 }
  0x89   : > { %7580 = vmatmul.mubr.msk.f32.gmra.mrb[24].mxu0 %vm548_vm3, %v9032_v36  ;;  %7163 = vmatprep.mubr.msk.f32.mxu1 %vm548_vm3, %v11255_v23  ;;  %v9275_v36 = vsel %vm451_vm4, %v2261_v18, %v2262_v33  ;;  %v11262_v33 = vld [vmem:[#allocation10_spill] sm:$0xff] }
  0x8a   : > { %7582 = vmatprep.mubr.msk.f32.mxu0 %vm548_vm3, %v9041_v62  ;;  %v3377_v62 = vrot.slane %v9056_v57, 1  ;;  %11258 = vst [vmem:[#allocation56_spill] sm:$0xff] %v9275_v36  ;;  %v1154_v57 = vrot.slane %v11270_v27, 2 }
  0x8c   : > { %7164 = vmatmul.mubr.msk.f32.gmra.mrb[24].mxu1 %vm548_vm3, %v8953_v47  ;;  %v9289_v18 = vsel %vm451_vm4, %v3377_v62, %v3378_v48  ;;  %v379_v62 = vld [vmem:[%s10874_s1 + $0xc0] sm:$0xff]  ;;  %v380_v48 = vld [vmem:[%s10874_s1 + $0xc8] sm:$0xf] }
  0x8d   : > { %7583 = vmatmul.mubr.msk.f32.gmra.mrb[26].mxu0 %vm548_vm3, %v9054_v60  ;;  %7166 = vmatprep.mubr.msk.f32.mxu1 %vm548_vm3, %v11257_v31  ;;  %11261 = vst [vmem:[#allocation60_spill] sm:$0xff] %v9289_v18  ;;  %v1145_v60 = vrot.slane %v11262_v33, 2  ;;  %v1151_v33 = vrot.slane %v11268_v22, 2 }
  0x8e   : > { %7585 = vmatprep.mubr.msk.f32.mxu0 %vm548_vm3, %v9063_v51  ;;  %v1144_v51 = vrot.slane %v8593_v21, 2  ;;  %v1153_v21 = vrot.slane %v8637_v46, 2 }
  0x90   : > { %7167 = vmatmul.mubr.msk.f32.gmra.mrb[26].mxu1 %vm548_vm3, %v11260_v55  ;;  %v9316_v20 = vsel %vm1134_vm5, %v1144_v51, %v1145_v60  ;;  %v9348_v60 = vsel %vm1134_vm5, %v1150_v6, %v1151_v33  ;;  %v3648_v6 = vrot.slane %v8699_v9, 2  ;;  %v11278_v33 = vld [vmem:[#allocation25_spill] sm:$0xff] }
  0x91   : > { %7586 = vmatmul.mubr.msk.f32.gmra.mrb[28].mxu0 %vm548_vm3, %v9079_v59  ;;  %7169 = vmatprep.mubr.msk.f32.mxu1 %vm548_vm3, %v8973_v39  ;;  %v1147_v59 = vrot.slane %v8606_v29, 2  ;;  %11267 = vst [vmem:[#allocation95_spill] sm:$0xff] %v9316_v20  ;;  %v1137_v29 = vsel %vm1134_vm5, %v1135_v14, %v1136_v58  ;;  %v363_v58 = vld [vmem:[%s10874_s1 + $0x40] sm:$0xff]  ;;  %v364_v14 = vld [vmem:[%s10874_s1 + $0x48] sm:$0xf]  ;;  %11273 = vst [vmem:[#allocation96_spill] sm:$0xff] %v9348_v60 }
  0x92   : > { %7588 = vmatprep.mubr.msk.f32.mxu0 %vm548_vm3, %v9275_v36  ;;  %v1139_v36 = vrot.slane %v11266_v61, 2  ;;  %v9326_v61 = vpack.c.bf16 %v380_v48, %v379_v62  ;;  %v9353_v48 = vsel %vm1134_vm5, %v1153_v21, %v1154_v57 }
  0x94   : > { %7170 = vmatmul.mubr.msk.f32.gmra.mrb[28].mxu1 %vm548_vm3, %v8998_v4  ;;  %v9340_v51 = vsel %vm1134_vm5, %v1138_v24, %v1139_v36  ;;  %v2533_v36 = vrot.slane %v9083_v2, 2  ;;  %v9357_v24 = vpack.c.bf16 %v364_v14, %v363_v58  ;;  %v1166_v58 = vrot.slane %v11278_v33, 2 }
  0x95   : > { %7589 = vmatmul.mubr.msk.f32.gmra.mrb[30].mxu0 %vm548_vm3, %v9289_v18  ;;  %7172 = vmatprep.mubr.msk.f32.mxu1 %vm548_vm3, %v9008_v42  ;;  %v9322_v18 = vsel %vm1134_vm5, %v1147_v59, %v1148_v0  ;;  %11272 = vst [vmem:[#allocation16_spill] sm:$0xff] %v9340_v51  ;;  %v1156_v59 = vrot.slane %v8660_v56, 2  ;;  %v11274_v0 = vld [vmem:[#allocation17_spill] sm:$0xff]  ;;  %v1168_v14 = vrot.slane %v8735_v35, 2  ;;  %v1171_v33 = vrot.slane %v8737_v37, 2 }
  0x96   : > { %7595 = vmatprep.mubr.msk.f32.mxu0 %vm548_vm3, %v9295_v38  ;;  %11269 = vst [vmem:[#allocation14_spill] sm:$0xff] %v9322_v18  ;;  %v1157_v62 = vrot.slane %v11274_v0, 2  ;;  %11275 = vst [vmem:[#allocation17_spill] sm:$0xff] %v9353_v48 }
  0x98   : > { %7173 = vmatmul.mubr.msk.f32.gmra.mrb[30].mxu1 %vm548_vm3, %v11271_v41  ;;  %v9374_v21 = vsel %vm1134_vm5, %v1156_v59, %v1157_v62  ;;  %v11280_v62 = vld [vmem:[#allocation28_spill] sm:$0xff] }
  0x99   : > { %7596 = vmatmul.mubr.msk.f32.vlgmr.msra.gmra.mrb[0].mxu0 %vm548_vm3, %v9316_v20  ;;  %7179 = vmatprep.mubr.msk.f32.mxu1 %vm548_vm3, %v1137_v29  ;;  %v2532_v29 = vrot.slane %v8683_v1, 2  ;;  %11276 = vst [vmem:[#allocation97_spill] sm:$0xff] %v9374_v21 }
  0x9a   : > { %7598 = vmatprep.mubr.msk.f32.mxu0 %vm548_vm3, %v9322_v18  ;;  %7974 = vmatpush3.bf16.msk.msra.mxu0 %vm8535_vm2, %v9086_v44  ;;  %v3649_v44 = vrot.slane %v9105_v7, 2 }
  0x9b   : > { %7977 = vmatprep.subr.msk.bf16.mxu0 %vm8535_vm2, %v9326_v61  ;;  %v9379_v57 = vsel %vm1134_vm5, %v2532_v29, %v2533_v36  ;;  %v1169_v29 = vrot.slane %v11280_v62, 2  ;;  %v1159_v36 = vrot.slane %v8702_v11, 2 }
  0x9c   : > { %7180 = vmatmul.mubr.msk.f32.vlgmr.msra.gmra.mrb[0].mxu1 %vm548_vm3, %v9340_v51  ;;  %11277 = vst [vmem:[#allocation98_spill] sm:$0xff] %v9379_v57  ;;  %v9396_v59 = vsel %vm1134_vm5, %v3648_v6, %v3649_v44  ;;  %v1162_v6 = vrot.slane %v8715_v16, 2  ;;  %v11284_v44 = vld [vmem:[#allocation22_spill] sm:$0xff]  ;;  %v11288_v16 = vld [vmem:[#allocation33_spill] sm:$0xff] }
  0x9d   : > { %7926 = vmatpush3.bf16.msk.msra.mxu1 %vm8535_vm2, %v9109_v50  ;;  %7599 = vmatmul.mubr.msk.f32.gmra.mrb[2].mxu0 %vm548_vm3, %v9348_v60  ;;  %v1165_v50 = vrot.slane %v8725_v25, 2  ;;  %11279 = vst [vmem:[#allocation99_spill] sm:$0xff] %v9396_v59 }
  0x9e   : > { %7182 = vmatprep.mubr.msk.f32.mxu1 %vm548_vm3, %v9295_v38  ;;  %7601 = vmatprep.mubr.msk.f32.mxu0 %vm548_vm3, %v9353_v48  ;;  %v11281_v38 = vld [vmem:[#allocation19_spill] sm:$0xff] }
  0x9f   : > { %7929 = vmatprep.subr.msk.bf16.mxu1 %vm8535_vm2, %v9357_v24  ;;  %v1160_v51 = vrot.slane %v11281_v38, 2  ;;  %v1178_v38 = vrot.slane %v11288_v16, 2 }
  0xa0   : > { %7183 = vmatmul.mubr.msk.f32.gmra.mrb[2].mxu1 %vm548_vm3, %v9316_v20  ;;  %v9402_v20 = vsel %vm1134_vm5, %v1165_v50, %v1166_v58  ;;  %v9417_v50 = vsel %vm1134_vm5, %v1168_v14, %v1169_v29  ;;  %v11291_v14 = vld [vmem:[#allocation35_spill] sm:$0xff] }
  0xa1   : > { %7602 = vmatmul.mubr.msk.f32.gmra.mrb[4].mxu0 %vm548_vm3, %v9374_v21  ;;  %7185 = vmatprep.mubr.msk.f32.mxu1 %vm548_vm3, %v9322_v18  ;;  %11282 = vst [vmem:[#allocation28_spill] sm:$0xff] %v9402_v20  ;;  %v11283_v18 = vld [vmem:[#allocation29_spill] sm:$0xff]  ;;  %11285 = vst [vmem:[#allocation22_spill] sm:$0xff] %v9417_v50  ;;  %v1161_v58 = vsel %vm1134_vm5, %v1159_v36, %v1160_v51  ;;  %v1181_v29 = vrot.slane %v11291_v14, 2 }
  0xa2   : > { %7604 = vmatprep.mubr.msk.f32.mxu0 %vm548_vm3, %v9379_v57  ;;  %v1172_v25 = vrot.slane %v11283_v18, 2  ;;  %v1163_v57 = vrot.slane %v11284_v44, 2  ;;  %v11286_v18 = vld [vmem:[#allocation31_spill] sm:$0xff] }
  0xa3   : > { %v1175_v37 = vrot.slane %v11286_v18, 2 }
  0xa4   : > { %7186 = vmatmul.mubr.msk.f32.gmra.mrb[4].mxu1 %vm548_vm3, %v9348_v60  ;;  %v1174_v60 = vrot.slane %v8762_v54, 2  ;;  %v9433_v51 = vsel %vm1134_vm5, %v1162_v6, %v1163_v57  ;;  %v1189_v57 = vrot.slane %v11244_v10, 2  ;;  %v11295_v6 = vld [vmem:[#allocation44_spill] sm:$0xff]  ;;  %v11437_v3 = vld [vmem:[#allocation99_spill] sm:$0xff] }
  0xa5   : > { %7605 = vmatmul.mubr.msk.f32.gmra.mrb[6].mxu0 %vm548_vm3, %v9396_v59  ;;  %7188 = vmatprep.mubr.msk.f32.mxu1 %vm548_vm3, %v9353_v48  ;;  %v9423_v59 = vsel %vm1134_vm5, %v1171_v33, %v1172_v25  ;;  %v1177_v48 = vrot.slane %v8772_v63, 2  ;;  %11289 = vst [vmem:[#allocation33_spill] sm:$0xff] %v9433_v51  ;;  %v1180_v33 = vrot.slane %v8791_v26, 2 }
  0xa6   : > { %7607 = vmatprep.mubr.msk.f32.mxu0 %vm548_vm3, %v9402_v20  ;;  %11287 = vst [vmem:[#allocation31_spill] sm:$0xff] %v9423_v59  ;;  %v9438_v25 = vsel %vm1134_vm5, %v1174_v60, %v1175_v37  ;;  %v3652_v60 = vrot.slane %v9164_v19, 2  ;;  %v1195_v19 = vrot.slane %v11249_v28, 2 }
  0xa7   : > { %11290 = vst [vmem:[#allocation100_spill] sm:$0xff] %v9438_v25  ;;  %v9443_v36 = vsel %vm1134_vm5, %v1177_v48, %v1178_v38  ;;  %v9456_v37 = vsel %vm1134_vm5, %v1180_v33, %v1181_v29  ;;  %v3651_v38 = vrot.slane %v8822_v13, 2  ;;  %v1192_v33 = vrot.slane %v11248_v8, 2  ;;  %v11297_v29 = vld [vmem:[#allocation48_spill] sm:$0xff] }
  0xa8   : > { %7189 = vmatmul.mubr.msk.f32.gmra.mrb[6].mxu1 %vm548_vm3, %v9374_v21  ;;  %11292 = vst [vmem:[#allocation35_spill] sm:$0xff] %v9443_v36  ;;  %v2535_v21 = vrot.slane %v8794_v32, 2  ;;  %11293 = vst [vmem:[#allocation101_spill] sm:$0xff] %v9456_v37 }
  0xa9   : > { %7608 = vmatmul.mubr.msk.f32.gmra.mrb[8].mxu0 %vm548_vm3, %v9417_v50  ;;  %7191 = vmatprep.mubr.msk.f32.mxu1 %vm548_vm3, %v1161_v58  ;;  %v2536_v58 = vrot.slane %v9153_v12, 2 }
  0xaa   : > { %7610 = vmatprep.mubr.msk.f32.mxu0 %vm548_vm3, %v9423_v59 }
  0xab   : > { %v9461_v48 = vsel %vm1134_vm5, %v2535_v21, %v2536_v58  ;;  %v9475_v21 = vsel %vm1134_vm5, %v3651_v38, %v3652_v60  ;;  %v1193_v58 = vrot.slane %v11297_v29, 2  ;;  %v1186_v38 = vrot.slane %v8835_v49, 2  ;;  %v11301_v60 = vld [vmem:[#allocation42_spill] sm:$0xff]  ;;  %v11305_v49 = vld [vmem:[#allocation55_spill] sm:$0xff] }
  0xac   : > { %7192 = vmatmul.mubr.msk.f32.gmra.mrb[8].mxu1 %vm548_vm3, %v9433_v51  ;;  %11294 = vst [vmem:[#allocation102_spill] sm:$0xff] %v9461_v48  ;;  %v1190_v51 = vrot.slane %v11295_v6, 2  ;;  %11296 = vst [vmem:[#allocation103_spill] sm:$0xff] %v9475_v21  ;;  %v11298_v6 = vld [vmem:[#allocation37_spill] sm:$0xff] }
  0xad   : > { %7611 = vmatmul.mubr.msk.f32.gmra.mrb[10].mxu0 %vm548_vm3, %v9438_v25  ;;  %7194 = vmatprep.mubr.msk.f32.mxu1 %vm548_vm3, %v9402_v20  ;;  %v1183_v20 = vrot.slane %v8814_v52, 2 }
  0xae   : > { %7613 = vmatprep.mubr.msk.f32.mxu0 %vm548_vm3, %v9443_v36  ;;  %v9481_v10 = vsel %vm1134_vm5, %v1189_v57, %v1190_v51  ;;  %v9496_v51 = vsel %vm1134_vm5, %v1192_v33, %v1193_v58 }
  0xaf   : > { %11299 = vst [vmem:[#allocation48_spill] sm:$0xff] %v9481_v10  ;;  %11302 = vst [vmem:[#allocation42_spill] sm:$0xff] %v9496_v51 }
  0xb0   : > { %7195 = vmatmul.mubr.msk.f32.gmra.mrb[10].mxu1 %vm548_vm3, %v9417_v50  ;;  %v1184_v50 = vrot.slane %v11298_v6, 2  ;;  %v1202_v6 = vrot.slane %v11305_v49, 2 }
  0xb1   : > { %7614 = vmatmul.mubr.msk.f32.gmra.mrb[12].mxu0 %vm548_vm3, %v9456_v37  ;;  %7197 = vmatprep.mubr.msk.f32.mxu1 %vm548_vm3, %v9423_v59  ;;  %v11300_v59 = vld [vmem:[#allocation49_spill] sm:$0xff] }
  0xb2   : > { %7616 = vmatprep.mubr.msk.f32.mxu0 %vm548_vm3, %v9461_v48  ;;  %v1196_v13 = vrot.slane %v11300_v59, 2  ;;  %v1187_v48 = vrot.slane %v11301_v60, 2  ;;  %v1185_v57 = vsel %vm1134_vm5, %v1183_v20, %v1184_v50  ;;  %v11303_v59 = vld [vmem:[#allocation53_spill] sm:$0xff]  ;;  %v11308_v50 = vld [vmem:[#allocation58_spill] sm:$0xff] }
  0xb3   : > { %v1199_v28 = vrot.slane %v11303_v59, 2  ;;  %v1205_v33 = vrot.slane %v11308_v50, 2 }
  0xb4   : > { %7198 = vmatmul.mubr.msk.f32.gmra.mrb[12].mxu1 %vm548_vm3, %v9438_v25  ;;  %v1198_v25 = vrot.slane %v11251_v34, 2  ;;  %v9512_v20 = vsel %vm1134_vm5, %v1186_v38, %v1187_v48  ;;  %v11312_v38 = vld [vmem:[#allocation68_spill] sm:$0xff] }
  0xb5   : > { %7617 = vmatmul.mubr.msk.f32.gmra.mrb[14].mxu0 %vm548_vm3, %v9475_v21  ;;  %7200 = vmatprep.mubr.msk.f32.mxu1 %vm548_vm3, %v9443_v36  ;;  %v9502_v21 = vsel %vm1134_vm5, %v1195_v19, %v1196_v13  ;;  %v1201_v36 = vrot.slane %v11252_v17, 2  ;;  %11306 = vst [vmem:[#allocation55_spill] sm:$0xff] %v9512_v20  ;;  %v1204_v19 = vrot.slane %v11254_v45, 2 }
  0xb6   : > { %7619 = vmatprep.mubr.msk.f32.mxu0 %vm548_vm3, %v9481_v10  ;;  %11304 = vst [vmem:[#allocation53_spill] sm:$0xff] %v9502_v21  ;;  %v9517_v13 = vsel %vm1134_vm5, %v1198_v25, %v1199_v28  ;;  %v3654_v25 = vrot.slane %v11246_v40, 2 }
  0xb7   : > { %11307 = vst [vmem:[#allocation104_spill] sm:$0xff] %v9517_v13  ;;  %v9522_v58 = vsel %vm1134_vm5, %v1201_v36, %v1202_v6  ;;  %v9535_v28 = vsel %vm1134_vm5, %v1204_v19, %v1205_v33  ;;  %v3655_v36 = vrot.slane %v9212_v5, 2  ;;  %v1213_v6 = vrot.slane %v11257_v31, 2  ;;  %v11314_v33 = vld [vmem:[#allocation72_spill] sm:$0xff] }
  0xb8   : > { %7201 = vmatmul.mubr.msk.f32.gmra.mrb[14].mxu1 %vm548_vm3, %v9456_v37  ;;  %11309 = vst [vmem:[#allocation58_spill] sm:$0xff] %v9522_v58  ;;  %v2538_v37 = vrot.slane %v8912_v43, 2  ;;  %11310 = vst [vmem:[#allocation105_spill] sm:$0xff] %v9535_v28  ;;  %v1216_v19 = vrot.slane %v11260_v55, 2  ;;  %v1219_v5 = vrot.slane %v8973_v39, 2 }
  0xb9   : > { %7620 = vmatmul.mubr.msk.f32.gmra.mrb[16].mxu0 %vm548_vm3, %v9496_v51  ;;  %7203 = vmatprep.mubr.msk.f32.mxu1 %vm548_vm3, %v1185_v57  ;;  %v2539_v57 = vrot.slane %v9201_v53, 2 }
  0xba   : > { %7622 = vmatprep.mubr.msk.f32.mxu0 %vm548_vm3, %v9502_v21 }
  0xbb   : > { %v9540_v48 = vsel %vm1134_vm5, %v2538_v37, %v2539_v57  ;;  %v9554_v37 = vsel %vm1134_vm5, %v3654_v25, %v3655_v36  ;;  %v1217_v57 = vrot.slane %v11314_v33, 2  ;;  %v1210_v25 = vrot.slane %v8953_v47, 2  ;;  %v11318_v36 = vld [vmem:[#allocation66_spill] sm:$0xff] }
  0xbc   : > { %7204 = vmatmul.mubr.msk.f32.gmra.mrb[16].mxu1 %vm548_vm3, %v9512_v20  ;;  %11311 = vst [vmem:[#allocation106_spill] sm:$0xff] %v9540_v48  ;;  %v1214_v20 = vrot.slane %v11312_v38, 2  ;;  %11313 = vst [vmem:[#allocation107_spill] sm:$0xff] %v9554_v37  ;;  %v11315_v38 = vld [vmem:[#allocation61_spill] sm:$0xff]  ;;  %v11322_v47 = vld [vmem:[#allocation78_spill] sm:$0xff] }
  0xbd   : > { %7623 = vmatmul.mubr.msk.f32.gmra.mrb[18].mxu0 %vm548_vm3, %v9517_v13  ;;  %7206 = vmatprep.mubr.msk.f32.mxu1 %vm548_vm3, %v9481_v10  ;;  %v1207_v10 = vrot.slane %v11255_v23, 2 }
  0xbe   : > { %7625 = vmatprep.mubr.msk.f32.mxu0 %vm548_vm3, %v9522_v58  ;;  %v9560_v31 = vsel %vm1134_vm5, %v1213_v6, %v1214_v20  ;;  %v9575_v20 = vsel %vm1134_vm5, %v1216_v19, %v1217_v57 }
  0xbf   : > { %11316 = vst [vmem:[#allocation72_spill] sm:$0xff] %v9560_v31  ;;  %11319 = vst [vmem:[#allocation66_spill] sm:$0xff] %v9575_v20 }
  0xc0   : > { %7207 = vmatmul.mubr.msk.f32.gmra.mrb[18].mxu1 %vm548_vm3, %v9496_v51  ;;  %v1208_v51 = vrot.slane %v11315_v38, 2  ;;  %v1226_v38 = vrot.slane %v11322_v47, 2  ;;  %v11327_v47 = vld [vmem:[#allocation50_spill] sm:$0xff] }
  0xc1   : > { %7626 = vmatmul.mubr.msk.f32.gmra.mrb[20].mxu0 %vm548_vm3, %v9535_v28  ;;  %7209 = vmatprep.mubr.msk.f32.mxu1 %vm548_vm3, %v9502_v21  ;;  %v11317_v21 = vld [vmem:[#allocation73_spill] sm:$0xff] }
  0xc2   : > { %7628 = vmatprep.mubr.msk.f32.mxu0 %vm548_vm3, %v9540_v48  ;;  %v1220_v40 = vrot.slane %v11317_v21, 2  ;;  %v1211_v48 = vrot.slane %v11318_v36, 2  ;;  %v1209_v6 = vsel %vm1134_vm5, %v1207_v10, %v1208_v51  ;;  %v11320_v21 = vld [vmem:[#allocation76_spill] sm:$0xff]  ;;  %v11325_v51 = vld [vmem:[#allocation81_spill] sm:$0xff] }
  0xc3   : > { %v1223_v39 = vrot.slane %v11320_v21, 2  ;;  %v1229_v19 = vrot.slane %v11325_v51, 2 }
  0xc4   : > { %7210 = vmatmul.mubr.msk.f32.gmra.mrb[20].mxu1 %vm548_vm3, %v9517_v13  ;;  %v1222_v13 = vrot.slane %v8998_v4, 2  ;;  %v9591_v10 = vsel %vm1134_vm5, %v1210_v25, %v1211_v48  ;;  %v11329_v48 = vld [vmem:[#allocation52_spill] sm:$0xff] }
  0xc5   : > { %7629 = vmatmul.mubr.msk.f32.gmra.mrb[22].mxu0 %vm548_vm3, %v9554_v37  ;;  %7212 = vmatprep.mubr.msk.f32.mxu1 %vm548_vm3, %v9522_v58  ;;  %v9581_v37 = vsel %vm1134_vm5, %v1219_v5, %v1220_v40  ;;  %v1225_v58 = vrot.slane %v9008_v42, 2  ;;  %11323 = vst [vmem:[#allocation109_spill] sm:$0xff] %v9591_v10  ;;  %v1228_v40 = vrot.slane %v11271_v41, 2  ;;  %v3658_v25 = vrot.slane %v11329_v48, 2  ;;  %v11338_v41 = vld [vmem:[#allocation8_spill] sm:$0xff] }
  0xc6   : > { %7631 = vmatprep.mubr.msk.f32.mxu0 %vm548_vm3, %v9560_v31  ;;  %11321 = vst [vmem:[#allocation108_spill] sm:$0xff] %v9581_v37  ;;  %v9596_v5 = vsel %vm1134_vm5, %v1222_v13, %v1223_v39  ;;  %v11328_v39 = vld [vmem:[#allocation85_spill] sm:$0xff]  ;;  %v1568_v42 = vrot.slane %v11338_v41, 3 }
  0xc7   : > { %11324 = vst [vmem:[#allocation110_spill] sm:$0xff] %v9596_v5  ;;  %v9601_v57 = vsel %vm1134_vm5, %v1225_v58, %v1226_v38  ;;  %v3657_v13 = vrot.slane %v11328_v39, 2  ;;  %v9616_v58 = vsel %vm1134_vm5, %v1228_v40, %v1229_v19 }
  0xc8   : > { %7213 = vmatmul.mubr.msk.f32.gmra.mrb[22].mxu1 %vm548_vm3, %v9535_v28  ;;  %11326 = vst [vmem:[#allocation111_spill] sm:$0xff] %v9601_v57  ;;  %v2541_v28 = vrot.slane %v9043_v15, 2  ;;  %v11332_v15 = vld [vmem:[#allocation9_spill] sm:$0xff] }
  0xc9   : > { %7632 = vmatmul.mubr.msk.f32.gmra.mrb[24].mxu0 %vm548_vm3, %v9575_v20  ;;  %7215 = vmatprep.mubr.msk.f32.mxu1 %vm548_vm3, %v1209_v6  ;;  %v2542_v6 = vrot.slane %v11327_v47, 2  ;;  %v1563_v51 = vrot.slane %v11332_v15, 3  ;;  %v9630_v40 = vsel %vm1134_vm5, %v3657_v13, %v3658_v25  ;;  %v381_v13 = vld [vmem:[%s10874_s1 + $0xd0] sm:$0xff] }
  0xca   : > { %7634 = vmatprep.mubr.msk.f32.mxu0 %vm548_vm3, %v9581_v37  ;;  %11333 = vst [vmem:[#allocation9_spill] sm:$0xff] %v9630_v40 }
  0xcb   : > { %v9619_v38 = vsel %vm1134_vm5, %v2541_v28, %v2542_v6  ;;  %v11334_v28 = vld [vmem:[#allocation3_spill] sm:$0xff]  ;;  %v11335_v6 = vld [vmem:[#allocation10_spill] sm:$0xff] }
  0xcc   : > { %7216 = vmatmul.mubr.msk.f32.gmra.mrb[24].mxu1 %vm548_vm3, %v9591_v10  ;;  %11330 = vst [vmem:[#allocation112_spill] sm:$0xff] %v9619_v38  ;;  %v11331_v10 = vld [vmem:[#allocation2_spill] sm:$0xff]  ;;  %v1565_v19 = vrot.slane %v11334_v28, 3  ;;  %v1566_v15 = vrot.slane %v11335_v6, 3 }
  0xcd   : > { %7635 = vmatmul.mubr.msk.f32.gmra.mrb[26].mxu0 %vm548_vm3, %v9596_v5  ;;  %7218 = vmatprep.mubr.msk.f32.mxu1 %vm548_vm3, %v9560_v31  ;;  %v1562_v47 = vrot.slane %v11331_v10, 3  ;;  %v11336_v31 = vld [vmem:[#allocation4_spill] sm:$0xff] }
  0xce   : > { %7637 = vmatprep.mubr.msk.f32.mxu0 %vm548_vm3, %v9601_v57  ;;  %v1556_v10 = vrot.slane %v11336_v31, 3  ;;  %v382_v31 = vld [vmem:[%s10874_s1 + $0xd8] sm:$0xf]  ;;  %v9660_v25 = vsel %vm1555_vm6, %v1565_v19, %v1566_v15  ;;  %v2812_v15 = vrot.slane %v8683_v1, 3 }
  0xcf   : > { %v9639_v39 = vsel %vm1555_vm6, %v1562_v47, %v1563_v51  ;;  %v11340_v47 = vld [vmem:[#allocation6_spill] sm:$0xff] }
  0xd0   : > { %7219 = vmatmul.mubr.msk.f32.gmra.mrb[26].mxu1 %vm548_vm3, %v9575_v20  ;;  %v11337_v20 = vld [vmem:[#allocation5_spill] sm:$0xff] }
  0xd1   : > { %7638 = vmatmul.mubr.msk.f32.gmra.mrb[28].mxu0 %vm548_vm3, %v9616_v58  ;;  %7221 = vmatprep.mubr.msk.f32.mxu1 %vm548_vm3, %v9581_v37  ;;  %v1557_v48 = vrot.slane %v11337_v20, 3  ;;  %v11339_v37 = vld [vmem:[#allocation12_spill] sm:$0xff]  ;;  %v1559_v20 = vrot.slane %v11340_v47, 3  ;;  %v1575_v47 = vrot.slane %v11270_v27, 3 }
  0xd2   : > { %7640 = vmatprep.mubr.msk.f32.mxu0 %vm548_vm3, %v9619_v38  ;;  %v1569_v21 = vrot.slane %v11339_v37, 3  ;;  %v11341_v37 = vld [vmem:[#allocation7_spill] sm:$0xff]  ;;  %v1571_v38 = vrot.slane %v8608_v30, 3 }
  0xd3   : > { %v1560_v51 = vrot.slane %v11341_v37, 3  ;;  %v1558_v6 = vsel %vm1555_vm6, %v1556_v10, %v1557_v48  ;;  %v9670_v37 = vpack.c.bf16 %v382_v31, %v381_v13  ;;  %v365_v10 = vld [vmem:[%s10874_s1 + $0x50] sm:$0xff]  ;;  %v1578_v48 = vrot.slane %v11274_v0, 3 }
  0xd4   : > { %7222 = vmatmul.mubr.msk.f32.gmra.mrb[28].mxu1 %vm548_vm3, %v9596_v5  ;;  %v1572_v5 = vrot.slane %v11268_v22, 3  ;;  %v366_v22 = vld [vmem:[%s10874_s1 + $0x58] sm:$0xf]  ;;  %v2813_v13 = vrot.slane %v9083_v2, 3  ;;  %v3929_v0 = vrot.slane %v9105_v7, 3  ;;  %v1589_v7 = vrot.slane %v8735_v35, 3 }
  0xd5   : > { %7641 = vmatmul.mubr.msk.f32.gmra.mrb[30].mxu0 %vm548_vm3, %v9630_v40  ;;  %7224 = vmatprep.mubr.msk.f32.mxu1 %vm548_vm3, %v9601_v57  ;;  %v9666_v40 = vsel %vm1555_vm6, %v1568_v42, %v1569_v21  ;;  %v1574_v57 = vrot.slane %v8637_v46, 3  ;;  %v9684_v27 = vsel %vm1555_vm6, %v1559_v20, %v1560_v51  ;;  %v1577_v21 = vrot.slane %v8660_v56, 3 }
  0xd6   : > { %7647 = vmatprep.mubr.msk.f32.mxu0 %vm548_vm3, %v9639_v39  ;;  %v9692_v42 = vsel %vm1555_vm6, %v1571_v38, %v1572_v5  ;;  %v9701_v31 = vpack.c.bf16 %v366_v22, %v365_v10  ;;  %v9723_v5 = vsel %vm1555_vm6, %v2812_v15, %v2813_v13  ;;  %v11344_v38 = vld [vmem:[#allocation25_spill] sm:$0xff]  ;;  %v1590_v51 = vrot.slane %v11280_v62, 3  ;;  %v11346_v10 = vld [vmem:[#allocation19_spill] sm:$0xff] }
  0xd7   : > { %v9697_v19 = vsel %vm1555_vm6, %v1574_v57, %v1575_v47  ;;  %v9718_v2 = vsel %vm1555_vm6, %v1577_v21, %v1578_v48  ;;  %11342 = vst [vmem:[#allocation3_spill] sm:$0xff] %v9723_v5  ;;  %v1587_v47 = vrot.slane %v11344_v38, 3  ;;  %v1581_v22 = vrot.slane %v11346_v10, 3  ;;  %v11348_v48 = vld [vmem:[#allocation26_spill] sm:$0xff]  ;;  %v11349_v13 = vld [vmem:[#allocation29_spill] sm:$0xff] }
  0xd8   : > { %7225 = vmatmul.mubr.msk.f32.gmra.mrb[30].mxu1 %vm548_vm3, %v9616_v58  ;;  %v1592_v15 = vrot.slane %v11348_v48, 3  ;;  %v1593_v38 = vrot.slane %v11349_v13, 3  ;;  %v11350_v62 = vld [vmem:[#allocation21_spill] sm:$0xff]  ;;  %v1596_v10 = vrot.slane %v11286_v18, 3 }
  0xd9   : > { %7648 = vmatmul.mubr.msk.f32.vlgmr.msra.gmra.mrb[0].mxu0 %vm548_vm3, %v9660_v25  ;;  %7231 = vmatprep.mubr.msk.f32.mxu1 %vm548_vm3, %v1558_v6  ;;  %v1580_v6 = vrot.slane %v8702_v11, 3  ;;  %v1583_v11 = vrot.slane %v11350_v62, 3 }
  0xda   : > { %7650 = vmatprep.mubr.msk.f32.mxu0 %vm548_vm3, %v9666_v40  ;;  %7980 = vmatpush3.bf16.msk.msra.mxu0 %vm8535_vm2, %v9326_v61  ;;  %v3928_v61 = vrot.slane %v8699_v9, 3  ;;  %v9767_v13 = vsel %vm1555_vm6, %v1592_v15, %v1593_v38  ;;  %v11356_v15 = vld [vmem:[#allocation90_spill] sm:$0xff] }
  0xdb   : > { %7983 = vmatprep.subr.msk.bf16.mxu0 %vm8535_vm2, %v9670_v37  ;;  %11352 = vst [vmem:[#allocation8_spill] sm:$0xff] %v9767_v13  ;;  %v3932_v38 = vrot.slane %v11356_v15, 3 }
  0xdc   : > { %7232 = vmatmul.mubr.msk.f32.vlgmr.msra.gmra.mrb[0].mxu1 %vm548_vm3, %v9684_v27  ;;  %v9740_v20 = vsel %vm1555_vm6, %v3928_v61, %v3929_v0  ;;  %v1584_v61 = vrot.slane %v11284_v44, 3  ;;  %v9761_v0 = vsel %vm1555_vm6, %v1589_v7, %v1590_v51  ;;  %v1601_v7 = vrot.slane %v8791_v26, 3 }
  0xdd   : > { %7932 = vmatpush3.bf16.msk.msra.mxu1 %vm8535_vm2, %v9357_v24  ;;  %7651 = vmatmul.mubr.msk.f32.gmra.mrb[2].mxu0 %vm548_vm3, %v9692_v42  ;;  %v11343_v24 = vld [vmem:[#allocation24_spill] sm:$0xff]  ;;  %11345 = vst [vmem:[#allocation10_spill] sm:$0xff] %v9740_v20  ;;  %11351 = vst [vmem:[#allocation5_spill] sm:$0xff] %v9761_v0 }
  0xde   : > { %7234 = vmatprep.mubr.msk.f32.mxu1 %vm548_vm3, %v9639_v39  ;;  %7653 = vmatprep.mubr.msk.f32.mxu0 %vm548_vm3, %v9697_v19  ;;  %v1586_v57 = vrot.slane %v11343_v24, 3  ;;  %v9777_v44 = vsel %vm1555_vm6, %v1583_v11, %v1584_v61  ;;  %v11358_v11 = vld [vmem:[#allocation39_spill] sm:$0xff] }
  0xdf   : > { %7935 = vmatprep.subr.msk.bf16.mxu1 %vm8535_vm2, %v9701_v31  ;;  %11353 = vst [vmem:[#allocation12_spill] sm:$0xff] %v9777_v44  ;;  %v1610_v61 = vrot.slane %v11358_v11, 3 }
  0xe0   : > { %7235 = vmatmul.mubr.msk.f32.gmra.mrb[2].mxu1 %vm548_vm3, %v9660_v25  ;;  %v9746_v21 = vsel %vm1555_vm6, %v1586_v57, %v1587_v47  ;;  %v1582_v57 = vsel %vm1555_vm6, %v1580_v6, %v1581_v22  ;;  %v1595_v47 = vrot.slane %v8762_v54, 3  ;;  %v2815_v6 = vrot.slane %v8794_v32, 3 }
  0xe1   : > { %7654 = vmatmul.mubr.msk.f32.gmra.mrb[4].mxu0 %vm548_vm3, %v9718_v2  ;;  %7237 = vmatprep.mubr.msk.f32.mxu1 %vm548_vm3, %v9666_v40  ;;  %11347 = vst [vmem:[#allocation4_spill] sm:$0xff] %v9746_v21  ;;  %v2816_v22 = vrot.slane %v9153_v12, 3 }
  0xe2   : > { %7656 = vmatprep.mubr.msk.f32.mxu0 %vm548_vm3, %v9723_v5  ;;  %v1599_v5 = vrot.slane %v11288_v16, 3  ;;  %v9782_v18 = vsel %vm1555_vm6, %v1595_v47, %v1596_v10  ;;  %v1602_v16 = vrot.slane %v11291_v14, 3  ;;  %v1613_v10 = vrot.slane %v11248_v8, 3 }
  0xe3   : > { %v9805_v12 = vsel %vm1555_vm6, %v2815_v6, %v2816_v22  ;;  %v1604_v6 = vrot.slane %v8814_v52, 3  ;;  %v11361_v22 = vld [vmem:[#allocation37_spill] sm:$0xff] }
  0xe4   : > { %7238 = vmatmul.mubr.msk.f32.gmra.mrb[4].mxu1 %vm548_vm3, %v9692_v42  ;;  %v9800_v14 = vsel %vm1555_vm6, %v1601_v7, %v1602_v16  ;;  %11357 = vst [vmem:[#allocation24_spill] sm:$0xff] %v9805_v12  ;;  %v1614_v16 = vrot.slane %v11297_v29, 3  ;;  %v1605_v15 = vrot.slane %v11361_v22, 3  ;;  %v11365_v29 = vld [vmem:[#allocation41_spill] sm:$0xff] }
  0xe5   : > { %7657 = vmatmul.mubr.msk.f32.gmra.mrb[6].mxu0 %vm548_vm3, %v9740_v20  ;;  %7240 = vmatprep.mubr.msk.f32.mxu1 %vm548_vm3, %v9697_v19  ;;  %v1598_v20 = vrot.slane %v8772_v63, 3  ;;  %11354 = vst [vmem:[#allocation7_spill] sm:$0xff] %v9800_v14  ;;  %v1607_v52 = vrot.slane %v11365_v29, 3 }
  0xe6   : > { %7659 = vmatprep.mubr.msk.f32.mxu0 %vm548_vm3, %v9746_v21 }
  0xe7   : > { %v9787_v51 = vsel %vm1555_vm6, %v1598_v20, %v1599_v5  ;;  %v11355_v5 = vld [vmem:[#allocation38_spill] sm:$0xff] }
  0xe8   : > { %7241 = vmatmul.mubr.msk.f32.gmra.mrb[6].mxu1 %vm548_vm3, %v9718_v2  ;;  %v3931_v20 = vrot.slane %v11355_v5, 3 }
  0xe9   : > { %7660 = vmatmul.mubr.msk.f32.gmra.mrb[8].mxu0 %vm548_vm3, %v9761_v0  ;;  %7243 = vmatprep.mubr.msk.f32.mxu1 %vm548_vm3, %v1582_v57  ;;  %v11359_v57 = vld [vmem:[#allocation44_spill] sm:$0xff] }
  0xea   : > { %7662 = vmatprep.mubr.msk.f32.mxu0 %vm548_vm3, %v9767_v13  ;;  %v1611_v47 = vrot.slane %v11359_v57, 3  ;;  %v9819_v7 = vsel %vm1555_vm6, %v3931_v20, %v3932_v38  ;;  %v1608_v20 = vrot.slane %v11301_v60, 3  ;;  %v9840_v38 = vsel %vm1555_vm6, %v1613_v10, %v1614_v16 }
  0xeb   : > { %11360 = vst [vmem:[#allocation25_spill] sm:$0xff] %v9819_v7  ;;  %11366 = vst [vmem:[#allocation26_spill] sm:$0xff] %v9840_v38  ;;  %v2818_v10 = vrot.slane %v8912_v43, 3  ;;  %v2819_v16 = vrot.slane %v9201_v53, 3 }
  0xec   : > { %7244 = vmatmul.mubr.msk.f32.gmra.mrb[8].mxu1 %vm548_vm3, %v9777_v44  ;;  %v9825_v57 = vsel %vm1555_vm6, %v1610_v61, %v1611_v47  ;;  %v1619_v61 = vrot.slane %v11251_v34, 3  ;;  %v1620_v47 = vrot.slane %v11303_v59, 3  ;;  %v9856_v60 = vsel %vm1555_vm6, %v1607_v52, %v1608_v20  ;;  %v11372_v52 = vld [vmem:[#allocation93_spill] sm:$0xff] }
  0xed   : > { %7663 = vmatmul.mubr.msk.f32.gmra.mrb[10].mxu0 %vm548_vm3, %v9782_v18  ;;  %7246 = vmatprep.mubr.msk.f32.mxu1 %vm548_vm3, %v9746_v21  ;;  %11362 = vst [vmem:[#allocation19_spill] sm:$0xff] %v9825_v57  ;;  %v11363_v21 = vld [vmem:[#allocation46_spill] sm:$0xff]  ;;  %11368 = vst [vmem:[#allocation21_spill] sm:$0xff] %v9856_v60  ;;  %v9884_v53 = vsel %vm1555_vm6, %v2818_v10, %v2819_v16  ;;  %v1628_v10 = vrot.slane %v11255_v23, 3  ;;  %v11378_v16 = vld [vmem:[#allocation61_spill] sm:$0xff] }
  0xee   : > { %7665 = vmatprep.mubr.msk.f32.mxu0 %vm548_vm3, %v9787_v51  ;;  %v1616_v44 = vrot.slane %v11363_v21, 3  ;;  %v9861_v59 = vsel %vm1555_vm6, %v1619_v61, %v1620_v47  ;;  %11374 = vst [vmem:[#allocation44_spill] sm:$0xff] %v9884_v53 }
  0xef   : > { %11369 = vst [vmem:[#allocation38_spill] sm:$0xff] %v9861_v59 }
  0xf0   : > { %7247 = vmatmul.mubr.msk.f32.gmra.mrb[10].mxu1 %vm548_vm3, %v9761_v0 }
  0xf1   : > { %7666 = vmatmul.mubr.msk.f32.gmra.mrb[12].mxu0 %vm548_vm3, %v9800_v14  ;;  %7249 = vmatprep.mubr.msk.f32.mxu1 %vm548_vm3, %v9767_v13  ;;  %v11364_v13 = vld [vmem:[#allocation49_spill] sm:$0xff] }
  0xf2   : > { %7668 = vmatprep.mubr.msk.f32.mxu0 %vm548_vm3, %v9805_v12  ;;  %v1617_v0 = vrot.slane %v11364_v13, 3  ;;  %v1606_v13 = vsel %vm1555_vm6, %v1604_v6, %v1605_v15  ;;  %v1623_v12 = vrot.slane %v11305_v49, 3  ;;  %v1626_v49 = vrot.slane %v11308_v50, 3  ;;  %v11371_v6 = vld [vmem:[#allocation62_spill] sm:$0xff] }
  0xf3   : > { %v3934_v15 = vrot.slane %v11371_v6, 3  ;;  %v3935_v50 = vrot.slane %v11372_v52, 3  ;;  %v1629_v52 = vrot.slane %v11378_v16, 3 }
  0xf4   : > { %7250 = vmatmul.mubr.msk.f32.gmra.mrb[12].mxu1 %vm548_vm3, %v9782_v18  ;;  %v9846_v22 = vsel %vm1555_vm6, %v1616_v44, %v1617_v0  ;;  %v1625_v0 = vrot.slane %v11254_v45, 3 }
  0xf5   : > { %7669 = vmatmul.mubr.msk.f32.gmra.mrb[14].mxu0 %vm548_vm3, %v9819_v7  ;;  %7252 = vmatprep.mubr.msk.f32.mxu1 %vm548_vm3, %v9787_v51  ;;  %11367 = vst [vmem:[#allocation29_spill] sm:$0xff] %v9846_v22  ;;  %v1622_v7 = vrot.slane %v11252_v17, 3  ;;  %v9895_v47 = vsel %vm1555_vm6, %v3934_v15, %v3935_v50  ;;  %v1632_v15 = vrot.slane %v11318_v36, 3 }
  0xf6   : > { %7671 = vmatprep.mubr.msk.f32.mxu0 %vm548_vm3, %v9825_v57  ;;  %11377 = vst [vmem:[#allocation37_spill] sm:$0xff] %v9895_v47 }
  0xf7   : > { %v9866_v44 = vsel %vm1555_vm6, %v1622_v7, %v1623_v12  ;;  %v9881_v12 = vsel %vm1555_vm6, %v1625_v0, %v1626_v49  ;;  %v11375_v7 = vld [vmem:[#allocation63_spill] sm:$0xff]  ;;  %v1637_v0 = vrot.slane %v11260_v55, 3  ;;  %v1638_v49 = vrot.slane %v11314_v33, 3  ;;  %v11381_v33 = vld [vmem:[#allocation65_spill] sm:$0xff] }
  0xf8   : > { %7253 = vmatmul.mubr.msk.f32.gmra.mrb[14].mxu1 %vm548_vm3, %v9800_v14  ;;  %11370 = vst [vmem:[#allocation90_spill] sm:$0xff] %v9866_v44  ;;  %11373 = vst [vmem:[#allocation39_spill] sm:$0xff] %v9881_v12  ;;  %v1634_v20 = vrot.slane %v11375_v7, 3  ;;  %v1631_v23 = vrot.slane %v11381_v33, 3 }
  0xf9   : > { %7672 = vmatmul.mubr.msk.f32.gmra.mrb[16].mxu0 %vm548_vm3, %v9840_v38  ;;  %7255 = vmatprep.mubr.msk.f32.mxu1 %vm548_vm3, %v1606_v13  ;;  %v11376_v13 = vld [vmem:[#allocation68_spill] sm:$0xff]  ;;  %v9919_v50 = vsel %vm1555_vm6, %v1637_v0, %v1638_v49 }
  0xfa   : > { %7674 = vmatprep.mubr.msk.f32.mxu0 %vm548_vm3, %v9846_v22  ;;  %v1635_v61 = vrot.slane %v11376_v13, 3  ;;  %v9935_v36 = vsel %vm1555_vm6, %v1631_v23, %v1632_v15  ;;  %v11390_v15 = vld [vmem:[#allocation52_spill] sm:$0xff] }
  0xfc   : > { %7256 = vmatmul.mubr.msk.f32.gmra.mrb[16].mxu1 %vm548_vm3, %v9856_v60  ;;  %v9904_v13 = vsel %vm1555_vm6, %v1634_v20, %v1635_v61  ;;  %v1643_v20 = vrot.slane %v8998_v4, 3  ;;  %v11382_v61 = vld [vmem:[#allocation76_spill] sm:$0xff] }
  0xfd   : > { %7675 = vmatmul.mubr.msk.f32.gmra.mrb[18].mxu0 %vm548_vm3, %v9861_v59  ;;  %7258 = vmatprep.mubr.msk.f32.mxu1 %vm548_vm3, %v9825_v57  ;;  %v11379_v57 = vld [vmem:[#allocation70_spill] sm:$0xff]  ;;  %v1644_v16 = vrot.slane %v11382_v61, 3 }
  0xfe   : > { %7677 = vmatprep.mubr.msk.f32.mxu0 %vm548_vm3, %v9866_v44  ;;  %v1640_v60 = vrot.slane %v11379_v57, 3 }
 0x100   : > { %7259 = vmatmul.mubr.msk.f32.gmra.mrb[18].mxu1 %vm548_vm3, %v9840_v38 }
 0x101   : > { %7678 = vmatmul.mubr.msk.f32.gmra.mrb[20].mxu0 %vm548_vm3, %v9881_v12  ;;  %7261 = vmatprep.mubr.msk.f32.mxu1 %vm548_vm3, %v9846_v22  ;;  %v11380_v22 = vld [vmem:[#allocation73_spill] sm:$0xff] }
 0x102   : > { %7680 = vmatprep.mubr.msk.f32.mxu0 %vm548_vm3, %v9884_v53  ;;  %v1641_v38 = vrot.slane %v11380_v22, 3  ;;  %v1630_v22 = vsel %vm1555_vm6, %v1628_v10, %v1629_v52  ;;  %v11383_v53 = vld [vmem:[#allocation75_spill] sm:$0xff] }
 0x103   : > { %v11387_v52 = vld [vmem:[#allocation83_spill] sm:$0xff] }
 0x104   : > { %7262 = vmatmul.mubr.msk.f32.gmra.mrb[20].mxu1 %vm548_vm3, %v9861_v59  ;;  %v11384_v59 = vld [vmem:[#allocation78_spill] sm:$0xff]  ;;  %v2821_v61 = vrot.slane %v11387_v52, 3 }
 0x105   : > { %7681 = vmatmul.mubr.msk.f32.gmra.mrb[22].mxu0 %vm548_vm3, %v9895_v47  ;;  %7264 = vmatprep.mubr.msk.f32.mxu1 %vm548_vm3, %v9866_v44  ;;  %v9925_v47 = vsel %vm1555_vm6, %v1640_v60, %v1641_v38  ;;  %v1646_v44 = vrot.slane %v11383_v53, 3  ;;  %v1647_v14 = vrot.slane %v11384_v59, 3  ;;  %v9940_v38 = vsel %vm1555_vm6, %v1643_v20, %v1644_v16  ;;  %v11385_v60 = vld [vmem:[#allocation79_spill] sm:$0xff]  ;;  %v11386_v59 = vld [vmem:[#allocation81_spill] sm:$0xff] }
 0x106   : > { %7683 = vmatprep.mubr.msk.f32.mxu0 %vm548_vm3, %v9904_v13  ;;  %v1649_v0 = vrot.slane %v11385_v60, 3  ;;  %v1650_v49 = vrot.slane %v11386_v59, 3  ;;  %v3938_v20 = vrot.slane %v11390_v15, 3  ;;  %v384_v59 = vld [vmem:[%s10874_s1 + $0xe8] sm:$0xf] }
 0x107   : > { %v9945_v10 = vsel %vm1555_vm6, %v1646_v44, %v1647_v14  ;;  %v11389_v14 = vld [vmem:[#allocation85_spill] sm:$0xff] }
 0x108   : > { %7265 = vmatmul.mubr.msk.f32.gmra.mrb[22].mxu1 %vm548_vm3, %v9881_v12  ;;  %v11388_v12 = vld [vmem:[#allocation50_spill] sm:$0xff]  ;;  %v9958_v23 = vsel %vm1555_vm6, %v1649_v0, %v1650_v49  ;;  %v3937_v44 = vrot.slane %v11389_v14, 3 }
 0x109   : > { %7684 = vmatmul.mubr.msk.f32.gmra.mrb[24].mxu0 %vm548_vm3, %v9919_v50  ;;  %7267 = vmatprep.mubr.msk.f32.mxu1 %vm548_vm3, %v1630_v22  ;;  %v2822_v22 = vrot.slane %v11388_v12, 3  ;;  %v383_v0 = vld [vmem:[%s10874_s1 + $0xe0] sm:$0xff] }
 0x10a   : > { %7686 = vmatprep.mubr.msk.f32.mxu0 %vm548_vm3, %v9925_v47  ;;  %v9974_v16 = vsel %vm1555_vm6, %v3937_v44, %v3938_v20  ;;  %v9990_v49 = vpack.c.bf16 %v384_v59, %v383_v0  ;;  %v11391_v44 = vld [vmem:[#allocation6_spill] sm:$0xff]  ;;  %v11409_v59 = vld [vmem:[#allocation91_spill] sm:$0xff] }
 0x10b   : > { %v9963_v12 = vsel %vm1555_vm6, %v2821_v61, %v2822_v22  ;;  %v367_v61 = vld [vmem:[%s10874_s1 + $0x60] sm:$0xff]  ;;  %v368_v22 = vld [vmem:[%s10874_s1 + $0x68] sm:$0xf] }
 0x10c   : > { %7268 = vmatmul.mubr.msk.f32.gmra.mrb[24].mxu1 %vm548_vm3, %v9935_v36  ;;  %v10009_v15 = vpack.c.bf16 %v368_v22, %v367_v61  ;;  %v11392_v20 = vld [vmem:[#allocation2_spill] sm:$0xff]  ;;  %v11411_v22 = vld [vmem:[#allocation57_spill] sm:$0xff] }
 0x10d   : > { %7687 = vmatmul.mubr.msk.f32.gmra.mrb[26].mxu0 %vm548_vm3, %v9940_v38  ;;  %7270 = vmatprep.mubr.msk.f32.mxu1 %vm548_vm3, %v9904_v13 }
 0x10e   : > { %7689 = vmatprep.mubr.msk.f32.mxu0 %vm548_vm3, %v9945_v10 }
 0x110   : > { %7271 = vmatmul.mubr.msk.f32.gmra.mrb[26].mxu1 %vm548_vm3, %v9919_v50 }
 0x111   : > { %7690 = vmatmul.mubr.msk.f32.gmra.mrb[28].mxu0 %vm548_vm3, %v9958_v23  ;;  %7273 = vmatprep.mubr.msk.f32.mxu1 %vm548_vm3, %v9925_v47 }
 0x112   : > { %7692 = vmatprep.mubr.msk.f32.mxu0 %vm548_vm3, %v9963_v12 }
 0x114   : > { %7274 = vmatmul.mubr.msk.f32.gmra.mrb[28].mxu1 %vm548_vm3, %v9940_v38 }
 0x115   : > { %7693 = vmatmul.mubr.msk.f32.gmra.mrb[30].mxu0 %vm548_vm3, %v9974_v16  ;;  %7276 = vmatprep.mubr.msk.f32.mxu1 %vm548_vm3, %v9945_v10 }
 0x116   : > { %7699 = vmatprep.mubr.msk.f32.mxu0 %vm548_vm3, %v11334_v28 }
 0x118   : > { %7277 = vmatmul.mubr.msk.f32.gmra.mrb[30].mxu1 %vm548_vm3, %v9958_v23 }
 0x119   : > { %7700 = vmatmul.mubr.msk.f32.vlgmr.msra.gmra.mrb[0].mxu0 %vm548_vm3, %v11338_v41  ;;  %7283 = vmatprep.mubr.msk.f32.mxu1 %vm548_vm3, %v11391_v44  ;;  %v244_v44 = vld [vmem:[%s8581_s11 + $0x104] sm:$0x3] }
 0x11a   : > { %7702 = vmatprep.mubr.msk.f32.mxu0 %vm548_vm3, %v8608_v30  ;;  %7986 = vmatpush3.bf16.msk.msra.mxu0 %vm8535_vm2, %v9670_v37  ;;  %v199_v37 = vld [vmem:[%s8581_s11 + $0x50] ss:$88 sps:$4 sm:$0xff]  }
 0x11b   : > { %7989 = vmatprep.subr.msk.bf16.mxu0 %vm8535_vm2, %v9990_v49 }
 0x11c   : > { %7284 = vmatmul.mubr.msk.f32.vlgmr.msra.gmra.mrb[0].mxu1 %vm548_vm3, %v11392_v20  ;;  %v11413_v20 = vld [vmem:[#allocation51_spill] sm:$0xff] }
 0x11d   : > { %7938 = vmatpush3.bf16.msk.msra.mxu1 %vm8535_vm2, %v9701_v31  ;;  %7703 = vmatmul.mubr.msk.f32.gmra.mrb[2].mxu0 %vm548_vm3, %v8637_v46  ;;  %v10035_v31 = vunpack.c.l.bf16 %v199_v37 }
 0x11e   : > { %7286 = vmatprep.mubr.msk.f32.mxu1 %vm548_vm3, %v11334_v28  ;;  %7705 = vmatprep.mubr.msk.f32.mxu0 %vm548_vm3, %v8660_v56  ;;  %v11399_v28 = vld [vmem:[#allocation27_spill] sm:$0xff] }
 0x11f   : > { %7941 = vmatprep.subr.msk.bf16.mxu1 %vm8535_vm2, %v10009_v15 }
 0x120   : > { %7287 = vmatmul.mubr.msk.f32.gmra.mrb[2].mxu1 %vm548_vm3, %v11338_v41 }
 0x121   : > { %7706 = vmatmul.mubr.msk.f32.gmra.mrb[4].mxu0 %vm548_vm3, %v8683_v1  ;;  %7289 = vmatprep.mubr.msk.f32.mxu1 %vm548_vm3, %v8608_v30  ;;  %v10069_v30 = vunpack.c.h.bf16 %v199_v37  ;;  %v11414_v37 = vld [vmem:[#allocation64_spill] sm:$0xff] }
 0x122   : > { %7708 = vmatprep.mubr.msk.f32.mxu0 %vm548_vm3, %v8699_v9  ;;  %v386_v9 = vld [vmem:[%s10874_s1 + $0xf8] sm:$0xf] }
 0x124   : > { %7290 = vmatmul.mubr.msk.f32.gmra.mrb[4].mxu1 %vm548_vm3, %v8637_v46  ;;  %v243_v46 = vld [vmem:[%s8581_s11 + $0x100] ss:$88 sps:$4 sm:$0xff]  }
 0x125   : > { %7709 = vmatmul.mubr.msk.f32.gmra.mrb[6].mxu0 %vm548_vm3, %v10035_v31  ;;  %7292 = vmatprep.mubr.msk.f32.mxu1 %vm548_vm3, %v8660_v56  ;;  %v10104_v56 = vunpack.c.l.bf16 %v243_v46 }
 0x126   : > { %7711 = vmatprep.mubr.msk.f32.mxu0 %vm548_vm3, %v8735_v35 }
 0x128   : > { %7293 = vmatmul.mubr.msk.f32.gmra.mrb[6].mxu1 %vm548_vm3, %v8683_v1  ;;  %v10138_v1 = vunpack.c.h.bf16 %v243_v46  ;;  %v10261_v46 = vunpack.c.l.bf16 %v244_v44  ;;  %v11438_v44 = vld [vmem:[#allocation22_spill] sm:$0xff] }
 0x129   : > { %7712 = vmatmul.mubr.msk.f32.gmra.mrb[8].mxu0 %vm548_vm3, %v11348_v48  ;;  %7295 = vmatprep.mubr.msk.f32.mxu1 %vm548_vm3, %v11350_v62  ;;  %v11401_v62 = vld [vmem:[#allocation89_spill] sm:$0xff] }
 0x12a   : > { %7714 = vmatprep.mubr.msk.f32.mxu0 %vm548_vm3, %v8762_v54 }
 0x12c   : > { %7296 = vmatmul.mubr.msk.f32.gmra.mrb[8].mxu1 %vm548_vm3, %v11343_v24  ;;  %v4484_v24 = vrot.slane %v10035_v31, 1 }
 0x12d   : > { %7715 = vmatmul.mubr.msk.f32.gmra.mrb[10].mxu0 %vm548_vm3, %v8772_v63  ;;  %7298 = vmatprep.mubr.msk.f32.mxu1 %vm548_vm3, %v8735_v35  ;;  %v11393_v35 = vld [vmem:[#allocation15_spill] sm:$0xff] }
 0x12e   : > { %7717 = vmatprep.mubr.msk.f32.mxu0 %vm548_vm3, %v8791_v26 }
 0x130   : > { %7299 = vmatmul.mubr.msk.f32.gmra.mrb[10].mxu1 %vm548_vm3, %v11348_v48  ;;  %v11400_v48 = vld [vmem:[#allocation88_spill] sm:$0xff] }
 0x131   : > { %7718 = vmatmul.mubr.msk.f32.gmra.mrb[12].mxu0 %vm548_vm3, %v8794_v32  ;;  %7301 = vmatprep.mubr.msk.f32.mxu1 %vm548_vm3, %v8762_v54  ;;  %v200_v54 = vld [vmem:[%s8581_s11 + $0x54] sm:$0x3] }
 0x132   : > { %7720 = vmatprep.mubr.msk.f32.mxu0 %vm548_vm3, %v11355_v5 }
 0x134   : > { %7302 = vmatmul.mubr.msk.f32.gmra.mrb[12].mxu1 %vm548_vm3, %v8772_v63 }
 0x135   : > { %7721 = vmatmul.mubr.msk.f32.gmra.mrb[14].mxu0 %vm548_vm3, %v10069_v30  ;;  %7304 = vmatprep.mubr.msk.f32.mxu1 %vm548_vm3, %v8791_v26  ;;  %v369_v26 = vld [vmem:[%s10874_s1 + $0x70] sm:$0xff] }
 0x136   : > { %7723 = vmatprep.mubr.msk.f32.mxu0 %vm548_vm3, %v11248_v8 }
 0x138   : > { %7305 = vmatmul.mubr.msk.f32.gmra.mrb[14].mxu1 %vm548_vm3, %v8794_v32  ;;  %v370_v32 = vld [vmem:[%s10874_s1 + $0x78] sm:$0xf] }
 0x139   : > { %7724 = vmatmul.mubr.msk.f32.gmra.mrb[16].mxu0 %vm548_vm3, %v11363_v21  ;;  %7307 = vmatprep.mubr.msk.f32.mxu1 %vm548_vm3, %v11365_v29  ;;  %v10178_v41 = vpack.c.bf16 %v370_v32, %v369_v26  ;;  %v11403_v29 = vld [vmem:[#allocation36_spill] sm:$0xff]  ;;  %v4491_v26 = vrot.slane %v10261_v46, 1  ;;  %v11418_v32 = vld [vmem:[#allocation94_spill] sm:$0xff] }
 0x13a   : > { %7726 = vmatprep.mubr.msk.f32.mxu0 %vm548_vm3, %v11251_v34 }
 0x13c   : > { %7308 = vmatmul.mubr.msk.f32.gmra.mrb[16].mxu1 %vm548_vm3, %v11358_v11  ;;  %v11402_v11 = vld [vmem:[#allocation34_spill] sm:$0xff] }
 0x13d   : > { %7727 = vmatmul.mubr.msk.f32.gmra.mrb[18].mxu0 %vm548_vm3, %v11252_v17  ;;  %7310 = vmatprep.mubr.msk.f32.mxu1 %vm548_vm3, %v11248_v8  ;;  %v11396_v8 = vld [vmem:[#allocation20_spill] sm:$0xff] }
 0x13e   : > { %7729 = vmatprep.mubr.msk.f32.mxu0 %vm548_vm3, %v11254_v45 }
 0x140   : > { %7311 = vmatmul.mubr.msk.f32.gmra.mrb[18].mxu1 %vm548_vm3, %v11363_v21 }
 0x141   : > { %7730 = vmatmul.mubr.msk.f32.gmra.mrb[20].mxu0 %vm548_vm3, %v8912_v43  ;;  %7313 = vmatprep.mubr.msk.f32.mxu1 %vm548_vm3, %v11251_v34  ;;  %v11394_v34 = vld [vmem:[#allocation18_spill] sm:$0xff] }
 0x142   : > { %7732 = vmatprep.mubr.msk.f32.mxu0 %vm548_vm3, %v11371_v6  ;;  %v11404_v6 = vld [vmem:[#allocation30_spill] sm:$0xff] }
 0x144   : > { %7314 = vmatmul.mubr.msk.f32.gmra.mrb[20].mxu1 %vm548_vm3, %v11252_v17  ;;  %v11398_v17 = vld [vmem:[#allocation23_spill] sm:$0xff] }
 0x145   : > { %7733 = vmatmul.mubr.msk.f32.gmra.mrb[22].mxu0 %vm548_vm3, %v10104_v56  ;;  %7316 = vmatprep.mubr.msk.f32.mxu1 %vm548_vm3, %v11254_v45  ;;  %v11395_v45 = vld [vmem:[#allocation11_spill] sm:$0xff] }
 0x146   : > { %7735 = vmatprep.mubr.msk.f32.mxu0 %vm548_vm3, %v11260_v55 }
 0x148   : > { %7317 = vmatmul.mubr.msk.f32.gmra.mrb[22].mxu1 %vm548_vm3, %v8912_v43  ;;  %v10176_v43 = vunpack.c.l.bf16 %v200_v54  ;;  %v4490_v54 = vrot.slane %v10104_v56, 1 }
 0x149   : > { %7736 = vmatmul.mubr.msk.f32.gmra.mrb[24].mxu0 %vm548_vm3, %v11379_v57  ;;  %7319 = vmatprep.mubr.msk.f32.mxu1 %vm548_vm3, %v11381_v33  ;;  %v11406_v33 = vld [vmem:[#allocation32_spill] sm:$0xff] }
 0x14a   : > { %7738 = vmatprep.mubr.msk.f32.mxu0 %vm548_vm3, %v8998_v4  ;;  %v4485_v21 = vrot.slane %v10176_v43, 1 }
 0x14c   : > { %7320 = vmatmul.mubr.msk.f32.gmra.mrb[24].mxu1 %vm548_vm3, %v11375_v7  ;;  %v4486_v5 = vsel %vm451_vm4, %v4484_v24, %v4485_v21  ;;  %v11423_v24 = vld [vmem:[#allocation84_spill] sm:$0xff] }
 0x14d   : > { %7739 = vmatmul.mubr.msk.f32.gmra.mrb[26].mxu0 %vm548_vm3, %v11383_v53  ;;  %7322 = vmatprep.mubr.msk.f32.mxu1 %vm548_vm3, %v11260_v55  ;;  %v385_v55 = vld [vmem:[%s10874_s1 + $0xf0] sm:$0xff] }
 0x14e   : > { %7741 = vmatprep.mubr.msk.f32.mxu0 %vm548_vm3, %v11385_v60  ;;  %v10157_v63 = vpack.c.bf16 %v386_v9, %v385_v55  ;;  %v11415_v55 = vld [vmem:[#allocation54_spill] sm:$0xff]  ;;  %v11416_v9 = vld [vmem:[#allocation67_spill] sm:$0xff] }
 0x150   : > { %7323 = vmatmul.mubr.msk.f32.gmra.mrb[26].mxu1 %vm548_vm3, %v11379_v57  ;;  %v222_v57 = vld [vmem:[%s8581_s11 + $0xac] sm:$0x3] }
 0x151   : > { %7742 = vmatmul.mubr.msk.f32.gmra.mrb[28].mxu0 %vm548_vm3, %v11387_v52  ;;  %7325 = vmatprep.mubr.msk.f32.mxu1 %vm548_vm3, %v8998_v4  ;;  %v11397_v4 = vld [vmem:[#allocation13_spill] sm:$0xff]  ;;  %v10224_v7 = vunpack.c.l.bf16 %v222_v57 }
 0x152   : > { %7744 = vmatprep.mubr.msk.f32.mxu0 %vm548_vm3, %v11389_v14  ;;  %v4487_v14 = vrot.slane %v10069_v30, 1 }
 0x153   : > { %v4488_v0 = vrot.slane %v10224_v7, 1 }
 0x154   : > { %7326 = vmatmul.mubr.msk.f32.gmra.mrb[28].mxu1 %vm548_vm3, %v11383_v53  ;;  %v11405_v53 = vld [vmem:[#allocation40_spill] sm:$0xff] }
 0x155   : > { %7745 = vmatmul.mubr.msk.f32.gmra.mrb[30].mxu0 %vm548_vm3, %v10138_v1  ;;  %7328 = vmatprep.mubr.msk.f32.mxu1 %vm548_vm3, %v11385_v60  ;;  %v11407_v60 = vld [vmem:[#allocation43_spill] sm:$0xff]  ;;  %v4489_v61 = vsel %vm451_vm4, %v4487_v14, %v4488_v0  ;;  %v11432_v14 = vld [vmem:[#allocation96_spill] sm:$0xff]  ;;  %v11433_v0 = vld [vmem:[#allocation69_spill] sm:$0xff] }
 0x156   : > { %7751 = vmatprep.mubr.msk.f32.mxu0 %vm548_vm3, %v11393_v35 }
 0x158   : > { %7329 = vmatmul.mubr.msk.f32.gmra.mrb[30].mxu1 %vm548_vm3, %v11387_v52  ;;  %v11408_v52 = vld [vmem:[#allocation47_spill] sm:$0xff] }
 0x159   : > { %7752 = vmatmul.mubr.msk.f32.vlgmr.msra.gmra.mrb[0].mxu0 %vm548_vm3, %v11394_v34  ;;  %7335 = vmatprep.mubr.msk.f32.mxu1 %vm548_vm3, %v11395_v45  ;;  %v4492_v45 = vsel %vm451_vm4, %v4490_v54, %v4491_v26  ;;  %v4767_v54 = vrot.slane %v10069_v30, 2  ;;  %v4768_v26 = vrot.slane %v10224_v7, 2 }
 0x15a   : > { %7754 = vmatprep.mubr.msk.f32.mxu0 %vm548_vm3, %v11396_v8  ;;  %7992 = vmatpush3.bf16.msk.msra.mxu0 %vm8535_vm2, %v9990_v49  ;;  %v11410_v49 = vld [vmem:[#allocation92_spill] sm:$0xff] }
 0x15b   : > { %7995 = vmatprep.subr.msk.bf16.mxu0 %vm8535_vm2, %v10157_v63 }
 0x15c   : > { %7336 = vmatmul.mubr.msk.f32.vlgmr.msra.gmra.mrb[0].mxu1 %vm548_vm3, %v11397_v4  ;;  %v266_v4 = vld [vmem:[%s8581_s11 + $0x15c] sm:$0x3] }
 0x15d   : > { %7944 = vmatpush3.bf16.msk.msra.mxu1 %vm8535_vm2, %v10009_v15  ;;  %7755 = vmatmul.mubr.msk.f32.gmra.mrb[2].mxu0 %vm548_vm3, %v11398_v17  ;;  %v11412_v15 = vld [vmem:[#allocation59_spill] sm:$0xff]  ;;  %v10298_v21 = vunpack.c.l.bf16 %v266_v4  ;;  %v11448_v4 = vld [vmem:[#allocation53_spill] sm:$0xff] }
 0x15e   : > { %7338 = vmatprep.mubr.msk.f32.mxu1 %vm548_vm3, %v11393_v35  ;;  %7757 = vmatprep.mubr.msk.f32.mxu0 %vm548_vm3, %v11399_v28  ;;  %v11417_v35 = vld [vmem:[#allocation71_spill] sm:$0xff] }
 0x15f   : > { %7947 = vmatprep.subr.msk.bf16.mxu1 %vm8535_vm2, %v10178_v41  ;;  %v4494_v57 = vrot.slane %v10298_v21, 1 }
 0x160   : > { %7339 = vmatmul.mubr.msk.f32.gmra.mrb[2].mxu1 %vm548_vm3, %v11394_v34  ;;  %v11419_v34 = vld [vmem:[#allocation45_spill] sm:$0xff] }
 0x161   : > { %7758 = vmatmul.mubr.msk.f32.gmra.mrb[4].mxu0 %vm548_vm3, %v11400_v48  ;;  %7341 = vmatprep.mubr.msk.f32.mxu1 %vm548_vm3, %v11396_v8  ;;  %v11420_v8 = vld [vmem:[#allocation80_spill] sm:$0xff] }
 0x162   : > { %7760 = vmatprep.mubr.msk.f32.mxu0 %vm548_vm3, %v11401_v62  ;;  %v11425_v62 = vld [vmem:[#allocation86_spill] sm:$0xff] }
 0x164   : > { %7342 = vmatmul.mubr.msk.f32.gmra.mrb[4].mxu1 %vm548_vm3, %v11398_v17  ;;  %v11421_v17 = vld [vmem:[#allocation82_spill] sm:$0xff] }
 0x165   : > { %7761 = vmatmul.mubr.msk.f32.gmra.mrb[6].mxu0 %vm548_vm3, %v4486_v5  ;;  %7344 = vmatprep.mubr.msk.f32.mxu1 %vm548_vm3, %v11399_v28  ;;  %v11422_v28 = vld [vmem:[#allocation74_spill] sm:$0xff]  ;;  %v11426_v5 = vld [vmem:[#allocation87_spill] sm:$0xff] }
 0x166   : > { %7763 = vmatprep.mubr.msk.f32.mxu0 %vm548_vm3, %v11402_v11 }
 0x168   : > { %7345 = vmatmul.mubr.msk.f32.gmra.mrb[6].mxu1 %vm548_vm3, %v11400_v48  ;;  %v11424_v48 = vld [vmem:[#allocation77_spill] sm:$0xff] }
 0x169   : > { %7764 = vmatmul.mubr.msk.f32.gmra.mrb[8].mxu0 %vm548_vm3, %v11403_v29  ;;  %7347 = vmatprep.mubr.msk.f32.mxu1 %vm548_vm3, %v11404_v6  ;;  %v11428_v6 = vld [vmem:[#allocation60_spill] sm:$0xff] }
 0x16a   : > { %7766 = vmatprep.mubr.msk.f32.mxu0 %vm548_vm3, %v11405_v53 }
 0x16c   : > { %7348 = vmatmul.mubr.msk.f32.gmra.mrb[8].mxu1 %vm548_vm3, %v11406_v33  ;;  %v11429_v33 = vld [vmem:[#allocation95_spill] sm:$0xff] }
 0x16d   : > { %7767 = vmatmul.mubr.msk.f32.gmra.mrb[10].mxu0 %vm548_vm3, %v11407_v60  ;;  %7350 = vmatprep.mubr.msk.f32.mxu1 %vm548_vm3, %v11402_v11  ;;  %v4493_v11 = vrot.slane %v10138_v1, 1 }
 0x16e   : > { %7769 = vmatprep.mubr.msk.f32.mxu0 %vm548_vm3, %v11408_v52 }
 0x170   : > { %7351 = vmatmul.mubr.msk.f32.gmra.mrb[10].mxu1 %vm548_vm3, %v11403_v29  ;;  %v11427_v29 = vld [vmem:[#allocation56_spill] sm:$0xff] }
 0x171   : > { %7770 = vmatmul.mubr.msk.f32.gmra.mrb[12].mxu0 %vm548_vm3, %v11409_v59  ;;  %7353 = vmatprep.mubr.msk.f32.mxu1 %vm548_vm3, %v11405_v53  ;;  %v4495_v53 = vsel %vm451_vm4, %v4493_v11, %v4494_v57  ;;  %v4771_v11 = vrot.slane %v10261_v46, 2  ;;  %v11454_v57 = vld [vmem:[#allocation106_spill] sm:$0xff] }
 0x172   : > { %7772 = vmatprep.mubr.msk.f32.mxu0 %vm548_vm3, %v11410_v49  ;;  %v11435_v49 = vld [vmem:[#allocation97_spill] sm:$0xff] }
 0x174   : > { %7354 = vmatmul.mubr.msk.f32.gmra.mrb[12].mxu1 %vm548_vm3, %v11407_v60  ;;  %v11430_v60 = vld [vmem:[#allocation14_spill] sm:$0xff] }
 0x175   : > { %7773 = vmatmul.mubr.msk.f32.gmra.mrb[14].mxu0 %vm548_vm3, %v4489_v61  ;;  %7356 = vmatprep.mubr.msk.f32.mxu1 %vm548_vm3, %v11408_v52  ;;  %v11431_v52 = vld [vmem:[#allocation16_spill] sm:$0xff]  ;;  %v4764_v61 = vrot.slane %v10035_v31, 2 }
 0x176   : > { %7775 = vmatprep.mubr.msk.f32.mxu0 %vm548_vm3, %v11411_v22 }
 0x178   : > { %7357 = vmatmul.mubr.msk.f32.gmra.mrb[14].mxu1 %vm548_vm3, %v11409_v59  ;;  %v11434_v59 = vld [vmem:[#allocation17_spill] sm:$0xff] }
 0x179   : > { %7776 = vmatmul.mubr.msk.f32.gmra.mrb[16].mxu0 %vm548_vm3, %v11412_v15  ;;  %7359 = vmatprep.mubr.msk.f32.mxu1 %vm548_vm3, %v11413_v20  ;;  %v11440_v20 = vld [vmem:[#allocation33_spill] sm:$0xff] }
 0x17a   : > { %7778 = vmatprep.mubr.msk.f32.mxu0 %vm548_vm3, %v11414_v37 }
 0x17c   : > { %7360 = vmatmul.mubr.msk.f32.gmra.mrb[16].mxu1 %vm548_vm3, %v11415_v55  ;;  %v11442_v55 = vld [vmem:[#allocation28_spill] sm:$0xff] }
 0x17d   : > { %7779 = vmatmul.mubr.msk.f32.gmra.mrb[18].mxu0 %vm548_vm3, %v11416_v9  ;;  %7362 = vmatprep.mubr.msk.f32.mxu1 %vm548_vm3, %v11411_v22  ;;  %v11436_v22 = vld [vmem:[#allocation98_spill] sm:$0xff] }
 0x17e   : > { %7781 = vmatprep.mubr.msk.f32.mxu0 %vm548_vm3, %v11417_v35 }
 0x180   : > { %7363 = vmatmul.mubr.msk.f32.gmra.mrb[18].mxu1 %vm548_vm3, %v11412_v15  ;;  %v11439_v15 = vld [vmem:[#allocation31_spill] sm:$0xff] }
 0x181   : > { %7782 = vmatmul.mubr.msk.f32.gmra.mrb[20].mxu0 %vm548_vm3, %v11418_v32  ;;  %7365 = vmatprep.mubr.msk.f32.mxu1 %vm548_vm3, %v11414_v37  ;;  %v11441_v37 = vld [vmem:[#allocation100_spill] sm:$0xff] }
 0x182   : > { %7784 = vmatprep.mubr.msk.f32.mxu0 %vm548_vm3, %v11419_v34  ;;  %v11446_v34 = vld [vmem:[#allocation103_spill] sm:$0xff] }
 0x184   : > { %7366 = vmatmul.mubr.msk.f32.gmra.mrb[20].mxu1 %vm548_vm3, %v11416_v9  ;;  %v11443_v9 = vld [vmem:[#allocation35_spill] sm:$0xff] }
 0x185   : > { %7785 = vmatmul.mubr.msk.f32.gmra.mrb[22].mxu0 %vm548_vm3, %v4492_v45  ;;  %7368 = vmatprep.mubr.msk.f32.mxu1 %vm548_vm3, %v11417_v35  ;;  %v11444_v35 = vld [vmem:[#allocation101_spill] sm:$0xff]  ;;  %v4769_v45 = vsel %vm1134_vm5, %v4767_v54, %v4768_v26  ;;  %v5051_v54 = vrot.slane %v10261_v46, 3  ;;  %v11480_v26 = vld [vmem:[#allocation44_spill] sm:$0xff]  ;;  %v5054_v46 = vrot.slane %v10298_v21, 3 }
 0x186   : > { %7787 = vmatprep.mubr.msk.f32.mxu0 %vm548_vm3, %v11420_v8 }
 0x188   : > { %7369 = vmatmul.mubr.msk.f32.gmra.mrb[22].mxu1 %vm548_vm3, %v11418_v32  ;;  %v11445_v32 = vld [vmem:[#allocation102_spill] sm:$0xff] }
 0x189   : > { %7788 = vmatmul.mubr.msk.f32.gmra.mrb[24].mxu0 %vm548_vm3, %v11421_v17  ;;  %7371 = vmatprep.mubr.msk.f32.mxu1 %vm548_vm3, %v11422_v28  ;;  %v11450_v28 = vld [vmem:[#allocation104_spill] sm:$0xff] }
 0x18a   : > { %7790 = vmatprep.mubr.msk.f32.mxu0 %vm548_vm3, %v11423_v24 }
 0x18c   : > { %7372 = vmatmul.mubr.msk.f32.gmra.mrb[24].mxu1 %vm548_vm3, %v11424_v48  ;;  %v11452_v48 = vld [vmem:[#allocation58_spill] sm:$0xff] }
 0x18d   : > { %7791 = vmatmul.mubr.msk.f32.gmra.mrb[26].mxu0 %vm548_vm3, %v11425_v62  ;;  %7374 = vmatprep.mubr.msk.f32.mxu1 %vm548_vm3, %v11420_v8  ;;  %v11447_v8 = vld [vmem:[#allocation42_spill] sm:$0xff] }
 0x18e   : > { %7793 = vmatprep.mubr.msk.f32.mxu0 %vm548_vm3, %v11426_v5 }
 0x190   : > { %7375 = vmatmul.mubr.msk.f32.gmra.mrb[26].mxu1 %vm548_vm3, %v11421_v17  ;;  %v11449_v17 = vld [vmem:[#allocation55_spill] sm:$0xff] }
 0x191   : > { %7794 = vmatmul.mubr.msk.f32.gmra.mrb[28].mxu0 %vm548_vm3, %v11427_v29  ;;  %7377 = vmatprep.mubr.msk.f32.mxu1 %vm548_vm3, %v11423_v24  ;;  %v11451_v24 = vld [vmem:[#allocation48_spill] sm:$0xff] }
 0x192   : > { %7796 = vmatprep.mubr.msk.f32.mxu0 %vm548_vm3, %v11428_v6 }
 0x194   : > { %7378 = vmatmul.mubr.msk.f32.gmra.mrb[28].mxu1 %vm548_vm3, %v11425_v62  ;;  %v11453_v62 = vld [vmem:[#allocation105_spill] sm:$0xff] }
 0x195   : > { %7797 = vmatmul.mubr.msk.f32.gmra.mrb[30].mxu0 %vm548_vm3, %v4495_v53  ;;  %7380 = vmatprep.mubr.msk.f32.mxu1 %vm548_vm3, %v11426_v5  ;;  %v4770_v5 = vrot.slane %v10104_v56, 2  ;;  %v11456_v53 = vld [vmem:[#allocation66_spill] sm:$0xff] }
 0x196   : > { %7803 = vmatprep.mubr.msk.f32.mxu0 %vm548_vm3, %v11429_v33 }
 0x197   : > { %v4772_v6 = vsel %vm1134_vm5, %v4770_v5, %v4771_v11 }
 0x198   : > { %7381 = vmatmul.mubr.msk.f32.gmra.mrb[30].mxu1 %vm548_vm3, %v11427_v29  ;;  %v11455_v29 = vld [vmem:[#allocation107_spill] sm:$0xff] }
 0x199   : > { %7804 = vmatmul.mubr.msk.f32.vlgmr.msra.gmra.mrb[0].mxu0 %vm548_vm3, %v11430_v60  ;;  %7387 = vmatprep.mubr.msk.f32.mxu1 %vm548_vm3, %v11431_v52  ;;  %v11459_v52 = vld [vmem:[#allocation110_spill] sm:$0xff] }
 0x19a   : > { %7806 = vmatprep.mubr.msk.f32.mxu0 %vm548_vm3, %v11432_v14  ;;  %7998 = vmatpush3.bf16.msk.msra.mxu0 %vm8535_vm2, %v10157_v63  ;;  %v4765_v63 = vrot.slane %v10176_v43, 2 }
 0x19c   : > { %7388 = vmatmul.mubr.msk.f32.vlgmr.msra.gmra.mrb[0].mxu1 %vm548_vm3, %v11433_v0  ;;  %v11461_v0 = vld [vmem:[#allocation111_spill] sm:$0xff] }
 0x19d   : > { %7950 = vmatpush3.bf16.msk.msra.mxu1 %vm8535_vm2, %v10178_v41  ;;  %7807 = vmatmul.mubr.msk.f32.gmra.mrb[2].mxu0 %vm548_vm3, %v11434_v59  ;;  %v4766_v41 = vsel %vm1134_vm5, %v4764_v61, %v4765_v63  ;;  %v11462_v61 = vld [vmem:[#allocation112_spill] sm:$0xff]  ;;  %v11463_v63 = vld [vmem:[#allocation9_spill] sm:$0xff] }
 0x19e   : > { %7390 = vmatprep.mubr.msk.f32.mxu1 %vm548_vm3, %v11429_v33  ;;  %7809 = vmatprep.mubr.msk.f32.mxu0 %vm548_vm3, %v11435_v49  ;;  %v11457_v33 = vld [vmem:[#allocation108_spill] sm:$0xff] }
 0x1a0   : > { %7391 = vmatmul.mubr.msk.f32.gmra.mrb[2].mxu1 %vm548_vm3, %v11430_v60  ;;  %v11458_v60 = vld [vmem:[#allocation109_spill] sm:$0xff] }
 0x1a1   : > { %7810 = vmatmul.mubr.msk.f32.gmra.mrb[4].mxu0 %vm548_vm3, %v11436_v22  ;;  %7393 = vmatprep.mubr.msk.f32.mxu1 %vm548_vm3, %v11432_v14  ;;  %v11460_v14 = vld [vmem:[#allocation72_spill] sm:$0xff] }
 0x1a2   : > { %7812 = vmatprep.mubr.msk.f32.mxu0 %vm548_vm3, %v11437_v3  ;;  %v5045_v3 = vrot.slane %v10176_v43, 3  ;;  %v5047_v43 = vrot.slane %v10069_v30, 3  ;;  %v11473_v30 = vld [vmem:[#allocation26_spill] sm:$0xff] }
 0x1a4   : > { %7394 = vmatmul.mubr.msk.f32.gmra.mrb[4].mxu1 %vm548_vm3, %v11434_v59  ;;  %v4773_v59 = vrot.slane %v10138_v1, 2 }
 0x1a5   : > { %7813 = vmatmul.mubr.msk.f32.gmra.mrb[6].mxu0 %vm548_vm3, %v4766_v41  ;;  %7396 = vmatprep.mubr.msk.f32.mxu1 %vm548_vm3, %v11435_v49  ;;  %v4774_v49 = vrot.slane %v10298_v21, 2  ;;  %v5048_v41 = vrot.slane %v10224_v7, 3  ;;  %v11475_v7 = vld [vmem:[#allocation21_spill] sm:$0xff] }
 0x1a6   : > { %7815 = vmatprep.mubr.msk.f32.mxu0 %vm548_vm3, %v11438_v44 }
 0x1a8   : > { %7397 = vmatmul.mubr.msk.f32.gmra.mrb[6].mxu1 %vm548_vm3, %v11436_v22  ;;  %v4775_v22 = vsel %vm1134_vm5, %v4773_v59, %v4774_v49 }
 0x1a9   : > { %7816 = vmatmul.mubr.msk.f32.gmra.mrb[8].mxu0 %vm548_vm3, %v11439_v15  ;;  %7399 = vmatprep.mubr.msk.f32.mxu1 %vm548_vm3, %v11440_v20  ;;  %v5049_v20 = vsel %vm1555_vm6, %v5047_v43, %v5048_v41 }
 0x1aa   : > { %7818 = vmatprep.mubr.msk.f32.mxu0 %vm548_vm3, %v11441_v37 }
 0x1ac   : > { %7400 = vmatmul.mubr.msk.f32.gmra.mrb[8].mxu1 %vm548_vm3, %v11442_v55  ;;  %v11478_v55 = vld [vmem:[#allocation90_spill] sm:$0xff] }
 0x1ad   : > { %7819 = vmatmul.mubr.msk.f32.gmra.mrb[10].mxu0 %vm548_vm3, %v11443_v9  ;;  %7402 = vmatprep.mubr.msk.f32.mxu1 %vm548_vm3, %v11438_v44  ;;  %v11471_v44 = vld [vmem:[#allocation24_spill] sm:$0xff] }
 0x1ae   : > { %7821 = vmatprep.mubr.msk.f32.mxu0 %vm548_vm3, %v11444_v35 }
 0x1b0   : > { %7403 = vmatmul.mubr.msk.f32.gmra.mrb[10].mxu1 %vm548_vm3, %v11439_v15  ;;  %v11472_v15 = vld [vmem:[#allocation25_spill] sm:$0xff] }
 0x1b1   : > { %7822 = vmatmul.mubr.msk.f32.gmra.mrb[12].mxu0 %vm548_vm3, %v11445_v32  ;;  %7405 = vmatprep.mubr.msk.f32.mxu1 %vm548_vm3, %v11441_v37  ;;  %v11476_v37 = vld [vmem:[#allocation38_spill] sm:$0xff] }
 0x1b2   : > { %7824 = vmatprep.mubr.msk.f32.mxu0 %vm548_vm3, %v11446_v34 }
 0x1b4   : > { %7406 = vmatmul.mubr.msk.f32.gmra.mrb[12].mxu1 %vm548_vm3, %v11443_v9  ;;  %v11479_v9 = vld [vmem:[#allocation39_spill] sm:$0xff] }
 0x1b5   : > { %7825 = vmatmul.mubr.msk.f32.gmra.mrb[14].mxu0 %vm548_vm3, %v4769_v45  ;;  %7408 = vmatprep.mubr.msk.f32.mxu1 %vm548_vm3, %v11444_v35  ;;  %v5050_v35 = vrot.slane %v10104_v56, 3  ;;  %v5053_v56 = vrot.slane %v10138_v1, 3 }
 0x1b6   : > { %7827 = vmatprep.mubr.msk.f32.mxu0 %vm548_vm3, %v11447_v8 }
 0x1b7   : > { %v5052_v34 = vsel %vm1555_vm6, %v5050_v35, %v5051_v54 }
 0x1b8   : > { %7409 = vmatmul.mubr.msk.f32.gmra.mrb[14].mxu1 %vm548_vm3, %v11445_v32  ;;  %v11481_v32 = vld [vmem:[#allocation37_spill] sm:$0xff] }
 0x1b9   : > { %7828 = vmatmul.mubr.msk.f32.gmra.mrb[16].mxu0 %vm548_vm3, %v11448_v4  ;;  %7411 = vmatprep.mubr.msk.f32.mxu1 %vm548_vm3, %v11449_v17 }
 0x1ba   : > { %7830 = vmatprep.mubr.msk.f32.mxu0 %vm548_vm3, %v11450_v28 }
 0x1bc   : > { %7412 = vmatmul.mubr.msk.f32.gmra.mrb[16].mxu1 %vm548_vm3, %v11451_v24 }
 0x1bd   : > { %7831 = vmatmul.mubr.msk.f32.gmra.mrb[18].mxu0 %vm548_vm3, %v11452_v48  ;;  %7414 = vmatprep.mubr.msk.f32.mxu1 %vm548_vm3, %v11447_v8 }
 0x1be   : > { %7833 = vmatprep.mubr.msk.f32.mxu0 %vm548_vm3, %v11453_v62 }
 0x1c0   : > { %7415 = vmatmul.mubr.msk.f32.gmra.mrb[18].mxu1 %vm548_vm3, %v11448_v4 }
 0x1c1   : > { %7834 = vmatmul.mubr.msk.f32.gmra.mrb[20].mxu0 %vm548_vm3, %v11454_v57  ;;  %7417 = vmatprep.mubr.msk.f32.mxu1 %vm548_vm3, %v11450_v28 }
 0x1c2   : > { %7836 = vmatprep.mubr.msk.f32.mxu0 %vm548_vm3, %v11455_v29 }
 0x1c4   : > { %7418 = vmatmul.mubr.msk.f32.gmra.mrb[20].mxu1 %vm548_vm3, %v11452_v48 }
 0x1c5   : > { %7837 = vmatmul.mubr.msk.f32.gmra.mrb[22].mxu0 %vm548_vm3, %v4772_v6  ;;  %7420 = vmatprep.mubr.msk.f32.mxu1 %vm548_vm3, %v11453_v62 }
 0x1c6   : > { %7839 = vmatprep.mubr.msk.f32.mxu0 %vm548_vm3, %v11456_v53 }
 0x1c8   : > { %7421 = vmatmul.mubr.msk.f32.gmra.mrb[22].mxu1 %vm548_vm3, %v11454_v57 }
 0x1c9   : > { %7840 = vmatmul.mubr.msk.f32.gmra.mrb[24].mxu0 %vm548_vm3, %v11457_v33  ;;  %7423 = vmatprep.mubr.msk.f32.mxu1 %vm548_vm3, %v11458_v60 }
 0x1ca   : > { %7842 = vmatprep.mubr.msk.f32.mxu0 %vm548_vm3, %v11459_v52 }
 0x1cc   : > { %7424 = vmatmul.mubr.msk.f32.gmra.mrb[24].mxu1 %vm548_vm3, %v11460_v14 }
 0x1cd   : > { %7843 = vmatmul.mubr.msk.f32.gmra.mrb[26].mxu0 %vm548_vm3, %v11461_v0  ;;  %7426 = vmatprep.mubr.msk.f32.mxu1 %vm548_vm3, %v11456_v53 }
 0x1ce   : > { %7845 = vmatprep.mubr.msk.f32.mxu0 %vm548_vm3, %v9616_v58 }
 0x1d0   : > { %7427 = vmatmul.mubr.msk.f32.gmra.mrb[26].mxu1 %vm548_vm3, %v11457_v33 }
 0x1d1   : > { %7846 = vmatmul.mubr.msk.f32.gmra.mrb[28].mxu0 %vm548_vm3, %v11462_v61  ;;  %7429 = vmatprep.mubr.msk.f32.mxu1 %vm548_vm3, %v11459_v52 }
 0x1d2   : > { %7848 = vmatprep.mubr.msk.f32.mxu0 %vm548_vm3, %v11463_v63 }
 0x1d4   : > { %7430 = vmatmul.mubr.msk.f32.gmra.mrb[28].mxu1 %vm548_vm3, %v11461_v0 }
 0x1d5   : > { %7849 = vmatmul.mubr.msk.f32.gmra.mrb[30].mxu0 %vm548_vm3, %v4775_v22  ;;  %7432 = vmatprep.mubr.msk.f32.mxu1 %vm548_vm3, %v9616_v58  ;;  %v5044_v58 = vrot.slane %v10035_v31, 3  ;;  %v11468_v31 = vld [vmem:[#allocation12_spill] sm:$0xff] }
 0x1d6   : > { %7855 = vmatprep.mubr.msk.f32.mxu0 %vm548_vm3, %v9660_v25 }
 0x1d8   : > { %7433 = vmatmul.mubr.msk.f32.gmra.mrb[30].mxu1 %vm548_vm3, %v11462_v61 }
 0x1d9   : > { %7856 = vmatmul.mubr.msk.f32.vlgmr.msra.gmra.mrb[0].mxu0 %vm548_vm3, %v9666_v40  ;;  %7439 = vmatprep.mubr.msk.f32.mxu1 %vm548_vm3, %v9684_v27  ;;  %v11464_v27 = vld [vmem:[#allocation3_spill] sm:$0xff] }
 0x1da   : > { %7858 = vmatprep.mubr.msk.f32.mxu0 %vm548_vm3, %v9692_v42 }
 0x1dc   : > { %7440 = vmatmul.mubr.msk.f32.vlgmr.msra.gmra.mrb[0].mxu1 %vm548_vm3, %v9639_v39  ;;  %v11465_v39 = vld [vmem:[#allocation10_spill] sm:$0xff] }
 0x1dd   : > { %7859 = vmatmul.mubr.msk.f32.gmra.mrb[2].mxu0 %vm548_vm3, %v9697_v19  ;;  %7442 = vmatprep.mubr.msk.f32.mxu1 %vm548_vm3, %v9660_v25  ;;  %v5046_v25 = vsel %vm1555_vm6, %v5044_v58, %v5045_v3 }
 0x1de   : > { %7861 = vmatprep.mubr.msk.f32.mxu0 %vm548_vm3, %v9718_v2 }
 0x1e0   : > { %7443 = vmatmul.mubr.msk.f32.gmra.mrb[2].mxu1 %vm548_vm3, %v9666_v40  ;;  %v11466_v40 = vld [vmem:[#allocation5_spill] sm:$0xff] }
 0x1e1   : > { %7862 = vmatmul.mubr.msk.f32.gmra.mrb[4].mxu0 %vm548_vm3, %v11464_v27  ;;  %7445 = vmatprep.mubr.msk.f32.mxu1 %vm548_vm3, %v9692_v42  ;;  %v11467_v42 = vld [vmem:[#allocation8_spill] sm:$0xff] }
 0x1e2   : > { %7864 = vmatprep.mubr.msk.f32.mxu0 %vm548_vm3, %v11465_v39 }
 0x1e4   : > { %7446 = vmatmul.mubr.msk.f32.gmra.mrb[4].mxu1 %vm548_vm3, %v9697_v19  ;;  %v11469_v19 = vld [vmem:[#allocation4_spill] sm:$0xff] }
 0x1e5   : > { %7865 = vmatmul.mubr.msk.f32.gmra.mrb[6].mxu0 %vm548_vm3, %v5046_v25  ;;  %7448 = vmatprep.mubr.msk.f32.mxu1 %vm548_vm3, %v9718_v2  ;;  %v11470_v2 = vld [vmem:[#allocation7_spill] sm:$0xff] }
 0x1e6   : > { %7867 = vmatprep.mubr.msk.f32.mxu0 %vm548_vm3, %v11466_v40 }
 0x1e8   : > { %7449 = vmatmul.mubr.msk.f32.gmra.mrb[6].mxu1 %vm548_vm3, %v11464_v27 }
 0x1e9   : > { %7868 = vmatmul.mubr.msk.f32.gmra.mrb[8].mxu0 %vm548_vm3, %v11467_v42  ;;  %7451 = vmatprep.mubr.msk.f32.mxu1 %vm548_vm3, %v11468_v31 }
 0x1ea   : > { %7870 = vmatprep.mubr.msk.f32.mxu0 %vm548_vm3, %v9782_v18 }
 0x1ec   : > { %7452 = vmatmul.mubr.msk.f32.gmra.mrb[8].mxu1 %vm548_vm3, %v11469_v19 }
 0x1ed   : > { %7871 = vmatmul.mubr.msk.f32.gmra.mrb[10].mxu0 %vm548_vm3, %v9787_v51  ;;  %7454 = vmatprep.mubr.msk.f32.mxu1 %vm548_vm3, %v11466_v40 }
 0x1ee   : > { %7873 = vmatprep.mubr.msk.f32.mxu0 %vm548_vm3, %v11470_v2 }
 0x1f0   : > { %7455 = vmatmul.mubr.msk.f32.gmra.mrb[10].mxu1 %vm548_vm3, %v11467_v42 }
 0x1f1   : > { %7874 = vmatmul.mubr.msk.f32.gmra.mrb[12].mxu0 %vm548_vm3, %v11471_v44  ;;  %7457 = vmatprep.mubr.msk.f32.mxu1 %vm548_vm3, %v9782_v18  ;;  %v11474_v18 = vld [vmem:[#allocation29_spill] sm:$0xff] }
 0x1f2   : > { %7876 = vmatprep.mubr.msk.f32.mxu0 %vm548_vm3, %v11472_v15 }
 0x1f4   : > { %7458 = vmatmul.mubr.msk.f32.gmra.mrb[12].mxu1 %vm548_vm3, %v9787_v51  ;;  %v11477_v51 = vld [vmem:[#allocation19_spill] sm:$0xff] }
 0x1f5   : > { %7877 = vmatmul.mubr.msk.f32.gmra.mrb[14].mxu0 %vm548_vm3, %v5049_v20  ;;  %7460 = vmatprep.mubr.msk.f32.mxu1 %vm548_vm3, %v11470_v2 }
 0x1f6   : > { %7879 = vmatprep.mubr.msk.f32.mxu0 %vm548_vm3, %v11473_v30 }
 0x1f8   : > { %7461 = vmatmul.mubr.msk.f32.gmra.mrb[14].mxu1 %vm548_vm3, %v11471_v44 }
 0x1f9   : > { %7880 = vmatmul.mubr.msk.f32.gmra.mrb[16].mxu0 %vm548_vm3, %v11474_v18  ;;  %7463 = vmatprep.mubr.msk.f32.mxu1 %vm548_vm3, %v11475_v7 }
 0x1fa   : > { %7882 = vmatprep.mubr.msk.f32.mxu0 %vm548_vm3, %v11476_v37 }
 0x1fc   : > { %7464 = vmatmul.mubr.msk.f32.gmra.mrb[16].mxu1 %vm548_vm3, %v11477_v51 }
 0x1fd   : > { %7883 = vmatmul.mubr.msk.f32.gmra.mrb[18].mxu0 %vm548_vm3, %v11478_v55  ;;  %7466 = vmatprep.mubr.msk.f32.mxu1 %vm548_vm3, %v11473_v30 }
 0x1fe   : > { %7885 = vmatprep.mubr.msk.f32.mxu0 %vm548_vm3, %v11479_v9 }
 0x200   : > { %7467 = vmatmul.mubr.msk.f32.gmra.mrb[18].mxu1 %vm548_vm3, %v11474_v18 }
 0x201   : > { %7886 = vmatmul.mubr.msk.f32.gmra.mrb[20].mxu0 %vm548_vm3, %v11480_v26  ;;  %7469 = vmatprep.mubr.msk.f32.mxu1 %vm548_vm3, %v11476_v37 }
 0x202   : > { %7888 = vmatprep.mubr.msk.f32.mxu0 %vm548_vm3, %v11481_v32 }
 0x204   : > { %7470 = vmatmul.mubr.msk.f32.gmra.mrb[20].mxu1 %vm548_vm3, %v11478_v55 }
 0x205   : > { %7889 = vmatmul.mubr.msk.f32.gmra.mrb[22].mxu0 %vm548_vm3, %v5052_v34  ;;  %7472 = vmatprep.mubr.msk.f32.mxu1 %vm548_vm3, %v11479_v9 }
 0x206   : > { %7891 = vmatprep.mubr.msk.f32.mxu0 %vm548_vm3, %v9919_v50 }
 0x208   : > { %7473 = vmatmul.mubr.msk.f32.gmra.mrb[22].mxu1 %vm548_vm3, %v11480_v26 }
 0x209   : > { %7892 = vmatmul.mubr.msk.f32.gmra.mrb[24].mxu0 %vm548_vm3, %v9925_v47  ;;  %7475 = vmatprep.mubr.msk.f32.mxu1 %vm548_vm3, %v9935_v36 }
 0x20a   : > { %7894 = vmatprep.mubr.msk.f32.mxu0 %vm548_vm3, %v9940_v38 }
 0x20c   : > { %7476 = vmatmul.mubr.msk.f32.gmra.mrb[24].mxu1 %vm548_vm3, %v9904_v13  ;;  %v5055_v13 = vsel %vm1555_vm6, %v5053_v56, %v5054_v46 }
 0x20d   : > { %7895 = vmatmul.mubr.msk.f32.gmra.mrb[26].mxu0 %vm548_vm3, %v9945_v10  ;;  %7478 = vmatprep.mubr.msk.f32.mxu1 %vm548_vm3, %v9919_v50 }
 0x20e   : > { %7897 = vmatprep.mubr.msk.f32.mxu0 %vm548_vm3, %v9958_v23 }
 0x210   : > { %7479 = vmatmul.mubr.msk.f32.gmra.mrb[26].mxu1 %vm548_vm3, %v9925_v47 }
 0x211   : > { %7898 = vmatmul.mubr.msk.f32.gmra.mrb[28].mxu0 %vm548_vm3, %v9963_v12  ;;  %7481 = vmatprep.mubr.msk.f32.mxu1 %vm548_vm3, %v9940_v38  ;;  %v10607_v38 = vld [vmem:[%s10875_s2] ss:$0 sm:$0xff] }
 0x212   : > { %7900 = vmatprep.mubr.msk.f32.mxu0 %vm548_vm3, %v9974_v16 }
 0x214   : > { %7482 = vmatmul.mubr.msk.f32.gmra.mrb[28].mxu1 %vm548_vm3, %v9945_v10 }
 0x215   : > { %7901 = vmatmul.mubr.msk.f32.gmra.mrb[30].mxu0 %vm548_vm3, %v5055_v13  ;;  %7484 = vmatprep.mubr.msk.f32.mxu1 %vm548_vm3, %v9958_v23 }
 0x218   : > { %7485 = vmatmul.mubr.msk.f32.gmra.mrb[30].mxu1 %vm548_vm3, %v9963_v12 }
 0x2ac   : > { %v7857_v47 = vpop.f32.mrb[0].mxu0 }
 0x2ad   : > { %v5133_v50 = vpop.f32.mrb[1].mxu0 }
 0x2af   : > { %v7441_v36 = vpop.f32.mrb[0].mxu1 }
 0x2b0   : > { %v7999_v16 = vadd.f32 %v7857_v47, %v7441_v36  ;;  %v2901_v1 = vpop.f32.mrb[1].mxu1  ;;  %v7860_v21 = vpop.f32.mrb[2].mxu0 }
 0x2b1   : > { %v8000_v10 = vadd.f32 %v5133_v50, %v2901_v1  ;;  %v5143_v45 = vpop.f32.mrb[3].mxu0 }
 0x2b2   : > { %v5332_v8 = vadd.f32 %v7999_v16, %v10607_v38 }
 0x2b3   : > { %v5331_v23 = vadd.f32 %v8000_v10, %v10607_v38  ;;  %v7444_v4 = vpop.f32.mrb[2].mxu1 }
 0x2b4   : > { %v5364_v17 = vmax.f32 %v5332_v8, 0.0  ;;  %v8001_v12 = vadd.f32 %v7860_v21, %v7444_v4  ;;  %v2911_v28 = vpop.f32.mrb[3].mxu1  ;;  %v7863_v24 = vpop.f32.mrb[4].mxu0 }
 0x2b5   : > { %v5363_v48 = vmax.f32 %v5331_v23, 0.0  ;;  %v8002_v62 = vadd.f32 %v5143_v45, %v2911_v28  ;;  %v5153_v5 = vpop.f32.mrb[5].mxu0 }
 0x2b6   : > { %v5334_v11 = vadd.f32 %v8001_v12, %v10607_v38  ;;  %v5428_v57 = vrot.slane %v5364_v17, 7 }
 0x2b7   : > { %v5427_v29 = vrot.slane %v5363_v48, 7  ;;  %v5333_v6 = vadd.f32 %v8002_v62, %v10607_v38  ;;  %v7447_v53 = vpop.f32.mrb[4].mxu1 }
 0x2b8   : > { %v5366_v33 = vmax.f32 %v5334_v11, 0.0  ;;  %v8003_v60 = vadd.f32 %v7863_v24, %v7447_v53  ;;  %v2921_v52 = vpop.f32.mrb[5].mxu1  ;;  %v7866_v14 = vpop.f32.mrb[6].mxu0  ;;  %v5493_v25 = vsel %vm5491_vm7, 0.0, %v5428_v57 }
 0x2b9   : > { %v5492_v0 = vsel %vm5491_vm7, 0.0, %v5427_v29  ;;  %v5525_v59 = vmax.f32 %v5427_v29, 0.0  ;;  %v5365_v49 = vmax.f32 %v5333_v6, 0.0  ;;  %v8004_v61 = vadd.f32 %v5153_v5, %v2921_v52  ;;  %v5163_v63 = vpop.f32.mrb[7].mxu0 }
 0x2ba   : > { %v5524_v22 = vmax.f32 %v5492_v0, 0.0  ;;  %v5430_v58 = vrot.slane %v5366_v33, 7  ;;  %v5336_v3 = vadd.f32 %v8003_v60, %v10607_v38 }
 0x2bb   : > { %v5557_v27 = vmax.f32 %v5525_v59, %v5428_v57  ;;  %v5429_v39 = vrot.slane %v5365_v49, 7  ;;  %v5335_v40 = vadd.f32 %v8004_v61, %v10607_v38  ;;  %v7450_v42 = vpop.f32.mrb[6].mxu1 }
 0x2bc   : > { %v5556_v31 = vmax.f32 %v5524_v22, %v5493_v25  ;;  %v5368_v19 = vmax.f32 %v5336_v3, 0.0  ;;  %v5495_v2 = vsel %vm5491_vm7, 0.0, %v5430_v58  ;;  %v8005_v43 = vadd.f32 %v7866_v14, %v7450_v42  ;;  %v2931_v41 = vpop.f32.mrb[7].mxu1  ;;  %v7869_v44 = vpop.f32.mrb[8].mxu0 }
 0x2bd   : > { %v5716_v15 = vrot.slane %v5557_v27, 2  ;;  %v5494_v20 = vsel %vm5491_vm7, 0.0, %v5429_v39  ;;  %v5527_v30 = vmax.f32 %v5428_v57, %v5429_v39  ;;  %v5367_v18 = vmax.f32 %v5335_v40, 0.0  ;;  %v5173_v7 = vpop.f32.mrb[9].mxu0 }
 0x2be   : > { %v5526_v37 = vmax.f32 %v5493_v25, %v5494_v20  ;;  %v5604_v51 = vrot.slane %v5556_v31, 1  ;;  %v5652_v55 = vrot.slane %v5556_v31, 2  ;;  %v10619_v9 = vrot.slane %v5368_v19, 7 }
 0x2bf   : > { %v5559_v35 = vmax.f32 %v5527_v30, %v5430_v58  ;;  %v5431_v54 = vrot.slane %v5367_v18, 7  ;;  %v5338_v26 = vadd.f32 %v8005_v43, %v10607_v38  ;;  %v8006_v32 = vadd.f32 %v5163_v63, %v2931_v41  ;;  %v7453_v34 = vpop.f32.mrb[8].mxu1 }
 0x2c0   : > { %v5636_v56 = vmax.f32 %v5556_v31, %v5604_v51  ;;  %v5558_v46 = vmax.f32 %v5526_v37, %v5495_v2  ;;  %v5497_v13 = vsel %vm5491_vm7, 0.0, %v10619_v9  ;;  %v8007_v47 = vadd.f32 %v7869_v44, %v7453_v34  ;;  %v2941_v50 = vpop.f32.mrb[9].mxu1  ;;  %v7872_v36 = vpop.f32.mrb[10].mxu0 }
 0x2c1   : > { %v5717_v16 = vrot.slane %v5559_v35, 2  ;;  %v5496_v1 = vsel %vm5491_vm7, 0.0, %v5431_v54  ;;  %v5529_v21 = vmax.f32 %v5430_v58, %v5431_v54  ;;  %v5370_v10 = vmax.f32 %v5338_v26, 0.0  ;;  %v10625_v45 = vpop.f32.mrb[11].mxu0 }
 0x2c2   : > { %v5684_v8 = vmax.f32 %v5636_v56, %v5652_v55  ;;  %v5748_v23 = vmax.f32 %v5636_v56, %v5716_v15  ;;  %v5528_v4 = vmax.f32 %v5495_v2, %v5496_v1  ;;  %v5605_v17 = vrot.slane %v5558_v46, 1 }
 0x2c3   : > { %v5561_v12 = vmax.f32 %v5529_v21, %v10619_v9  ;;  %v5653_v28 = vrot.slane %v5558_v46, 2  ;;  %v5434_v24 = vrot.slane %v5370_v10, 7  ;;  %v5337_v48 = vadd.f32 %v8006_v32, %v10607_v38  ;;  %v7456_v62 = vpop.f32.mrb[10].mxu1 }
 0x2c4   : > { %v5807_v5 = vrot.slane %v5684_v8, 2  ;;  %v5831_v11 = vrot.slane %v5684_v8, 4  ;;  %v5875_v57 = vrot.slane %v5748_v23, 6  ;;  %v5637_v29 = vmax.f32 %v5558_v46, %v5605_v17  ;;  %v2951_v6 = vpop.f32.mrb[11].mxu1  ;;  %v10629_v53 = vpop.f32.mrb[12].mxu0 }
 0x2c5   : > { %v5718_v33 = vrot.slane %v5561_v12, 2  ;;  %v5499_v60 = vsel %vm5491_vm7, 0.0, %v5434_v24  ;;  %v5369_v52 = vmax.f32 %v5337_v48, 0.0  ;;  %v5560_v14 = vmax.f32 %v5528_v4, %v5497_v13  ;;  %v5193_v0 = vpop.f32.mrb[13].mxu0 }
 0x2c6   : > { %v5685_v59 = vmax.f32 %v5637_v29, %v5653_v28  ;;  %v5749_v49 = vmax.f32 %v5637_v29, %v5717_v16  ;;  %v5340_v61 = vadd.f32 %v8007_v47, %v10607_v38  ;;  %v8008_v63 = vadd.f32 %v5173_v7, %v2941_v50 }
 0x2c7   : > { %v5433_v22 = vrot.slane %v5369_v52, 7  ;;  %v5606_v58 = vrot.slane %v5560_v14, 1  ;;  %v5654_v3 = vrot.slane %v5560_v14, 2  ;;  %v8009_v27 = vadd.f32 %v7872_v36, %v7456_v62  ;;  %v7459_v39 = vpop.f32.mrb[12].mxu1 }
 0x2c8   : > { %v5780_v25 = vrot.slane %v5685_v59, 7  ;;  %v5808_v40 = vrot.slane %v5685_v59, 1  ;;  %v5832_v42 = vrot.slane %v5685_v59, 3  ;;  %v5876_v31 = vrot.slane %v5749_v49, 5  ;;  %v2961_v19 = vpop.f32.mrb[13].mxu1  ;;  %v10633_v2 = vpop.f32.mrb[14].mxu0 }
 0x2c9   : > { %v5498_v43 = vsel %vm5491_vm7, 0.0, %v5433_v22  ;;  %v5531_v41 = vmax.f32 %v10619_v9, %v5433_v22  ;;  %v5638_v44 = vmax.f32 %v5560_v14, %v5606_v58  ;;  %v5372_v15 = vmax.f32 %v5340_v61, 0.0  ;;  %v10637_v20 = vpop.f32.mrb[15].mxu0 }
 0x2ca   : > { %v5782_v30 = vsel %vm5781_vm8, %v5780_v25, %v5684_v8  ;;  %v5530_v18 = vmax.f32 %v5497_v13, %v5498_v43  ;;  %v5809_v7 = vsel %vm5781_vm8, %v5808_v40, %v5807_v5  ;;  %v5833_v37 = vsel %vm5781_vm8, %v5832_v42, %v5831_v11 }
 0x2cb   : > { %v5563_v51 = vmax.f32 %v5531_v41, %v5434_v24  ;;  %v5686_v55 = vmax.f32 %v5638_v44, %v5654_v3  ;;  %v5750_v35 = vmax.f32 %v5638_v44, %v5718_v33  ;;  %v5877_v54 = vsel %vm5781_vm8, %v5876_v31, %v5875_v57  ;;  %v10643_v26 = vpop.f32.mrb[14].mxu1 }
 0x2cc   : > { %v5562_v9 = vmax.f32 %v5530_v18, %v5499_v60  ;;  %v10645_v32 = vrot.slane %v5372_v15, 7  ;;  %v5339_v34 = vadd.f32 %v8008_v63, %v10607_v38  ;;  %v5342_v56 = vadd.f32 %v8009_v27, %v10607_v38  ;;  %v10649_v46 = vpop.f32.mrb[15].mxu1  ;;  %v10651_v13 = vpop.f32.mrb[16].mxu0 }
 0x2cd   : > { %v5719_v47 = vrot.slane %v5563_v51, 2  ;;  %v5783_v50 = vrot.slane %v5686_v55, 6  ;;  %v5810_v36 = vsel %vm5784_vm9, %v5686_v55, %v5809_v7  ;;  %v5834_v16 = vrot.slane %v5686_v55, 2  ;;  %v10654_v1 = vpop.f32.mrb[17].mxu0 }
 0x2ce   : > { %v5607_v21 = vrot.slane %v5562_v9, 1  ;;  %v5655_v10 = vrot.slane %v5562_v9, 2  ;;  %v5878_v8 = vrot.slane %v5750_v35, 4  ;;  %v5371_v23 = vmax.f32 %v5339_v34, 0.0 }
 0x2cf   : > { %v5785_v4 = vsel %vm5784_vm9, %v5783_v50, %v5782_v30  ;;  %v5835_v17 = vsel %vm5784_vm9, %v5834_v16, %v5833_v37  ;;  %v5374_v12 = vmax.f32 %v5342_v56, 0.0  ;;  %v8010_v28 = vadd.f32 %v10625_v45, %v2951_v6  ;;  %v7465_v24 = vpop.f32.mrb[16].mxu1 }
 0x2d0   : > { %v5639_v48 = vmax.f32 %v5562_v9, %v5607_v21  ;;  %v5879_v62 = vsel %vm5784_vm9, %v5878_v8, %v5877_v54  ;;  %v5435_v5 = vrot.slane %v5371_v23, 7  ;;  %v5501_v11 = vsel %vm5491_vm7, 0.0, %v10645_v32  ;;  %v10662_v57 = vpop.f32.mrb[17].mxu1  ;;  %v10664_v29 = vpop.f32.mrb[18].mxu0 }
 0x2d1   : > { %v10666_v33 = vrot.slane %v5374_v12, 7  ;;  %v5341_v60 = vadd.f32 %v8010_v28, %v10607_v38  ;;  %v8011_v52 = vadd.f32 %v10629_v53, %v7459_v39  ;;  %v8012_v45 = vadd.f32 %v5193_v0, %v2961_v19  ;;  %v10670_v6 = vpop.f32.mrb[19].mxu0 }
 0x2d2   : > { %v5687_v14 = vmax.f32 %v5639_v48, %v5655_v10  ;;  %v5751_v59 = vmax.f32 %v5639_v48, %v5719_v47  ;;  %v5500_v49 = vsel %vm5491_vm7, 0.0, %v5435_v5  ;;  %v5533_v61 = vmax.f32 %v5435_v5, 0.0 }
 0x2d3   : > { %v5532_v63 = vmax.f32 %v5500_v49, 0.0  ;;  %v5373_v22 = vmax.f32 %v5341_v60, 0.0  ;;  %v5344_v58 = vadd.f32 %v8011_v52, %v10607_v38  ;;  %v5343_v3 = vadd.f32 %v8012_v45, %v10607_v38  ;;  %v10676_v27 = vpop.f32.mrb[18].mxu1 }
 0x2d4   : > { %v5786_v25 = vrot.slane %v5687_v14, 5  ;;  %v5811_v40 = vrot.slane %v5687_v14, 7  ;;  %v5836_v53 = vrot.slane %v5687_v14, 1  ;;  %v5880_v0 = vrot.slane %v5751_v59, 3  ;;  %v10678_v39 = vpop.f32.mrb[19].mxu1  ;;  %v10680_v42 = vpop.f32.mrb[20].mxu0 }
 0x2d5   : > { %v5565_v31 = vmax.f32 %v5533_v61, %v10645_v32  ;;  %v5437_v19 = vrot.slane %v5373_v22, 7  ;;  %v5564_v43 = vmax.f32 %v5532_v63, %v5501_v11  ;;  %v5376_v41 = vmax.f32 %v5344_v58, 0.0  ;;  %v10683_v44 = vpop.f32.mrb[21].mxu0 }
 0x2d6   : > { %v5788_v15 = vsel %vm5787_vm10, %v5786_v25, %v5785_v4  ;;  %v5812_v30 = vsel %vm5787_vm10, %v5811_v40, %v5810_v36  ;;  %v5837_v18 = vsel %vm5787_vm10, %v5836_v53, %v5835_v17  ;;  %v5881_v7 = vsel %vm5787_vm10, %v5880_v0, %v5879_v62 }
 0x2d7   : > { %v5903_v37 = vcombine.low %v5788_v15, %v5812_v30  ;;  %v5904_v51 = vcombine.low %v5837_v18, %v5881_v7  ;;  %v5720_v55 = vrot.slane %v5565_v31, 2  ;;  %v5502_v35 = vsel %vm5491_vm7, 0.0, %v5437_v19  ;;  %v10695_v54 = vpop.f32.mrb[20].mxu1 }
 0x2d8   : > { %v5534_v9 = vmax.f32 %v5501_v11, %v5502_v35  ;;  %v5535_v34 = vmax.f32 %v10645_v32, %v5437_v19  ;;  %v5608_v56 = vrot.slane %v5564_v43, 1  ;;  %v5656_v47 = vrot.slane %v5564_v43, 2  ;;  %v10698_v50 = vpop.f32.mrb[21].mxu1  ;;  %v10700_v16 = vpop.f32.mrb[22].mxu0 }
 0x2d9   : > { %5919 = vst [vmem:[%s10688_s10] sm:$0xff] %v5903_v37  ;;  %5920 = vst [vmem:[%s10688_s10 + $0x8] sm:$0xff] %v5904_v51  ;;  %v10704_v36 = vrot.slane %v5376_v41, 7  ;;  %v5375_v21 = vmax.f32 %v5343_v3, 0.0  ;;  %v5503_v10 = vsel %vm5491_vm7, 0.0, %v10666_v33  ;;  %v8013_v8 = vadd.f32 %v10633_v2, %v10643_v26  ;;  %v10710_v23 = vpop.f32.mrb[23].mxu0 }
 0x2da   : > { %v5567_v32 = vmax.f32 %v5535_v34, %v10666_v33  ;;  %v5640_v4 = vmax.f32 %v5564_v43, %v5608_v56  ;;  %v5566_v17 = vmax.f32 %v5534_v9, %v5503_v10  ;;  %v8014_v12 = vadd.f32 %v10637_v20, %v10649_v46 }
 0x2db   : > { %v5439_v28 = vrot.slane %v5375_v21, 7  ;;  %v5346_v48 = vadd.f32 %v8013_v8, %v10607_v38  ;;  %v8015_v62 = vadd.f32 %v10651_v13, %v7465_v24  ;;  %v10717_v5 = vpop.f32.mrb[22].mxu1  ;;  %v10721_v2 = vsel %vm5491_vm7, 0.0, %v10704_v36 }
 0x2dc   : > { %v5688_v11 = vmax.f32 %v5640_v4, %v5656_v47  ;;  %v5752_v60 = vmax.f32 %v5640_v4, %v5720_v55  ;;  %v5609_v52 = vrot.slane %v5566_v17, 1  ;;  %v10723_v26 = vpop.f32.mrb[23].mxu1  ;;  %v10725_v45 = vpop.f32.mrb[24].mxu0  ;;  %v5721_v14 = vrot.slane %v5567_v32, 2 }
 0x2dd   : > { %v5504_v20 = vsel %vm5491_vm7, 0.0, %v5439_v28  ;;  %v5537_v46 = vmax.f32 %v10666_v33, %v5439_v28  ;;  %v5378_v59 = vmax.f32 %v5346_v48, 0.0  ;;  %v10729_v13 = vpop.f32.mrb[25].mxu0  ;;  %v5657_v63 = vrot.slane %v5566_v17, 2 }
 0x2de   : > { %v5813_v24 = vrot.slane %v5688_v11, 2  ;;  %v5838_v49 = vrot.slane %v5688_v11, 4  ;;  %v5536_v61 = vmax.f32 %v5503_v10, %v5504_v20  ;;  %v5641_v58 = vmax.f32 %v5566_v17, %v5609_v52 }
 0x2df   : > { %v5569_v22 = vmax.f32 %v5537_v46, %v10704_v36  ;;  %v5442_v3 = vrot.slane %v5378_v59, 7  ;;  %v5345_v25 = vadd.f32 %v8014_v12, %v10607_v38  ;;  %v10733_v40 = vpop.f32.mrb[24].mxu1  ;;  %v5348_v0 = vadd.f32 %v8015_v62, %v10607_v38 }
 0x2e0   : > { %v5568_v53 = vmax.f32 %v5536_v61, %v10721_v2  ;;  %v8016_v33 = vadd.f32 %v10654_v1, %v10662_v57  ;;  %v8017_v31 = vadd.f32 %v10664_v29, %v10676_v27  ;;  %v10741_v19 = vpop.f32.mrb[25].mxu1  ;;  %v10743_v43 = vpop.f32.mrb[26].mxu0  ;;  %v5882_v41 = vrot.slane %v5752_v60, 6 }
 0x2e1   : > { %v5689_v15 = vmax.f32 %v5641_v58, %v5657_v63  ;;  %v5722_v30 = vrot.slane %v5569_v22, 2  ;;  %v5753_v18 = vmax.f32 %v5641_v58, %v5721_v14  ;;  %v10745_v7 = vpop.f32.mrb[27].mxu0  ;;  %v5507_v37 = vsel %vm5491_vm7, 0.0, %v5442_v3 }
 0x2e2   : > { %v5377_v51 = vmax.f32 %v5345_v25, 0.0  ;;  %v5610_v55 = vrot.slane %v5568_v53, 1  ;;  %v5658_v35 = vrot.slane %v5568_v53, 2  ;;  %v5380_v47 = vmax.f32 %v5348_v0, 0.0 }
 0x2e3   : > { %v5789_v9 = vrot.slane %v5689_v15, 7  ;;  %v5814_v1 = vrot.slane %v5689_v15, 1  ;;  %v5839_v57 = vrot.slane %v5689_v15, 3  ;;  %v5883_v34 = vrot.slane %v5753_v18, 5  ;;  %v10748_v29 = vpop.f32.mrb[26].mxu1 }
 0x2e4   : > { %v5441_v27 = vrot.slane %v5377_v51, 7  ;;  %v5642_v56 = vmax.f32 %v5568_v53, %v5610_v55  ;;  %v5347_v21 = vadd.f32 %v8016_v33, %v10607_v38  ;;  %v10751_v10 = vpop.f32.mrb[27].mxu1  ;;  %v10753_v8 = vpop.f32.mrb[28].mxu0  ;;  %v5350_v46 = vadd.f32 %v8017_v31, %v10607_v38 }
 0x2e5   : > { %v5790_v32 = vsel %vm5781_vm8, %v5789_v9, %v5688_v11  ;;  %v5815_v4 = vsel %vm5781_vm8, %v5814_v1, %v5813_v24  ;;  %v5840_v17 = vsel %vm5781_vm8, %v5839_v57, %v5838_v49  ;;  %v5884_v12 = vsel %vm5781_vm8, %v5883_v34, %v5882_v41  ;;  %v10759_v28 = vpop.f32.mrb[29].mxu0 }
 0x2e6   : > { %v5506_v48 = vsel %vm5491_vm7, 0.0, %v5441_v27  ;;  %v5539_v62 = vmax.f32 %v10704_v36, %v5441_v27  ;;  %v5690_v60 = vmax.f32 %v5642_v56, %v5658_v35  ;;  %v5754_v52 = vmax.f32 %v5642_v56, %v5722_v30 }
 0x2e7   : > { %v5538_v14 = vmax.f32 %v10721_v2, %v5506_v48  ;;  %v5379_v20 = vmax.f32 %v5347_v21, 0.0  ;;  %v8018_v11 = vadd.f32 %v10670_v6, %v10678_v39  ;;  %v10767_v59 = vpop.f32.mrb[28].mxu1  ;;  %v5444_v2 = vrot.slane %v5380_v47, 7 }
 0x2e8   : > { %v5571_v24 = vmax.f32 %v5539_v62, %v5442_v3  ;;  %v5791_v49 = vrot.slane %v5690_v60, 6  ;;  %v5816_v61 = vsel %vm5784_vm9, %v5690_v60, %v5815_v4  ;;  %v5841_v63 = vrot.slane %v5690_v60, 2  ;;  %v10770_v22 = vpop.f32.mrb[29].mxu1  ;;  %v10772_v36 = vpop.f32.mrb[30].mxu0 }
 0x2e9   : > { %v5570_v58 = vmax.f32 %v5538_v14, %v5507_v37  ;;  %v5885_v25 = vrot.slane %v5754_v52, 4  ;;  %v5443_v53 = vrot.slane %v5379_v20, 7  ;;  %v10774_v0 = vpop.f32.mrb[31].mxu0  ;;  %v5382_v39 = vmax.f32 %v5350_v46, 0.0 }
 0x2ea   : > { %v5792_v33 = vsel %vm5784_vm9, %v5791_v49, %v5790_v32  ;;  %v5842_v6 = vsel %vm5784_vm9, %v5841_v63, %v5840_v17  ;;  %v5349_v3 = vadd.f32 %v8018_v11, %v10607_v38  ;;  %v5723_v41 = vrot.slane %v5571_v24, 2 }
 0x2eb   : > { %v5611_v31 = vrot.slane %v5570_v58, 1  ;;  %v5886_v15 = vsel %vm5784_vm9, %v5885_v25, %v5884_v12  ;;  %v5508_v30 = vsel %vm5491_vm7, 0.0, %v5443_v53  ;;  %v10781_v18 = vpop.f32.mrb[30].mxu1  ;;  %v5659_v37 = vrot.slane %v5570_v58, 2 }
 0x2ec   : > { %v5540_v51 = vmax.f32 %v5508_v30, 0.0  ;;  %v5541_v55 = vmax.f32 %v5443_v53, 0.0  ;;  %v5381_v35 = vmax.f32 %v5349_v3, 0.0  ;;  %v10783_v9 = vpop.f32.mrb[31].mxu1  ;;  %v5509_v57 = vsel %vm5491_vm7, 0.0, %v5444_v2 }
 0x2ed   : > { %v5643_v1 = vmax.f32 %v5570_v58, %v5611_v31  ;;  %v8019_v34 = vadd.f32 %v10680_v42, %v10695_v54  ;;  %v8020_v27 = vadd.f32 %v10683_v44, %v10698_v50  ;;  %v5446_v47 = vrot.slane %v5382_v39, 7 }
 0x2ee   : > { %v5573_v56 = vmax.f32 %v5541_v55, %v5444_v2  ;;  %v5445_v21 = vrot.slane %v5381_v35, 7  ;;  %v5572_v32 = vmax.f32 %v5540_v51, %v5509_v57 }
 0x2ef   : > { %v5691_v4 = vmax.f32 %v5643_v1, %v5659_v37  ;;  %v5755_v17 = vmax.f32 %v5643_v1, %v5723_v41  ;;  %v5352_v12 = vadd.f32 %v8019_v34, %v10607_v38  ;;  %v5351_v48 = vadd.f32 %v8020_v27, %v10607_v38 }
 0x2f0   : > { %v5724_v62 = vrot.slane %v5573_v56, 2  ;;  %v5510_v60 = vsel %vm5491_vm7, 0.0, %v5445_v21  ;;  %v5543_v52 = vmax.f32 %v5444_v2, %v5445_v21  ;;  %v5612_v14 = vrot.slane %v5572_v32, 1 }
 0x2f1   : > { %v5793_v20 = vrot.slane %v5691_v4, 5  ;;  %v5817_v42 = vrot.slane %v5691_v4, 7  ;;  %v5843_v54 = vrot.slane %v5691_v4, 1  ;;  %v5887_v46 = vrot.slane %v5755_v17, 3 }
 0x2f2   : > { %v5542_v44 = vmax.f32 %v5509_v57, %v5510_v60  ;;  %v5575_v50 = vmax.f32 %v5543_v52, %v5446_v47  ;;  %v5644_v11 = vmax.f32 %v5572_v32, %v5612_v14  ;;  %v5660_v24 = vrot.slane %v5572_v32, 2 }
 0x2f3   : > { %v5794_v49 = vsel %vm5787_vm10, %v5793_v20, %v5792_v33  ;;  %v5818_v63 = vsel %vm5787_vm10, %v5817_v42, %v5816_v61  ;;  %v5844_v58 = vsel %vm5787_vm10, %v5843_v54, %v5842_v6  ;;  %v5888_v25 = vsel %vm5787_vm10, %v5887_v46, %v5886_v15 }
 0x2f4   : > { %v5905_v2 = vcombine.low %v5794_v49, %v5818_v63  ;;  %v5906_v53 = vcombine.low %v5844_v58, %v5888_v25  ;;  %v5692_v39 = vmax.f32 %v5644_v11, %v5660_v24  ;;  %v5511_v3 = vsel %vm5491_vm7, 0.0, %v5446_v47 }
 0x2f5   : > { %v5756_v31 = vmax.f32 %v5644_v11, %v5724_v62  ;;  %v5384_v41 = vmax.f32 %v5352_v12, 0.0  ;;  %v5383_v30 = vmax.f32 %v5351_v48, 0.0  ;;  %v5574_v37 = vmax.f32 %v5542_v44, %v5511_v3 }
 0x2f6   : > { %5921 = vst [vmem:[%s10688_s10 + $0x10] sm:$0xff] %v5905_v2  ;;  %5922 = vst [vmem:[%s10688_s10 + $0x18] sm:$0xff] %v5906_v53  ;;  %v5725_v51 = vrot.slane %v5575_v50, 2  ;;  %v5819_v55 = vrot.slane %v5692_v39, 2  ;;  %v8021_v61 = vadd.f32 %v10700_v16, %v10717_v5  ;;  %v8022_v33 = vadd.f32 %v10710_v23, %v10723_v26 }
 0x2f7   : > { %v5845_v6 = vrot.slane %v5692_v39, 4  ;;  %v5448_v15 = vrot.slane %v5384_v41, 7  ;;  %v5447_v35 = vrot.slane %v5383_v30, 7  ;;  %v5613_v1 = vrot.slane %v5574_v37, 1 }
 0x2f8   : > { %v5661_v57 = vrot.slane %v5574_v37, 2  ;;  %v5354_v34 = vadd.f32 %v8021_v61, %v10607_v38  ;;  %v5353_v27 = vadd.f32 %v8022_v33, %v10607_v38  ;;  %v8023_v56 = vadd.f32 %v10725_v45, %v10733_v40 }
 0x2f9   : > { %v5512_v21 = vsel %vm5491_vm7, 0.0, %v5447_v35  ;;  %v5545_v32 = vmax.f32 %v5446_v47, %v5447_v35  ;;  %v5645_v4 = vmax.f32 %v5574_v37, %v5613_v1  ;;  %v5513_v16 = vsel %vm5491_vm7, 0.0, %v5448_v15 }
 0x2fa   : > { %v5544_v5 = vmax.f32 %v5511_v3, %v5512_v21  ;;  %v5386_v23 = vmax.f32 %v5354_v34, 0.0  ;;  %v5385_v26 = vmax.f32 %v5353_v27, 0.0  ;;  %v5356_v17 = vadd.f32 %v8023_v56, %v10607_v38 }
 0x2fb   : > { %v5577_v12 = vmax.f32 %v5545_v32, %v5448_v15  ;;  %v5693_v48 = vmax.f32 %v5645_v4, %v5661_v57  ;;  %v5757_v62 = vmax.f32 %v5645_v4, %v5725_v51  ;;  %v8024_v60 = vadd.f32 %v10729_v13, %v10741_v19 }
 0x2fc   : > { %v5889_v52 = vrot.slane %v5756_v31, 6  ;;  %v5450_v14 = vrot.slane %v5386_v23, 7  ;;  %v5449_v45 = vrot.slane %v5385_v26, 7  ;;  %v5576_v40 = vmax.f32 %v5544_v5, %v5513_v16 }
 0x2fd   : > { %v5795_v20 = vrot.slane %v5693_v48, 7  ;;  %v5820_v47 = vrot.slane %v5693_v48, 1  ;;  %v5846_v42 = vrot.slane %v5693_v48, 3  ;;  %v5388_v54 = vmax.f32 %v5356_v17, 0.0 }
 0x2fe   : > { %v5726_v46 = vrot.slane %v5577_v12, 2  ;;  %v5890_v44 = vrot.slane %v5757_v62, 5  ;;  %v5514_v50 = vsel %vm5491_vm7, 0.0, %v5449_v45  ;;  %v5547_v11 = vmax.f32 %v5448_v15, %v5449_v45 }
 0x2ff   : > { %v5796_v24 = vsel %vm5781_vm8, %v5795_v20, %v5692_v39  ;;  %v5515_v49 = vsel %vm5491_vm7, 0.0, %v5450_v14  ;;  %v5546_v63 = vmax.f32 %v5513_v16, %v5514_v50  ;;  %v5614_v58 = vrot.slane %v5576_v40, 1 }
 0x300   : > { %v5579_v13 = vmax.f32 %v5547_v11, %v5450_v14  ;;  %v5821_v19 = vsel %vm5781_vm8, %v5820_v47, %v5819_v55  ;;  %v5847_v25 = vsel %vm5781_vm8, %v5846_v42, %v5845_v6  ;;  %v5891_v2 = vsel %vm5781_vm8, %v5890_v44, %v5889_v52 }
 0x301   : > { %v5578_v53 = vmax.f32 %v5546_v63, %v5515_v49  ;;  %v5646_v3 = vmax.f32 %v5576_v40, %v5614_v58  ;;  %v5662_v31 = vrot.slane %v5576_v40, 2  ;;  %v5355_v41 = vadd.f32 %v8024_v60, %v10607_v38 }
 0x302   : > { %v5452_v30 = vrot.slane %v5388_v54, 7  ;;  %v8025_v39 = vadd.f32 %v10743_v43, %v10748_v29  ;;  %v8026_v37 = vadd.f32 %v10745_v7, %v10751_v10  ;;  %v8027_v51 = vadd.f32 %v10753_v8, %v10767_v59 }
 0x303   : > { %v5615_v55 = vrot.slane %v5578_v53, 1  ;;  %v5694_v61 = vmax.f32 %v5646_v3, %v5662_v31  ;;  %v5727_v33 = vrot.slane %v5579_v13, 2  ;;  %v5758_v6 = vmax.f32 %v5646_v3, %v5726_v46 }
 0x304   : > { %v5663_v15 = vrot.slane %v5578_v53, 2  ;;  %v5387_v35 = vmax.f32 %v5355_v41, 0.0  ;;  %v5358_v1 = vadd.f32 %v8025_v39, %v10607_v38  ;;  %v5357_v57 = vadd.f32 %v8026_v37, %v10607_v38 }
 0x305   : > { %v5647_v34 = vmax.f32 %v5578_v53, %v5615_v55  ;;  %v5797_v27 = vrot.slane %v5694_v61, 6  ;;  %v5822_v43 = vsel %vm5784_vm9, %v5694_v61, %v5821_v19  ;;  %v5848_v29 = vrot.slane %v5694_v61, 2 }
 0x306   : > { %v5892_v56 = vrot.slane %v5758_v6, 4  ;;  %v5451_v7 = vrot.slane %v5387_v35, 7  ;;  %v5390_v10 = vmax.f32 %v5358_v1, 0.0  ;;  %v5389_v21 = vmax.f32 %v5357_v57, 0.0 }
 0x307   : > { %v5695_v8 = vmax.f32 %v5647_v34, %v5663_v15  ;;  %v5759_v59 = vmax.f32 %v5647_v34, %v5727_v33  ;;  %v5798_v32 = vsel %vm5784_vm9, %v5797_v27, %v5796_v24  ;;  %v5849_v4 = vsel %vm5784_vm9, %v5848_v29, %v5847_v25 }
 0x308   : > { %v5893_v16 = vsel %vm5784_vm9, %v5892_v56, %v5891_v2  ;;  %v5516_v5 = vsel %vm5491_vm7, 0.0, %v5451_v7  ;;  %v5549_v23 = vmax.f32 %v5451_v7, 0.0  ;;  %v5454_v26 = vrot.slane %v5390_v10, 7 }
 0x309   : > { %v5799_v17 = vrot.slane %v5695_v8, 5  ;;  %v5823_v12 = vrot.slane %v5695_v8, 7  ;;  %v5850_v48 = vrot.slane %v5695_v8, 1  ;;  %v5894_v62 = vrot.slane %v5759_v59, 3 }
 0x30a   : > { %v5548_v60 = vmax.f32 %v5516_v5, 0.0  ;;  %v5581_v52 = vmax.f32 %v5549_v23, %v5452_v30  ;;  %v5453_v14 = vrot.slane %v5389_v21, 7  ;;  %v5360_v45 = vadd.f32 %v8027_v51, %v10607_v38 }
 0x30b   : > { %v5800_v40 = vsel %vm5787_vm10, %v5799_v17, %v5798_v32  ;;  %v5824_v20 = vsel %vm5787_vm10, %v5823_v12, %v5822_v43  ;;  %v5851_v47 = vsel %vm5787_vm10, %v5850_v48, %v5849_v4  ;;  %v5895_v42 = vsel %vm5787_vm10, %v5894_v62, %v5893_v16 }
 0x30c   : > { %v5907_v54 = vcombine.low %v5800_v40, %v5824_v20  ;;  %v5908_v46 = vcombine.low %v5851_v47, %v5895_v42  ;;  %v5517_v44 = vsel %vm5491_vm7, 0.0, %v5452_v30  ;;  %v5518_v50 = vsel %vm5491_vm7, 0.0, %v5453_v14 }
 0x30d   : > { %v5550_v11 = vmax.f32 %v5517_v44, %v5518_v50  ;;  %v5551_v24 = vmax.f32 %v5452_v30, %v5453_v14  ;;  %v5580_v49 = vmax.f32 %v5548_v60, %v5517_v44  ;;  %v5392_v63 = vmax.f32 %v5360_v45, 0.0 }
 0x30e   : > { %5923 = vst [vmem:[%s10688_s10 + $0x20] sm:$0xff] %v5907_v54  ;;  %5924 = vst [vmem:[%s10688_s10 + $0x28] sm:$0xff] %v5908_v46  ;;  %v8028_v58 = vadd.f32 %v10759_v28, %v10770_v22  ;;  %v8029_v13 = vadd.f32 %v10772_v36, %v10781_v18  ;;  %v8030_v19 = vadd.f32 %v10774_v0, %v10783_v9  ;;  %v5519_v3 = vsel %vm5491_vm7, 0.0, %v5454_v26 }
 0x30f   : > { %v5583_v25 = vmax.f32 %v5551_v24, %v5454_v26  ;;  %v5616_v2 = vrot.slane %v5580_v49, 1  ;;  %v5456_v53 = vrot.slane %v5392_v63, 7  ;;  %v5582_v41 = vmax.f32 %v5550_v11, %v5519_v3 }
 0x310   : > { %v5359_v31 = vadd.f32 %v8028_v58, %v10607_v38  ;;  %v5362_v30 = vadd.f32 %v8029_v13, %v10607_v38  ;;  %v5361_v39 = vadd.f32 %v8030_v19, %v10607_v38  ;;  %v5728_v37 = vrot.slane %v5581_v52, 2 }
 0x311   : > { %v5648_v28 = vmax.f32 %v5580_v49, %v5616_v2  ;;  %v5664_v22 = vrot.slane %v5580_v49, 2  ;;  %v5617_v36 = vrot.slane %v5582_v41, 1  ;;  %v5729_v0 = vrot.slane %v5583_v25, 2 }
 0x312   : > { %v5391_v51 = vmax.f32 %v5359_v31, 0.0  ;;  %v5394_v18 = vmax.f32 %v5362_v30, 0.0  ;;  %v5393_v61 = vmax.f32 %v5361_v39, 0.0  ;;  %v5665_v15 = vrot.slane %v5582_v41, 2 }
 0x313   : > { %v5696_v55 = vmax.f32 %v5648_v28, %v5664_v22  ;;  %v5760_v9 = vmax.f32 %v5648_v28, %v5728_v37  ;;  %v5649_v6 = vmax.f32 %v5582_v41, %v5617_v36  ;;  %v5521_v35 = vsel %vm5491_vm7, 0.0, %v5456_v53 }
 0x314   : > { %v5455_v33 = vrot.slane %v5391_v51, 7  ;;  %v5458_v34 = vrot.slane %v5394_v18, 7  ;;  %v5457_v27 = vrot.slane %v5393_v61, 7 }
 0x315   : > { %v5825_v1 = vrot.slane %v5696_v55, 2  ;;  %v5852_v57 = vrot.slane %v5696_v55, 4  ;;  %v5697_v29 = vmax.f32 %v5649_v6, %v5665_v15  ;;  %v5761_v56 = vmax.f32 %v5649_v6, %v5729_v0 }
 0x316   : > { %v5520_v38 = vsel %vm5491_vm7, 0.0, %v5455_v33  ;;  %v5553_v43 = vmax.f32 %v5454_v26, %v5455_v33  ;;  %v5896_v7 = vrot.slane %v5760_v9, 6  ;;  %v5522_v21 = vsel %vm5491_vm7, 0.0, %v5457_v27 }
 0x317   : > { %v5552_v10 = vmax.f32 %v5519_v3, %v5520_v38  ;;  %v5555_v8 = vmax.f32 %v5456_v53, %v5457_v27  ;;  %v5801_v32 = vrot.slane %v5697_v29, 7  ;;  %v5826_v4 = vrot.slane %v5697_v29, 1 }
 0x318   : > { %v5585_v59 = vmax.f32 %v5553_v43, %v5456_v53  ;;  %v5853_v16 = vrot.slane %v5697_v29, 3  ;;  %v5897_v5 = vrot.slane %v5761_v56, 5  ;;  %v5554_v23 = vmax.f32 %v5521_v35, %v5522_v21 }
 0x319   : > { %v5584_v17 = vmax.f32 %v5552_v10, %v5521_v35  ;;  %v5587_v12 = vmax.f32 %v5555_v8, %v5458_v34  ;;  %v5802_v48 = vsel %vm5781_vm8, %v5801_v32, %v5696_v55  ;;  %v5523_v62 = vsel %vm5491_vm7, 0.0, %v5458_v34 }
 0x31a   : > { %v5827_v26 = vsel %vm5781_vm8, %v5826_v4, %v5825_v1  ;;  %v5854_v60 = vsel %vm5781_vm8, %v5853_v16, %v5852_v57  ;;  %v5586_v52 = vmax.f32 %v5554_v23, %v5523_v62  ;;  %v5898_v45 = vsel %vm5781_vm8, %v5897_v5, %v5896_v7 }
 0x31b   : > { %v5618_v14 = vrot.slane %v5584_v17, 1  ;;  %v5730_v40 = vrot.slane %v5585_v59, 2  ;;  %v5666_v42 = vrot.slane %v5584_v17, 2  ;;  %v5731_v54 = vrot.slane %v5587_v12, 2 }
 0x31c   : > { %v5619_v20 = vrot.slane %v5586_v52, 1  ;;  %v5667_v44 = vrot.slane %v5586_v52, 2 }
 0x31d   : > { %v5650_v47 = vmax.f32 %v5584_v17, %v5618_v14 }
 0x31e   : > { %v5651_v46 = vmax.f32 %v5586_v52, %v5619_v20 }
 0x31f   : > { %v5698_v50 = vmax.f32 %v5650_v47, %v5666_v42  ;;  %v5762_v11 = vmax.f32 %v5650_v47, %v5730_v40 }
 0x320   : > { %v5699_v24 = vmax.f32 %v5651_v46, %v5667_v44  ;;  %v5763_v49 = vmax.f32 %v5651_v46, %v5731_v54 }
 0x321   : > { %v5803_v63 = vrot.slane %v5698_v50, 6  ;;  %v5828_v58 = vsel %vm5784_vm9, %v5698_v50, %v5827_v26  ;;  %v5855_v13 = vrot.slane %v5698_v50, 2  ;;  %v5899_v19 = vrot.slane %v5762_v11, 4 }
 0x322   : > { %v5805_v2 = vrot.slane %v5699_v24, 5  ;;  %v5829_v53 = vrot.slane %v5699_v24, 7  ;;  %v5857_v3 = vrot.slane %v5699_v24, 1  ;;  %v5901_v30 = vrot.slane %v5763_v49, 3 }
 0x323   : > { %v5804_v25 = vsel %vm5784_vm9, %v5803_v63, %v5802_v48  ;;  %v5856_v31 = vsel %vm5784_vm9, %v5855_v13, %v5854_v60  ;;  %v5900_v41 = vsel %vm5784_vm9, %v5899_v19, %v5898_v45 }
 0x324   : > { %v5806_v39 = vsel %vm5787_vm10, %v5805_v2, %v5804_v25  ;;  %v5830_v37 = vsel %vm5787_vm10, %v5829_v53, %v5828_v58  ;;  %v5858_v28 = vsel %vm5787_vm10, %v5857_v3, %v5856_v31  ;;  %v5902_v22 = vsel %vm5787_vm10, %v5901_v30, %v5900_v41 }
 0x325   : > { %v5909_v51 = vcombine.low %v5806_v39, %v5830_v37  ;;  %v5910_v36 = vcombine.low %v5858_v28, %v5902_v22 }
 0x327   : > { %5925 = vst [vmem:[%s10688_s10 + $0x30] sm:$0xff] %v5909_v51  ;;  %5926 = vst [vmem:[%s10688_s10 + $0x38] sm:$0xff] %v5910_v36 }
 0x328 PF: > { %s13_s12 = sadd.s32 1, %s8495_s12  }
 0x329   : > { %p10_p4 = scmp.ge.s32.totalorder %s13_s12, 4  }
 0x32b   :  { %12 = sbr.rel (!%p10_p4) target bundleno = 1 (0x1), region = 62 }

</bundles_post_ra>
